<compile_context>
chip_gen: v5e
topology: v5e:2x2
jax: 0.10.0
libtpu: 0.0.40
codegen_flags: <defaults>
</compile_context>

<pallas_src>
import functools

import jax
import jax.numpy as jnp
from jax.experimental import pallas as pl
from jax.experimental.pallas import tpu as pltpu

NEG_INF = -1e9
LN_EPS = 1e-5
APPROX_SOFTMAX_RECIP = True


# ----------------------------------------------------------------------------
# Device-dependent tiling / VMEM choices
# ----------------------------------------------------------------------------

def _device_kind():
    try:
        return jax.devices()[0].device_kind.lower()
    except Exception:
        return ""


def _vmem_limit_bytes():
    kind = _device_kind()
    if "v2" in kind or "v3" in kind:      # small physical VMEM: keep compiler default
        return None
    # Safe on v5e / v6e (128 MiB physical) and v7x (64 MiB physical), above the
    # 32 MiB scoped default.
    return 48 * 1024 * 1024


def _max_row_tile():
    kind = _device_kind()
    if "v7" in kind or "7x" in kind:      # v7x: 64 MiB VMEM -> smaller resident footprint
        return 256
    if "v6" in kind or "v5" in kind:      # v6e / v5e: 128 MiB VMEM -> amortize step overhead
        return 1024
    return 512


def _pick_tile(n, cap):
    """Largest tile <= cap (multiple of 8 when possible) that divides n."""
    for t in (1024, 512, 256, 128, 64, 32, 16, 8):
        if t <= cap and n % t == 0:
            return t
    return n


# ----------------------------------------------------------------------------
# Pallas kernels
# ----------------------------------------------------------------------------

def _linear_bias_kernel(x_ref, w_ref, b_ref, o_ref):
    # o = x @ w + b   (bf16 MXU, f32 accumulate, bf16 store)
    acc = jnp.dot(x_ref[...].astype(jnp.bfloat16), w_ref[...].astype(jnp.bfloat16),
                  preferred_element_type=jnp.float32) + b_ref[...]
    o_ref[...] = acc.astype(o_ref.dtype)


def _ffn_residual_ln_kernel(x_ref, w1_ref, b1_ref, w2_ref, b2_ref, g_ref, be_ref, o_ref):
    # o = LayerNorm(x + linear2(relu(linear1(x))))     (dropout = identity in eval)
    x32 = x_ref[...].astype(jnp.float32)
    h = jnp.dot(x_ref[...].astype(jnp.bfloat16), w1_ref[...].astype(jnp.bfloat16),
                preferred_element_type=jnp.float32) + b1_ref[...]
    h = jnp.maximum(h, 0.0)
    y = jnp.dot(h.astype(jnp.bfloat16), w2_ref[...].astype(jnp.bfloat16),
                preferred_element_type=jnp.float32) + b2_ref[...] + x32
    mu = jnp.mean(y, axis=-1, keepdims=True)
    var = jnp.mean((y - mu) ** 2, axis=-1, keepdims=True)
    y = (y - mu) * jax.lax.rsqrt(var + LN_EPS) * g_ref[...] + be_ref[...]
    o_ref[...] = y.astype(o_ref.dtype)


def _attn_block_kernel(*refs, nhead, head_dim, has_qk_bias, need_weights):
    # Fused: multi-head attention core + output projection (w_o) + bias + residual + LN.
    # One (batch, query-tile) grid step; heads handled in a static unrolled loop.
    idx = 0
    q_ref = refs[idx]; idx += 1            # (1, tq, D)  bf16
    k_ref = refs[idx]; idx += 1            # (1, Tk, D)  bf16
    v_ref = refs[idx]; idx += 1            # (1, Tk, D)  bf16
    kb_ref = refs[idx]; idx += 1           # (1, 1, Tk)  f32 additive key-padding bias
    if has_qk_bias:
        qb_ref = refs[idx]; idx += 1       # (tq, Tk)    f32 additive attn-mask bias
    wo_ref = refs[idx]; idx += 1           # (D, D)      bf16
    bo_ref = refs[idx]; idx += 1           # (1, D)      f32
    r_ref = refs[idx]; idx += 1            # (1, tq, D)  residual
    g_ref = refs[idx]; idx += 1            # (1, D)      LN gamma
    be_ref = refs[idx]; idx += 1           # (1, D)      LN beta
    out_ref = refs[idx]; idx += 1          # (1, tq, D)  bf16
    if need_weights:
        w_ref = refs[idx]; idx += 1        # (1, tq, Tk) bf16 head-averaged weights

    q = q_ref[0]                           # (tq, D)
    k = k_ref[0]                           # (Tk, D)
    v = v_ref[0]                           # (Tk, D)

    bias = kb_ref[0]                       # (1, Tk) -> broadcasts over query rows
    if has_qk_bias:
        bias = bias + qb_ref[...]          # (tq, Tk)

    acc = jnp.zeros((q.shape[0], wo_ref.shape[1]), jnp.float32)
    wsum = None
    for h in range(nhead):                 # static unrolled head loop
        lo = h * head_dim
        qh = q[:, lo:lo + head_dim].astype(jnp.bfloat16)   # scale pre-folded into w_q
        kh = k[:, lo:lo + head_dim].astype(jnp.bfloat16)
        vh = v[:, lo:lo + head_dim].astype(jnp.bfloat16)
        # q @ k^T without materializing the transpose.
        s = jax.lax.dot_general(qh, kh, dimension_numbers=(((1,), (1,)), ((), ())),
                                preferred_element_type=jnp.float32) + bias
        m = jnp.max(s, axis=-1, keepdims=True)
        p = jnp.exp(s - m)
        denom = jnp.sum(p, axis=-1, keepdims=True)
        if APPROX_SOFTMAX_RECIP:
            p = p * pl.reciprocal(denom, approx=True)       # EUP slot, ~free
        else:
            p = p / denom
        ctx_h = jnp.dot(p.astype(jnp.bfloat16), vh, preferred_element_type=jnp.float32)
        # Fused output projection: accumulate ctx_h @ w_o[h] -> no ctx concat/store.
        acc = acc + jnp.dot(ctx_h.astype(jnp.bfloat16),
                            wo_ref[lo:lo + head_dim, :].astype(jnp.bfloat16),
                            preferred_element_type=jnp.float32)
        if need_weights:
            wsum = p if wsum is None else wsum + p

    # bias + residual + LayerNorm epilogue (all f32, bf16 store)
    y = acc + bo_ref[...] + r_ref[0].astype(jnp.float32)
    mu = jnp.mean(y, axis=-1, keepdims=True)
    var = jnp.mean((y - mu) ** 2, axis=-1, keepdims=True)
    y = (y - mu) * jax.lax.rsqrt(var + LN_EPS) * g_ref[...] + be_ref[...]
    out_ref[0] = y.astype(out_ref.dtype)
    if need_weights:
        w_ref[0] = (wsum * (1.0 / nhead)).astype(w_ref.dtype)


# ----------------------------------------------------------------------------
# pallas_call wrappers
# ----------------------------------------------------------------------------

def fused_linear(x, w, b, *, out_dtype=jnp.bfloat16):
    # x: (M, K), w: (K, N) bf16, b: (N,) f32 -> (M, N) bf16
    M, K = x.shape
    N = w.shape[1]
    bm = _pick_tile(M, _max_row_tile())
    return pl.pallas_call(
        _linear_bias_kernel,
        grid=(M // bm,),
        in_specs=[
            pl.BlockSpec((bm, K), lambda i: (i, 0)),
            pl.BlockSpec((K, N), lambda i: (0, 0)),
            pl.BlockSpec((1, N), lambda i: (0, 0)),
        ],
        out_specs=pl.BlockSpec((bm, N), lambda i: (i, 0)),
        out_shape=jax.ShapeDtypeStruct((M, N), out_dtype),
        compiler_params=pltpu.CompilerParams(
            dimension_semantics=("parallel",),
            vmem_limit_bytes=_vmem_limit_bytes()),
    )(x, w, b.reshape(1, N))


def ffn_residual_ln(x, w1, b1, w2, b2, gamma, beta, *, out_dtype=jnp.bfloat16):
    # LayerNorm(x + relu(x @ w1 + b1) @ w2 + b2)
    # TODO(synk): on v7x, pipeline_mode=pl.Buffered(1) on the constant weight specs
    # would reclaim the second weight buffer; omitted here for compile safety.
    M, D = x.shape
    dff = w1.shape[1]
    bm = _pick_tile(M, _max_row_tile())
    return pl.pallas_call(
        _ffn_residual_ln_kernel,
        grid=(M // bm,),
        in_specs=[
            pl.BlockSpec((bm, D), lambda i: (i, 0)),
            pl.BlockSpec((D, dff), lambda i: (0, 0)),
            pl.BlockSpec((1, dff), lambda i: (0, 0)),
            pl.BlockSpec((dff, D), lambda i: (0, 0)),
            pl.BlockSpec((1, D), lambda i: (0, 0)),
            pl.BlockSpec((1, D), lambda i: (0, 0)),
            pl.BlockSpec((1, D), lambda i: (0, 0)),
        ],
        out_specs=pl.BlockSpec((bm, D), lambda i: (i, 0)),
        out_shape=jax.ShapeDtypeStruct((M, D), out_dtype),
        compiler_params=pltpu.CompilerParams(
            dimension_semantics=("parallel",),
            vmem_limit_bytes=_vmem_limit_bytes()),
    )(x, w1, b1.reshape(1, dff), w2, b2.reshape(1, D),
      gamma.reshape(1, D), beta.reshape(1, D))


def attn_block(q_arr, q_col, k_arr, k_col, v_arr, v_col, k_bias, qk_bias,
               w_o, b_o, resid, gamma, beta, *, nhead, need_weights=True,
               out_dtype=jnp.bfloat16, weights_dtype=jnp.bfloat16):
    """Fused MHA + out-proj + residual + LN.

    q/k/v are given as (array, lane-block column) pairs so the fused QKV / KV
    projection outputs are consumed in place (no host-side slicing copies).
    """
    B, Tq, D = resid.shape
    Tk = k_arr.shape[1]
    head_dim = D // nhead
    tq = _pick_tile(Tq, 256)
    has_qk_bias = qk_bias is not None

    kernel = functools.partial(_attn_block_kernel, nhead=nhead, head_dim=head_dim,
                               has_qk_bias=has_qk_bias, need_weights=need_weights)

    in_specs = [
        pl.BlockSpec((1, tq, D), lambda b, qi: (b, qi, q_col)),
        pl.BlockSpec((1, Tk, D), lambda b, qi: (b, 0, k_col)),   # resident over qi
        pl.BlockSpec((1, Tk, D), lambda b, qi: (b, 0, v_col)),   # resident over qi
        pl.BlockSpec((1, 1, Tk), lambda b, qi: (b, 0, 0)),
    ]
    operands = [q_arr, k_arr, v_arr, k_bias.reshape(B, 1, Tk)]
    if has_qk_bias:
        in_specs.append(pl.BlockSpec((tq, Tk), lambda b, qi: (qi, 0)))
        operands.append(qk_bias)
    in_specs += [
        pl.BlockSpec((D, D), lambda b, qi: (0, 0)),
        pl.BlockSpec((1, D), lambda b, qi: (0, 0)),
        pl.BlockSpec((1, tq, D), lambda b, qi: (b, qi, 0)),
        pl.BlockSpec((1, D), lambda b, qi: (0, 0)),
        pl.BlockSpec((1, D), lambda b, qi: (0, 0)),
    ]
    operands += [w_o, b_o.reshape(1, D), resid, gamma.reshape(1, D), beta.reshape(1, D)]

    out_specs = [pl.BlockSpec((1, tq, D), lambda b, qi: (b, qi, 0))]
    out_shape = [jax.ShapeDtypeStruct((B, Tq, D), out_dtype)]
    if need_weights:
        out_specs.append(pl.BlockSpec((1, tq, Tk), lambda b, qi: (b, qi, 0)))
        out_shape.append(jax.ShapeDtypeStruct((B, Tq, Tk), weights_dtype))

    outs = pl.pallas_call(
        kernel,
        grid=(B, Tq // tq),
        in_specs=in_specs,
        out_specs=out_specs,
        out_shape=out_shape,
        compiler_params=pltpu.CompilerParams(
            dimension_semantics=("parallel", "parallel"),
            vmem_limit_bytes=_vmem_limit_bytes()),
    )(*operands)
    if need_weights:
        return outs[0], outs[1]
    return outs[0], None


# ----------------------------------------------------------------------------
# Module glue (tiny host-side bias builders + fused projections)
# ----------------------------------------------------------------------------

def _key_padding_bias(key_padding_mask, B, Tk, valid_len=None):
    # Additive (B, Tk) f32 bias (tiny; the big (B,Tq,Tk) bias is built in-kernel).
    bias = jnp.zeros((B, Tk), jnp.float32)
    if valid_len is not None and valid_len < Tk:     # padded key columns
        bias = bias + jnp.where(jnp.arange(Tk)[None, :] >= valid_len, NEG_INF, 0.0)
    if key_padding_mask is not None:                 # True == padded (masked out)
        Tm = key_padding_mask.shape[1]
        m = key_padding_mask if Tm == Tk else jnp.pad(key_padding_mask,
                                                      ((0, 0), (0, Tk - Tm)))
        bias = bias + jnp.where(m, NEG_INF, 0.0)
    return bias


def _attn_mask_bias(attn_mask):
    if attn_mask is None:
        return None
    if attn_mask.dtype == jnp.bool_:
        return jnp.where(attn_mask, NEG_INF, 0.0).astype(jnp.float32)
    return attn_mask.astype(jnp.float32)


def paired_transformer_encoder_layer(params, src, global_emotion, local_emotion,
                                     src_mask=None, src_key_padding_mask=None,
                                     emotion_key_padding_mask=None, *, nhead):
    """Forward of PairedTransformerEncoderLayer (eval mode; dropout = identity).

    src:            (T, B, D)   seq-first (PyTorch convention)
    global_emotion: (1, B, D)
    local_emotion:  (Temo, B, D)
    returns (src_out (T, B, D) bf16, attn (B, T, T) bf16, attn_emo (B, T, Temo) bf16)
    Expects params pre-processed by fold_attention_scale (Q scale folded into w_q).
    """
    T, B, D = src.shape
    Temo = local_emotion.shape[0]

    # Batch-first bf16 internal layout: one transpose in / one out.
    x = jnp.transpose(src, (1, 0, 2)).astype(jnp.bfloat16)                     # (B, T, D)
    emo = jnp.transpose(
        jnp.broadcast_to(global_emotion, (Temo, B, D)) + local_emotion,
        (1, 0, 2)).astype(jnp.bfloat16)                                        # (B, Temo, D)

    # Pad emotion key length to a multiple of 128 for lane-dense scores / weights.
    Temo_pad = ((Temo + 127) // 128) * 128
    if Temo_pad != Temo:
        emo = jnp.pad(emo, ((0, 0), (0, Temo_pad - Temo), (0, 0)))

    sa = params["self_attn"]
    ea = params["emo_attn"]

    # ---- self-attention block:  src = norm1(src + self_attn(src, src, src)) ----
    qkv = fused_linear(x.reshape(B * T, D), sa["w_qkv"], sa["b_qkv"]).reshape(B, T, 3 * D)
    kb = _key_padding_bias(src_key_padding_mask, B, T)
    qb = _attn_mask_bias(src_mask)
    x, attn = attn_block(qkv, 0, qkv, 1, qkv, 2, kb, qb,
                         sa["w_o"], sa["b_o"], x,
                         params["ln1_g"], params["ln1_b"], nhead=nhead)

    # ---- FFN 1:  src = norm2(src + linear2(relu(linear1(src)))) ----
    x = ffn_residual_ln(x.reshape(B * T, D), params["w1"], params["b1"],
                        params["w2"], params["b2"],
                        params["ln2_g"], params["ln2_b"]).reshape(B, T, D)

    # ---- emotion cross-attention:  src = norm3(src + attn3(src, emo, emo)) ----
    q = fused_linear(x.reshape(B * T, D), ea["w_q"], ea["b_q"]).reshape(B, T, D)
    kv = fused_linear(emo.reshape(B * Temo_pad, D), ea["w_kv"],
                      ea["b_kv"]).reshape(B, Temo_pad, 2 * D)
    kb_emo = _key_padding_bias(emotion_key_padding_mask, B, Temo_pad, valid_len=Temo)
    x, attn_emo = attn_block(q, 0, kv, 0, kv, 1, kb_emo, None,
                             ea["w_o"], ea["b_o"], x,
                             params["ln3_g"], params["ln3_b"], nhead=nhead)
    attn_emo = attn_emo[:, :, :Temo]     # drop padded key columns (weights there ~0)

    # ---- FFN 2:  src = norm4(src + linear4(relu(linear3(src)))) ----
    x = ffn_residual_ln(x.reshape(B * T, D), params["w3"], params["b3"],
                        params["w4"], params["b4"],
                        params["ln4_g"], params["ln4_b"]).reshape(B, T, D)

    return jnp.transpose(x, (1, 0, 2)), attn, attn_emo


# ----------------------------------------------------------------------------
# Parameters
# ----------------------------------------------------------------------------

def _dense_init(key, shape, scale):
    return (jax.random.normal(key, shape, jnp.float32) * scale).astype(jnp.bfloat16)


def init_params(key, d, dff):
    ks = jax.random.split(key, 9)
    s = d ** -0.5
    sf = dff ** -0.5
    return {
        "self_attn": {
            "w_qkv": _dense_init(ks[0], (d, 3 * d), s),
            "b_qkv": jnp.zeros((3 * d,), jnp.float32),
            "w_o": _dense_init(ks[1], (d, d), s),
            "b_o": jnp.zeros((d,), jnp.float32),
        },
        "emo_attn": {
            "w_q": _dense_init(ks[2], (d, d), s),
            "b_q": jnp.zeros((d,), jnp.float32),
            "w_kv": _dense_init(ks[3], (d, 2 * d), s),
            "b_kv": jnp.zeros((2 * d,), jnp.float32),
            "w_o": _dense_init(ks[4], (d, d), s),
            "b_o": jnp.zeros((d,), jnp.float32),
        },
        "w1": _dense_init(ks[5], (d, dff), s), "b1": jnp.zeros((dff,), jnp.float32),
        "w2": _dense_init(ks[6], (dff, d), sf), "b2": jnp.zeros((d,), jnp.float32),
        "w3": _dense_init(ks[7], (d, dff), s), "b3": jnp.zeros((dff,), jnp.float32),
        "w4": _dense_init(ks[8], (dff, d), sf), "b4": jnp.zeros((d,), jnp.float32),
        "ln1_g": jnp.ones((d,), jnp.float32), "ln1_b": jnp.zeros((d,), jnp.float32),
        "ln2_g": jnp.ones((d,), jnp.float32), "ln2_b": jnp.zeros((d,), jnp.float32),
        "ln3_g": jnp.ones((d,), jnp.float32), "ln3_b": jnp.zeros((d,), jnp.float32),
        "ln4_g": jnp.ones((d,), jnp.float32), "ln4_b": jnp.zeros((d,), jnp.float32),
    }


def fold_attention_scale(params, nhead):
    """Fold 1/sqrt(head_dim) into the Q projection weights/bias (run once, e.g. after
    loading PyTorch weights). The attention kernel then needs no per-head scale."""
    params = jax.tree_util.tree_map(lambda a: a, params)   # copy containers, share leaves
    D = params["self_attn"]["w_o"].shape[0]
    scale = float(D // nhead) ** -0.5

    sa = params["self_attn"]
    w = sa["w_qkv"].astype(jnp.float32)
    sa["w_qkv"] = w.at[:, :D].multiply(scale).astype(jnp.bfloat16)
    sa["b_qkv"] = sa["b_qkv"].at[:D].multiply(scale)

    ea = params["emo_attn"]
    ea["w_q"] = (ea["w_q"].astype(jnp.float32) * scale).astype(jnp.bfloat16)
    ea["b_q"] = ea["b_q"] * scale
    return params


# ----------------------------------------------------------------------------
# Demo
# ----------------------------------------------------------------------------

if __name__ == "__main__":
    key = jax.random.PRNGKey(0)
    B, D, H = 2, 128, 4          # head_dim = 32
    T, Temo = 8, 8
    dff = 256

    ks = jax.random.split(key, 4)
    params = fold_attention_scale(init_params(ks[0], D, dff), H)

    src = jax.random.normal(ks[1], (T, B, D), jnp.float32)
    global_emotion = jax.random.normal(ks[2], (1, B, D), jnp.float32)
    local_emotion = jax.random.normal(ks[3], (Temo, B, D), jnp.float32)

    def make_pad(n, lengths):
        idx = jnp.arange(n)[None, :]
        return idx >= jnp.array(lengths)[:, None]   # True == padded

    src_kpm = make_pad(T, [8, 6])
    emo_kpm = make_pad(Temo, [8, 7])
    src_mask = jnp.triu(jnp.ones((T, T), jnp.float32), k=1).astype(bool)  # causal

    fwd = jax.jit(paired_transformer_encoder_layer, static_argnames=("nhead",))
    out, attn, attn_emo = fwd(
        params, src, global_emotion, local_emotion,
        src_mask=src_mask, src_key_padding_mask=src_kpm,
        emotion_key_padding_mask=emo_kpm, nhead=H)

    jax.block_until_ready((out, attn, attn_emo))
    print("KERNEL_OK")
</pallas_src>

<mosaic_0001>
module attributes {stable_mosaic.version = 11 : i64} {
  func.func @_linear_bias_kernel(%arg0: i32, %arg1: memref<16x128xbf16, #tpu.memory_space<vmem>>, %arg2: memref<128x384xbf16, #tpu.memory_space<vmem>>, %arg3: memref<1x384xf32, #tpu.memory_space<vmem>>, %arg4: memref<16x384xbf16, #tpu.memory_space<vmem>>) attributes {dimension_semantics = [#tpu.dimension_semantics<parallel>], iteration_bounds = array<i64: 1>, scalar_prefetch = 0 : i64, scratch_operands = 0 : i64, tpu.core_type = #tpu.core_type<tc>, window_params = [{transform_indices = @transform_0, window_bounds = array<i64: 16, 128>}, {pipeline_mode = #tpu.pipeline_mode<synchronous>, transform_indices = @transform_1, window_bounds = array<i64: 128, 384>}, {pipeline_mode = #tpu.pipeline_mode<synchronous>, transform_indices = @transform_2, window_bounds = array<i64: 1, 384>}, {transform_indices = @transform_3, window_bounds = array<i64: 16, 384>}]} {
    %c0 = arith.constant 0 : index
    %c0_0 = arith.constant 0 : index
    %0 = vector.load %arg1[%c0, %c0_0] : memref<16x128xbf16, #tpu.memory_space<vmem>>, vector<16x128xbf16>
    %c0_1 = arith.constant 0 : index
    %c0_2 = arith.constant 0 : index
    %1 = vector.load %arg2[%c0_1, %c0_2] : memref<128x384xbf16, #tpu.memory_space<vmem>>, vector<128x384xbf16>
    %cst = arith.constant dense<0.000000e+00> : vector<16x384xf32>
    %2 = tpu.matmul %0, %1, %cst {dimension_numbers = #tpu.dot_dimension_numbers<[1], [0], [0], [1], [0, 0, 1, 1], [], []>} : vector<16x128xbf16>, vector<128x384xbf16>, vector<16x384xf32> -> vector<16x384xf32>
    %c0_3 = arith.constant 0 : index
    %c0_4 = arith.constant 0 : index
    %3 = vector.load %arg3[%c0_3, %c0_4] : memref<1x384xf32, #tpu.memory_space<vmem>>, vector<1x384xf32>
    %4 = vector.broadcast %3 : vector<1x384xf32> to vector<16x384xf32>
    %5 = arith.addf %2, %4 : vector<16x384xf32>
    %6 = arith.truncf %5 : vector<16x384xf32> to vector<16x384xbf16>
    %c0_5 = arith.constant 0 : index
    %c0_6 = arith.constant 0 : index
    %7 = vector.load %arg4[%c0_5, %c0_6] : memref<16x384xbf16, #tpu.memory_space<vmem>>, vector<16x384xbf16>
    tpu.vector_store %arg4[%c0_5, %c0_6], %6 {strides = array<i32>} : memref<16x384xbf16, #tpu.memory_space<vmem>>, vector<16x384xbf16>,
    return
  }
  func.func @transform_0(%arg0: i32) -> (i32, i32) {
    %c0_i32 = arith.constant 0 : i32
    %c0_i32_0 = arith.constant 0 : i32
    return %arg0, %c0_i32 : i32, i32
  }
  func.func @transform_1(%arg0: i32) -> (i32, i32) {
    %c0_i32 = arith.constant 0 : i32
    %c0_i32_0 = arith.constant 0 : i32
    %c0_i32_1 = arith.constant 0 : i32
    return %c0_i32, %c0_i32_0 : i32, i32
  }
  func.func @transform_2(%arg0: i32) -> (i32, i32) {
    %c0_i32 = arith.constant 0 : i32
    %c0_i32_0 = arith.constant 0 : i32
    %c0_i32_1 = arith.constant 0 : i32
    return %c0_i32, %c0_i32_0 : i32, i32
  }
  func.func @transform_3(%arg0: i32) -> (i32, i32) {
    %c0_i32 = arith.constant 0 : i32
    %c0_i32_0 = arith.constant 0 : i32
    return %arg0, %c0_i32 : i32, i32
  }
}

module attributes {stable_mosaic.version = 11 : i64} {
  func.func @_attn_block_kernel(%arg0: i32, %arg1: i32, %arg2: memref<1x8x128xbf16, #tpu.memory_space<vmem>>, %arg3: memref<1x8x128xbf16, #tpu.memory_space<vmem>>, %arg4: memref<1x8x128xbf16, #tpu.memory_space<vmem>>, %arg5: memref<1x1x8xf32, #tpu.memory_space<vmem>>, %arg6: memref<8x8xf32, #tpu.memory_space<vmem>>, %arg7: memref<128x128xbf16, #tpu.memory_space<vmem>>, %arg8: memref<1x128xf32, #tpu.memory_space<vmem>>, %arg9: memref<1x8x128xbf16, #tpu.memory_space<vmem>>, %arg10: memref<1x128xf32, #tpu.memory_space<vmem>>, %arg11: memref<1x128xf32, #tpu.memory_space<vmem>>, %arg12: memref<1x8x128xbf16, #tpu.memory_space<vmem>>, %arg13: memref<1x8x8xbf16, #tpu.memory_space<vmem>>) attributes {dimension_semantics = [#tpu.dimension_semantics<parallel>, #tpu.dimension_semantics<parallel>], iteration_bounds = array<i64: 2, 1>, scalar_prefetch = 0 : i64, scratch_operands = 0 : i64, tpu.core_type = #tpu.core_type<tc>, window_params = [{transform_indices = @transform_0, window_bounds = array<i64: 1, 8, 128>}, {transform_indices = @transform_1, window_bounds = array<i64: 1, 8, 128>}, {transform_indices = @transform_2, window_bounds = array<i64: 1, 8, 128>}, {transform_indices = @transform_3, window_bounds = array<i64: 1, 1, 8>}, {transform_indices = @transform_4, window_bounds = array<i64: 8, 8>}, {pipeline_mode = #tpu.pipeline_mode<synchronous>, transform_indices = @transform_5, window_bounds = array<i64: 128, 128>}, {pipeline_mode = #tpu.pipeline_mode<synchronous>, transform_indices = @transform_6, window_bounds = array<i64: 1, 128>}, {transform_indices = @transform_7, window_bounds = array<i64: 1, 8, 128>}, {pipeline_mode = #tpu.pipeline_mode<synchronous>, transform_indices = @transform_8, window_bounds = array<i64: 1, 128>}, {pipeline_mode = #tpu.pipeline_mode<synchronous>, transform_indices = @transform_9, window_bounds = array<i64: 1, 128>}, {transform_indices = @transform_10, window_bounds = array<i64: 1, 8, 128>}, {transform_indices = @transform_11, window_bounds = array<i64: 1, 8, 8>}]} {
    %c0 = arith.constant 0 : index
    %c0_0 = arith.constant 0 : index
    %c0_1 = arith.constant 0 : index
    %0 = vector.load %arg2[%c0, %c0_0, %c0_1] : memref<1x8x128xbf16, #tpu.memory_space<vmem>>, vector<1x8x128xbf16>
    %1 = vector.shape_cast %0 : vector<1x8x128xbf16> to vector<8x128xbf16>
    %c0_2 = arith.constant 0 : index
    %c0_3 = arith.constant 0 : index
    %c0_4 = arith.constant 0 : index
    %2 = vector.load %arg3[%c0_2, %c0_3, %c0_4] : memref<1x8x128xbf16, #tpu.memory_space<vmem>>, vector<1x8x128xbf16>
    %3 = vector.shape_cast %2 : vector<1x8x128xbf16> to vector<8x128xbf16>
    %c0_5 = arith.constant 0 : index
    %c0_6 = arith.constant 0 : index
    %c0_7 = arith.constant 0 : index
    %4 = vector.load %arg4[%c0_5, %c0_6, %c0_7] : memref<1x8x128xbf16, #tpu.memory_space<vmem>>, vector<1x8x128xbf16>
    %5 = vector.shape_cast %4 : vector<1x8x128xbf16> to vector<8x128xbf16>
    %c0_8 = arith.constant 0 : index
    %c0_9 = arith.constant 0 : index
    %c0_10 = arith.constant 0 : index
    %6 = vector.load %arg5[%c0_8, %c0_9, %c0_10] : memref<1x1x8xf32, #tpu.memory_space<vmem>>, vector<1x1x8xf32>
    %7 = vector.shape_cast %6 : vector<1x1x8xf32> to vector<1x8xf32>
    %c0_11 = arith.constant 0 : index
    %c0_12 = arith.constant 0 : index
    %8 = vector.load %arg6[%c0_11, %c0_12] : memref<8x8xf32, #tpu.memory_space<vmem>>, vector<8x8xf32>
    %9 = vector.broadcast %7 : vector<1x8xf32> to vector<8x8xf32>
    %10 = arith.addf %9, %8 : vector<8x8xf32>
    %cst = arith.constant 0.000000e+00 : f32
    %11 = vector.broadcast %cst : f32 to vector<8x128xf32>
    %12 = vector.extract_strided_slice %1 {offsets = [0, 0], sizes = [8, 32], strides = [1, 1]} : vector<8x128xbf16> to vector<8x32xbf16>
    %13 = vector.extract_strided_slice %3 {offsets = [0, 0], sizes = [8, 32], strides = [1, 1]} : vector<8x128xbf16> to vector<8x32xbf16>
    %14 = vector.extract_strided_slice %5 {offsets = [0, 0], sizes = [8, 32], strides = [1, 1]} : vector<8x128xbf16> to vector<8x32xbf16>
    %cst_13 = arith.constant dense<0.000000e+00> : vector<8x8xf32>
    %15 = tpu.matmul %12, %13, %cst_13 {dimension_numbers = #tpu.dot_dimension_numbers<[1], [1], [0], [0], [0, 0, 1, 0], [], []>} : vector<8x32xbf16>, vector<8x32xbf16>, vector<8x8xf32> -> vector<8x8xf32>
    %16 = arith.addf %15, %10 : vector<8x8xf32>
    %cst_14 = arith.constant dense<0xFF800000> : vector<8xf32>
    %17 = vector.multi_reduction <maximumf>, %16, %cst_14 [1] : vector<8x8xf32> to vector<8xf32>
    %18 = vector.shape_cast %17 : vector<8xf32> to vector<8x1xf32>
    %19 = vector.broadcast %18 : vector<8x1xf32> to vector<8x8xf32>
    %20 = arith.subf %16, %19 : vector<8x8xf32>
    %21 = math.exp %20 : vector<8x8xf32>
    %cst_15 = arith.constant dense<0.000000e+00> : vector<8xf32>
    %22 = vector.multi_reduction <add>, %21, %cst_15 [1] : vector<8x8xf32> to vector<8xf32>
    %23 = vector.shape_cast %22 : vector<8xf32> to vector<8x1xf32>
    %24 = tpu.reciprocal %23 {approx = true} : vector<8x1xf32> -> vector<8x1xf32>
    %25 = vector.broadcast %24 : vector<8x1xf32> to vector<8x8xf32>
    %26 = arith.mulf %21, %25 : vector<8x8xf32>
    %27 = arith.truncf %26 : vector<8x8xf32> to vector<8x8xbf16>
    %cst_16 = arith.constant dense<0.000000e+00> : vector<8x32xf32>
    %28 = tpu.matmul %27, %14, %cst_16 {dimension_numbers = #tpu.dot_dimension_numbers<[1], [0], [0], [1], [0, 0, 1, 1], [], []>} : vector<8x8xbf16>, vector<8x32xbf16>, vector<8x32xf32> -> vector<8x32xf32>
    %29 = arith.truncf %28 : vector<8x32xf32> to vector<8x32xbf16>
    %c0_17 = arith.constant 0 : index
    %c0_18 = arith.constant 0 : index
    %30 = vector.load %arg7[%c0_17, %c0_18] : memref<128x128xbf16, #tpu.memory_space<vmem>>, vector<32x128xbf16>
    %cst_19 = arith.constant dense<0.000000e+00> : vector<8x128xf32>
    %31 = tpu.matmul %29, %30, %cst_19 {dimension_numbers = #tpu.dot_dimension_numbers<[1], [0], [0], [1], [0, 0, 1, 1], [], []>} : vector<8x32xbf16>, vector<32x128xbf16>, vector<8x128xf32> -> vector<8x128xf32>
    %32 = arith.addf %11, %31 : vector<8x128xf32>
    %33 = vector.extract_strided_slice %1 {offsets = [0, 32], sizes = [8, 32], strides = [1, 1]} : vector<8x128xbf16> to vector<8x32xbf16>
    %34 = vector.extract_strided_slice %3 {offsets = [0, 32], sizes = [8, 32], strides = [1, 1]} : vector<8x128xbf16> to vector<8x32xbf16>
    %35 = vector.extract_strided_slice %5 {offsets = [0, 32], sizes = [8, 32], strides = [1, 1]} : vector<8x128xbf16> to vector<8x32xbf16>
    %cst_20 = arith.constant dense<0.000000e+00> : vector<8x8xf32>
    %36 = tpu.matmul %33, %34, %cst_20 {dimension_numbers = #tpu.dot_dimension_numbers<[1], [1], [0], [0], [0, 0, 1, 0], [], []>} : vector<8x32xbf16>, vector<8x32xbf16>, vector<8x8xf32> -> vector<8x8xf32>
    %37 = arith.addf %36, %10 : vector<8x8xf32>
    %cst_21 = arith.constant dense<0xFF800000> : vector<8xf32>
    %38 = vector.multi_reduction <maximumf>, %37, %cst_21 [1] : vector<8x8xf32> to vector<8xf32>
    %39 = vector.shape_cast %38 : vector<8xf32> to vector<8x1xf32>
    %40 = vector.broadcast %39 : vector<8x1xf32> to vector<8x8xf32>
    %41 = arith.subf %37, %40 : vector<8x8xf32>
    %42 = math.exp %41 : vector<8x8xf32>
    %cst_22 = arith.constant dense<0.000000e+00> : vector<8xf32>
    %43 = vector.multi_reduction <add>, %42, %cst_22 [1] : vector<8x8xf32> to vector<8xf32>
    %44 = vector.shape_cast %43 : vector<8xf32> to vector<8x1xf32>
    %45 = tpu.reciprocal %44 {approx = true} : vector<8x1xf32> -> vector<8x1xf32>
    %46 = vector.broadcast %45 : vector<8x1xf32> to vector<8x8xf32>
    %47 = arith.mulf %42, %46 : vector<8x8xf32>
    %48 = arith.truncf %47 : vector<8x8xf32> to vector<8x8xbf16>
    %cst_23 = arith.constant dense<0.000000e+00> : vector<8x32xf32>
    %49 = tpu.matmul %48, %35, %cst_23 {dimension_numbers = #tpu.dot_dimension_numbers<[1], [0], [0], [1], [0, 0, 1, 1], [], []>} : vector<8x8xbf16>, vector<8x32xbf16>, vector<8x32xf32> -> vector<8x32xf32>
    %50 = arith.truncf %49 : vector<8x32xf32> to vector<8x32xbf16>
    %c32 = arith.constant 32 : index
    %c0_24 = arith.constant 0 : index
    %51 = vector.load %arg7[%c32, %c0_24] : memref<128x128xbf16, #tpu.memory_space<vmem>>, vector<32x128xbf16>
    %cst_25 = arith.constant dense<0.000000e+00> : vector<8x128xf32>
    %52 = tpu.matmul %50, %51, %cst_25 {dimension_numbers = #tpu.dot_dimension_numbers<[1], [0], [0], [1], [0, 0, 1, 1], [], []>} : vector<8x32xbf16>, vector<32x128xbf16>, vector<8x128xf32> -> vector<8x128xf32>
    %53 = arith.addf %32, %52 : vector<8x128xf32>
    %54 = arith.addf %26, %47 : vector<8x8xf32>
    %55 = vector.extract_strided_slice %1 {offsets = [0, 64], sizes = [8, 32], strides = [1, 1]} : vector<8x128xbf16> to vector<8x32xbf16>
    %56 = vector.extract_strided_slice %3 {offsets = [0, 64], sizes = [8, 32], strides = [1, 1]} : vector<8x128xbf16> to vector<8x32xbf16>
    %57 = vector.extract_strided_slice %5 {offsets = [0, 64], sizes = [8, 32], strides = [1, 1]} : vector<8x128xbf16> to vector<8x32xbf16>
    %cst_26 = arith.constant dense<0.000000e+00> : vector<8x8xf32>
    %58 = tpu.matmul %55, %56, %cst_26 {dimension_numbers = #tpu.dot_dimension_numbers<[1], [1], [0], [0], [0, 0, 1, 0], [], []>} : vector<8x32xbf16>, vector<8x32xbf16>, vector<8x8xf32> -> vector<8x8xf32>
    %59 = arith.addf %58, %10 : vector<8x8xf32>
    %cst_27 = arith.constant dense<0xFF800000> : vector<8xf32>
    %60 = vector.multi_reduction <maximumf>, %59, %cst_27 [1] : vector<8x8xf32> to vector<8xf32>
    %61 = vector.shape_cast %60 : vector<8xf32> to vector<8x1xf32>
    %62 = vector.broadcast %61 : vector<8x1xf32> to vector<8x8xf32>
    %63 = arith.subf %59, %62 : vector<8x8xf32>
    %64 = math.exp %63 : vector<8x8xf32>
    %cst_28 = arith.constant dense<0.000000e+00> : vector<8xf32>
    %65 = vector.multi_reduction <add>, %64, %cst_28 [1] : vector<8x8xf32> to vector<8xf32>
    %66 = vector.shape_cast %65 : vector<8xf32> to vector<8x1xf32>
    %67 = tpu.reciprocal %66 {approx = true} : vector<8x1xf32> -> vector<8x1xf32>
    %68 = vector.broadcast %67 : vector<8x1xf32> to vector<8x8xf32>
    %69 = arith.mulf %64, %68 : vector<8x8xf32>
    %70 = arith.truncf %69 : vector<8x8xf32> to vector<8x8xbf16>
    %cst_29 = arith.constant dense<0.000000e+00> : vector<8x32xf32>
    %71 = tpu.matmul %70, %57, %cst_29 {dimension_numbers = #tpu.dot_dimension_numbers<[1], [0], [0], [1], [0, 0, 1, 1], [], []>} : vector<8x8xbf16>, vector<8x32xbf16>, vector<8x32xf32> -> vector<8x32xf32>
    %72 = arith.truncf %71 : vector<8x32xf32> to vector<8x32xbf16>
    %c64 = arith.constant 64 : index
    %c0_30 = arith.constant 0 : index
    %73 = vector.load %arg7[%c64, %c0_30] : memref<128x128xbf16, #tpu.memory_space<vmem>>, vector<32x128xbf16>
    %cst_31 = arith.constant dense<0.000000e+00> : vector<8x128xf32>
    %74 = tpu.matmul %72, %73, %cst_31 {dimension_numbers = #tpu.dot_dimension_numbers<[1], [0], [0], [1], [0, 0, 1, 1], [], []>} : vector<8x32xbf16>, vector<32x128xbf16>, vector<8x128xf32> -> vector<8x128xf32>
    %75 = arith.addf %53, %74 : vector<8x128xf32>
    %76 = arith.addf %54, %69 : vector<8x8xf32>
    %77 = vector.extract_strided_slice %1 {offsets = [0, 96], sizes = [8, 32], strides = [1, 1]} : vector<8x128xbf16> to vector<8x32xbf16>
    %78 = vector.extract_strided_slice %3 {offsets = [0, 96], sizes = [8, 32], strides = [1, 1]} : vector<8x128xbf16> to vector<8x32xbf16>
    %79 = vector.extract_strided_slice %5 {offsets = [0, 96], sizes = [8, 32], strides = [1, 1]} : vector<8x128xbf16> to vector<8x32xbf16>
    %cst_32 = arith.constant dense<0.000000e+00> : vector<8x8xf32>
    %80 = tpu.matmul %77, %78, %cst_32 {dimension_numbers = #tpu.dot_dimension_numbers<[1], [1], [0], [0], [0, 0, 1, 0], [], []>} : vector<8x32xbf16>, vector<8x32xbf16>, vector<8x8xf32> -> vector<8x8xf32>
    %81 = arith.addf %80, %10 : vector<8x8xf32>
    %cst_33 = arith.constant dense<0xFF800000> : vector<8xf32>
    %82 = vector.multi_reduction <maximumf>, %81, %cst_33 [1] : vector<8x8xf32> to vector<8xf32>
    %83 = vector.shape_cast %82 : vector<8xf32> to vector<8x1xf32>
    %84 = vector.broadcast %83 : vector<8x1xf32> to vector<8x8xf32>
    %85 = arith.subf %81, %84 : vector<8x8xf32>
    %86 = math.exp %85 : vector<8x8xf32>
    %cst_34 = arith.constant dense<0.000000e+00> : vector<8xf32>
    %87 = vector.multi_reduction <add>, %86, %cst_34 [1] : vector<8x8xf32> to vector<8xf32>
    %88 = vector.shape_cast %87 : vector<8xf32> to vector<8x1xf32>
    %89 = tpu.reciprocal %88 {approx = true} : vector<8x1xf32> -> vector<8x1xf32>
    %90 = vector.broadcast %89 : vector<8x1xf32> to vector<8x8xf32>
    %91 = arith.mulf %86, %90 : vector<8x8xf32>
    %92 = arith.truncf %91 : vector<8x8xf32> to vector<8x8xbf16>
    %cst_35 = arith.constant dense<0.000000e+00> : vector<8x32xf32>
    %93 = tpu.matmul %92, %79, %cst_35 {dimension_numbers = #tpu.dot_dimension_numbers<[1], [0], [0], [1], [0, 0, 1, 1], [], []>} : vector<8x8xbf16>, vector<8x32xbf16>, vector<8x32xf32> -> vector<8x32xf32>
    %94 = arith.truncf %93 : vector<8x32xf32> to vector<8x32xbf16>
    %c96 = arith.constant 96 : index
    %c0_36 = arith.constant 0 : index
    %95 = vector.load %arg7[%c96, %c0_36] : memref<128x128xbf16, #tpu.memory_space<vmem>>, vector<32x128xbf16>
    %cst_37 = arith.constant dense<0.000000e+00> : vector<8x128xf32>
    %96 = tpu.matmul %94, %95, %cst_37 {dimension_numbers = #tpu.dot_dimension_numbers<[1], [0], [0], [1], [0, 0, 1, 1], [], []>} : vector<8x32xbf16>, vector<32x128xbf16>, vector<8x128xf32> -> vector<8x128xf32>
    %97 = arith.addf %75, %96 : vector<8x128xf32>
    %98 = arith.addf %76, %91 : vector<8x8xf32>
    %c0_38 = arith.constant 0 : index
    %c0_39 = arith.constant 0 : index
    %99 = vector.load %arg8[%c0_38, %c0_39] : memref<1x128xf32, #tpu.memory_space<vmem>>, vector<1x128xf32>
    %100 = vector.broadcast %99 : vector<1x128xf32> to vector<8x128xf32>
    %101 = arith.addf %97, %100 : vector<8x128xf32>
    %c0_40 = arith.constant 0 : index
    %c0_41 = arith.constant 0 : index
    %c0_42 = arith.constant 0 : index
    %102 = vector.load %arg9[%c0_40, %c0_41, %c0_42] : memref<1x8x128xbf16, #tpu.memory_space<vmem>>, vector<1x8x128xbf16>
    %103 = vector.shape_cast %102 : vector<1x8x128xbf16> to vector<8x128xbf16>
    %104 = arith.extf %103 : vector<8x128xbf16> to vector<8x128xf32>
    %105 = arith.addf %101, %104 : vector<8x128xf32>
    %cst_43 = arith.constant dense<0.000000e+00> : vector<8xf32>
    %106 = vector.multi_reduction <add>, %105, %cst_43 [1] : vector<8x128xf32> to vector<8xf32>
    %107 = vector.shape_cast %106 : vector<8xf32> to vector<8x1xf32>
    %cst_44 = arith.constant 1.280000e+02 : f32
    %108 = vector.broadcast %cst_44 : f32 to vector<8x1xf32>
    %109 = arith.divf %107, %108 : vector<8x1xf32>
    %110 = vector.broadcast %109 : vector<8x1xf32> to vector<8x128xf32>
    %111 = arith.subf %105, %110 : vector<8x128xf32>
    %112 = arith.mulf %111, %111 : vector<8x128xf32>
    %cst_45 = arith.constant dense<0.000000e+00> : vector<8xf32>
    %113 = vector.multi_reduction <add>, %112, %cst_45 [1] : vector<8x128xf32> to vector<8xf32>
    %114 = vector.shape_cast %113 : vector<8xf32> to vector<8x1xf32>
    %cst_46 = arith.constant 1.280000e+02 : f32
    %115 = vector.broadcast %cst_46 : f32 to vector<8x1xf32>
    %116 = arith.divf %114, %115 : vector<8x1xf32>
    %117 = vector.broadcast %109 : vector<8x1xf32> to vector<8x128xf32>
    %118 = arith.subf %105, %117 : vector<8x128xf32>
    %cst_47 = arith.constant 9.99999974E-6 : f32
    %119 = vector.broadcast %cst_47 : f32 to vector<8x1xf32>
    %120 = arith.addf %116, %119 : vector<8x1xf32>
    %121 = math.rsqrt %120 : vector<8x1xf32>
    %122 = vector.broadcast %121 : vector<8x1xf32> to vector<8x128xf32>
    %123 = arith.mulf %118, %122 : vector<8x128xf32>
    %c0_48 = arith.constant 0 : index
    %c0_49 = arith.constant 0 : index
    %124 = vector.load %arg10[%c0_48, %c0_49] : memref<1x128xf32, #tpu.memory_space<vmem>>, vector<1x128xf32>
    %125 = vector.broadcast %124 : vector<1x128xf32> to vector<8x128xf32>
    %126 = arith.mulf %123, %125 : vector<8x128xf32>
    %c0_50 = arith.constant 0 : index
    %c0_51 = arith.constant 0 : index
    %127 = vector.load %arg11[%c0_50, %c0_51] : memref<1x128xf32, #tpu.memory_space<vmem>>, vector<1x128xf32>
    %128 = vector.broadcast %127 : vector<1x128xf32> to vector<8x128xf32>
    %129 = arith.addf %126, %128 : vector<8x128xf32>
    %130 = arith.truncf %129 : vector<8x128xf32> to vector<8x128xbf16>
    %c0_52 = arith.constant 0 : index
    %c0_53 = arith.constant 0 : index
    %c0_54 = arith.constant 0 : index
    %131 = vector.load %arg12[%c0_52, %c0_53, %c0_54] : memref<1x8x128xbf16, #tpu.memory_space<vmem>>, vector<1x8x128xbf16>
    %132 = vector.shape_cast %131 : vector<1x8x128xbf16> to vector<8x128xbf16>
    %133 = vector.shape_cast %130 : vector<8x128xbf16> to vector<1x8x128xbf16>
    tpu.vector_store %arg12[%c0_52, %c0_53, %c0_54], %133 {strides = array<i32>} : memref<1x8x128xbf16, #tpu.memory_space<vmem>>, vector<1x8x128xbf16>,
    %cst_55 = arith.constant 2.500000e-01 : f32
    %134 = vector.broadcast %cst_55 : f32 to vector<8x8xf32>
    %135 = arith.mulf %98, %134 : vector<8x8xf32>
    %136 = arith.truncf %135 : vector<8x8xf32> to vector<8x8xbf16>
    %c0_56 = arith.constant 0 : index
    %c0_57 = arith.constant 0 : index
    %c0_58 = arith.constant 0 : index
    %137 = vector.load %arg13[%c0_56, %c0_57, %c0_58] : memref<1x8x8xbf16, #tpu.memory_space<vmem>>, vector<1x8x8xbf16>
    %138 = vector.shape_cast %137 : vector<1x8x8xbf16> to vector<8x8xbf16>
    %139 = vector.shape_cast %136 : vector<8x8xbf16> to vector<1x8x8xbf16>
    tpu.vector_store %arg13[%c0_56, %c0_57, %c0_58], %139 {strides = array<i32>} : memref<1x8x8xbf16, #tpu.memory_space<vmem>>, vector<1x8x8xbf16>,
    return
  }
  func.func @transform_0(%arg0: i32, %arg1: i32) -> (i32, i32, i32) {
    %c0_i32 = arith.constant 0 : i32
    %c0_i32_0 = arith.constant 0 : i32
    return %arg0, %arg1, %c0_i32 : i32, i32, i32
  }
  func.func @transform_1(%arg0: i32, %arg1: i32) -> (i32, i32, i32) {
    %c0_i32 = arith.constant 0 : i32
    %c1_i32 = arith.constant 1 : i32
    %c0_i32_0 = arith.constant 0 : i32
    return %arg0, %c0_i32, %c1_i32 : i32, i32, i32
  }
  func.func @transform_2(%arg0: i32, %arg1: i32) -> (i32, i32, i32) {
    %c0_i32 = arith.constant 0 : i32
    %c2_i32 = arith.constant 2 : i32
    %c0_i32_0 = arith.constant 0 : i32
    return %arg0, %c0_i32, %c2_i32 : i32, i32, i32
  }
  func.func @transform_3(%arg0: i32, %arg1: i32) -> (i32, i32, i32) {
    %c0_i32 = arith.constant 0 : i32
    %c0_i32_0 = arith.constant 0 : i32
    %c0_i32_1 = arith.constant 0 : i32
    return %arg0, %c0_i32, %c0_i32_0 : i32, i32, i32
  }
  func.func @transform_4(%arg0: i32, %arg1: i32) -> (i32, i32) {
    %c0_i32 = arith.constant 0 : i32
    %c0_i32_0 = arith.constant 0 : i32
    return %arg1, %c0_i32 : i32, i32
  }
  func.func @transform_5(%arg0: i32, %arg1: i32) -> (i32, i32) {
    %c0_i32 = arith.constant 0 : i32
    %c0_i32_0 = arith.constant 0 : i32
    %c0_i32_1 = arith.constant 0 : i32
    return %c0_i32, %c0_i32_0 : i32, i32
  }
  func.func @transform_6(%arg0: i32, %arg1: i32) -> (i32, i32) {
    %c0_i32 = arith.constant 0 : i32
    %c0_i32_0 = arith.constant 0 : i32
    %c0_i32_1 = arith.constant 0 : i32
    return %c0_i32, %c0_i32_0 : i32, i32
  }
  func.func @transform_7(%arg0: i32, %arg1: i32) -> (i32, i32, i32) {
    %c0_i32 = arith.constant 0 : i32
    %c0_i32_0 = arith.constant 0 : i32
    return %arg0, %arg1, %c0_i32 : i32, i32, i32
  }
  func.func @transform_8(%arg0: i32, %arg1: i32) -> (i32, i32) {
    %c0_i32 = arith.constant 0 : i32
    %c0_i32_0 = arith.constant 0 : i32
    %c0_i32_1 = arith.constant 0 : i32
    return %c0_i32, %c0_i32_0 : i32, i32
  }
  func.func @transform_9(%arg0: i32, %arg1: i32) -> (i32, i32) {
    %c0_i32 = arith.constant 0 : i32
    %c0_i32_0 = arith.constant 0 : i32
    %c0_i32_1 = arith.constant 0 : i32
    return %c0_i32, %c0_i32_0 : i32, i32
  }
  func.func @transform_10(%arg0: i32, %arg1: i32) -> (i32, i32, i32) {
    %c0_i32 = arith.constant 0 : i32
    %c0_i32_0 = arith.constant 0 : i32
    return %arg0, %arg1, %c0_i32 : i32, i32, i32
  }
  func.func @transform_11(%arg0: i32, %arg1: i32) -> (i32, i32, i32) {
    %c0_i32 = arith.constant 0 : i32
    %c0_i32_0 = arith.constant 0 : i32
    return %arg0, %arg1, %c0_i32 : i32, i32, i32
  }
}

module attributes {stable_mosaic.version = 11 : i64} {
  func.func @_ffn_residual_ln_kernel(%arg0: i32, %arg1: memref<16x128xbf16, #tpu.memory_space<vmem>>, %arg2: memref<128x256xbf16, #tpu.memory_space<vmem>>, %arg3: memref<1x256xf32, #tpu.memory_space<vmem>>, %arg4: memref<256x128xbf16, #tpu.memory_space<vmem>>, %arg5: memref<1x128xf32, #tpu.memory_space<vmem>>, %arg6: memref<1x128xf32, #tpu.memory_space<vmem>>, %arg7: memref<1x128xf32, #tpu.memory_space<vmem>>, %arg8: memref<16x128xbf16, #tpu.memory_space<vmem>>) attributes {dimension_semantics = [#tpu.dimension_semantics<parallel>], iteration_bounds = array<i64: 1>, scalar_prefetch = 0 : i64, scratch_operands = 0 : i64, tpu.core_type = #tpu.core_type<tc>, window_params = [{transform_indices = @transform_0, window_bounds = array<i64: 16, 128>}, {pipeline_mode = #tpu.pipeline_mode<synchronous>, transform_indices = @transform_1, window_bounds = array<i64: 128, 256>}, {pipeline_mode = #tpu.pipeline_mode<synchronous>, transform_indices = @transform_2, window_bounds = array<i64: 1, 256>}, {pipeline_mode = #tpu.pipeline_mode<synchronous>, transform_indices = @transform_3, window_bounds = array<i64: 256, 128>}, {pipeline_mode = #tpu.pipeline_mode<synchronous>, transform_indices = @transform_4, window_bounds = array<i64: 1, 128>}, {pipeline_mode = #tpu.pipeline_mode<synchronous>, transform_indices = @transform_5, window_bounds = array<i64: 1, 128>}, {pipeline_mode = #tpu.pipeline_mode<synchronous>, transform_indices = @transform_6, window_bounds = array<i64: 1, 128>}, {transform_indices = @transform_7, window_bounds = array<i64: 16, 128>}]} {
    %c0 = arith.constant 0 : index
    %c0_0 = arith.constant 0 : index
    %0 = vector.load %arg1[%c0, %c0_0] : memref<16x128xbf16, #tpu.memory_space<vmem>>, vector<16x128xbf16>
    %1 = arith.extf %0 : vector<16x128xbf16> to vector<16x128xf32>
    %c0_1 = arith.constant 0 : index
    %c0_2 = arith.constant 0 : index
    %2 = vector.load %arg1[%c0_1, %c0_2] : memref<16x128xbf16, #tpu.memory_space<vmem>>, vector<16x128xbf16>
    %c0_3 = arith.constant 0 : index
    %c0_4 = arith.constant 0 : index
    %3 = vector.load %arg2[%c0_3, %c0_4] : memref<128x256xbf16, #tpu.memory_space<vmem>>, vector<128x256xbf16>
    %cst = arith.constant dense<0.000000e+00> : vector<16x256xf32>
    %4 = tpu.matmul %2, %3, %cst {dimension_numbers = #tpu.dot_dimension_numbers<[1], [0], [0], [1], [0, 0, 1, 1], [], []>} : vector<16x128xbf16>, vector<128x256xbf16>, vector<16x256xf32> -> vector<16x256xf32>
    %c0_5 = arith.constant 0 : index
    %c0_6 = arith.constant 0 : index
    %5 = vector.load %arg3[%c0_5, %c0_6] : memref<1x256xf32, #tpu.memory_space<vmem>>, vector<1x256xf32>
    %6 = vector.broadcast %5 : vector<1x256xf32> to vector<16x256xf32>
    %7 = arith.addf %4, %6 : vector<16x256xf32>
    %cst_7 = arith.constant 0.000000e+00 : f32
    %8 = vector.broadcast %cst_7 : f32 to vector<16x256xf32>
    %9 = arith.maximumf %7, %8 : vector<16x256xf32>
    %10 = arith.truncf %9 : vector<16x256xf32> to vector<16x256xbf16>
    %c0_8 = arith.constant 0 : index
    %c0_9 = arith.constant 0 : index
    %11 = vector.load %arg4[%c0_8, %c0_9] : memref<256x128xbf16, #tpu.memory_space<vmem>>, vector<256x128xbf16>
    %cst_10 = arith.constant dense<0.000000e+00> : vector<16x128xf32>
    %12 = tpu.matmul %10, %11, %cst_10 {dimension_numbers = #tpu.dot_dimension_numbers<[1], [0], [0], [1], [0, 0, 1, 1], [], []>} : vector<16x256xbf16>, vector<256x128xbf16>, vector<16x128xf32> -> vector<16x128xf32>
    %c0_11 = arith.constant 0 : index
    %c0_12 = arith.constant 0 : index
    %13 = vector.load %arg5[%c0_11, %c0_12] : memref<1x128xf32, #tpu.memory_space<vmem>>, vector<1x128xf32>
    %14 = vector.broadcast %13 : vector<1x128xf32> to vector<16x128xf32>
    %15 = arith.addf %12, %14 : vector<16x128xf32>
    %16 = arith.addf %15, %1 : vector<16x128xf32>
    %cst_13 = arith.constant dense<0.000000e+00> : vector<16xf32>
    %17 = vector.multi_reduction <add>, %16, %cst_13 [1] : vector<16x128xf32> to vector<16xf32>
    %18 = vector.shape_cast %17 : vector<16xf32> to vector<16x1xf32>
    %cst_14 = arith.constant 1.280000e+02 : f32
    %19 = vector.broadcast %cst_14 : f32 to vector<16x1xf32>
    %20 = arith.divf %18, %19 : vector<16x1xf32>
    %21 = vector.broadcast %20 : vector<16x1xf32> to vector<16x128xf32>
    %22 = arith.subf %16, %21 : vector<16x128xf32>
    %23 = arith.mulf %22, %22 : vector<16x128xf32>
    %cst_15 = arith.constant dense<0.000000e+00> : vector<16xf32>
    %24 = vector.multi_reduction <add>, %23, %cst_15 [1] : vector<16x128xf32> to vector<16xf32>
    %25 = vector.shape_cast %24 : vector<16xf32> to vector<16x1xf32>
    %cst_16 = arith.constant 1.280000e+02 : f32
    %26 = vector.broadcast %cst_16 : f32 to vector<16x1xf32>
    %27 = arith.divf %25, %26 : vector<16x1xf32>
    %28 = vector.broadcast %20 : vector<16x1xf32> to vector<16x128xf32>
    %29 = arith.subf %16, %28 : vector<16x128xf32>
    %cst_17 = arith.constant 9.99999974E-6 : f32
    %30 = vector.broadcast %cst_17 : f32 to vector<16x1xf32>
    %31 = arith.addf %27, %30 : vector<16x1xf32>
    %32 = math.rsqrt %31 : vector<16x1xf32>
    %33 = vector.broadcast %32 : vector<16x1xf32> to vector<16x128xf32>
    %34 = arith.mulf %29, %33 : vector<16x128xf32>
    %c0_18 = arith.constant 0 : index
    %c0_19 = arith.constant 0 : index
    %35 = vector.load %arg6[%c0_18, %c0_19] : memref<1x128xf32, #tpu.memory_space<vmem>>, vector<1x128xf32>
    %36 = vector.broadcast %35 : vector<1x128xf32> to vector<16x128xf32>
    %37 = arith.mulf %34, %36 : vector<16x128xf32>
    %c0_20 = arith.constant 0 : index
    %c0_21 = arith.constant 0 : index
    %38 = vector.load %arg7[%c0_20, %c0_21] : memref<1x128xf32, #tpu.memory_space<vmem>>, vector<1x128xf32>
    %39 = vector.broadcast %38 : vector<1x128xf32> to vector<16x128xf32>
    %40 = arith.addf %37, %39 : vector<16x128xf32>
    %41 = arith.truncf %40 : vector<16x128xf32> to vector<16x128xbf16>
    %c0_22 = arith.constant 0 : index
    %c0_23 = arith.constant 0 : index
    %42 = vector.load %arg8[%c0_22, %c0_23] : memref<16x128xbf16, #tpu.memory_space<vmem>>, vector<16x128xbf16>
    tpu.vector_store %arg8[%c0_22, %c0_23], %41 {strides = array<i32>} : memref<16x128xbf16, #tpu.memory_space<vmem>>, vector<16x128xbf16>,
    return
  }
  func.func @transform_0(%arg0: i32) -> (i32, i32) {
    %c0_i32 = arith.constant 0 : i32
    %c0_i32_0 = arith.constant 0 : i32
    return %arg0, %c0_i32 : i32, i32
  }
  func.func @transform_1(%arg0: i32) -> (i32, i32) {
    %c0_i32 = arith.constant 0 : i32
    %c0_i32_0 = arith.constant 0 : i32
    %c0_i32_1 = arith.constant 0 : i32
    return %c0_i32, %c0_i32_0 : i32, i32
  }
  func.func @transform_2(%arg0: i32) -> (i32, i32) {
    %c0_i32 = arith.constant 0 : i32
    %c0_i32_0 = arith.constant 0 : i32
    %c0_i32_1 = arith.constant 0 : i32
    return %c0_i32, %c0_i32_0 : i32, i32
  }
  func.func @transform_3(%arg0: i32) -> (i32, i32) {
    %c0_i32 = arith.constant 0 : i32
    %c0_i32_0 = arith.constant 0 : i32
    %c0_i32_1 = arith.constant 0 : i32
    return %c0_i32, %c0_i32_0 : i32, i32
  }
  func.func @transform_4(%arg0: i32) -> (i32, i32) {
    %c0_i32 = arith.constant 0 : i32
    %c0_i32_0 = arith.constant 0 : i32
    %c0_i32_1 = arith.constant 0 : i32
    return %c0_i32, %c0_i32_0 : i32, i32
  }
  func.func @transform_5(%arg0: i32) -> (i32, i32) {
    %c0_i32 = arith.constant 0 : i32
    %c0_i32_0 = arith.constant 0 : i32
    %c0_i32_1 = arith.constant 0 : i32
    return %c0_i32, %c0_i32_0 : i32, i32
  }
  func.func @transform_6(%arg0: i32) -> (i32, i32) {
    %c0_i32 = arith.constant 0 : i32
    %c0_i32_0 = arith.constant 0 : i32
    %c0_i32_1 = arith.constant 0 : i32
    return %c0_i32, %c0_i32_0 : i32, i32
  }
  func.func @transform_7(%arg0: i32) -> (i32, i32) {
    %c0_i32 = arith.constant 0 : i32
    %c0_i32_0 = arith.constant 0 : i32
    return %arg0, %c0_i32 : i32, i32
  }
}

module attributes {stable_mosaic.version = 11 : i64} {
  func.func @_linear_bias_kernel(%arg0: i32, %arg1: memref<16x128xbf16, #tpu.memory_space<vmem>>, %arg2: memref<128x128xbf16, #tpu.memory_space<vmem>>, %arg3: memref<1x128xf32, #tpu.memory_space<vmem>>, %arg4: memref<16x128xbf16, #tpu.memory_space<vmem>>) attributes {dimension_semantics = [#tpu.dimension_semantics<parallel>], iteration_bounds = array<i64: 1>, scalar_prefetch = 0 : i64, scratch_operands = 0 : i64, tpu.core_type = #tpu.core_type<tc>, window_params = [{transform_indices = @transform_0, window_bounds = array<i64: 16, 128>}, {pipeline_mode = #tpu.pipeline_mode<synchronous>, transform_indices = @transform_1, window_bounds = array<i64: 128, 128>}, {pipeline_mode = #tpu.pipeline_mode<synchronous>, transform_indices = @transform_2, window_bounds = array<i64: 1, 128>}, {transform_indices = @transform_3, window_bounds = array<i64: 16, 128>}]} {
    %c0 = arith.constant 0 : index
    %c0_0 = arith.constant 0 : index
    %0 = vector.load %arg1[%c0, %c0_0] : memref<16x128xbf16, #tpu.memory_space<vmem>>, vector<16x128xbf16>
    %c0_1 = arith.constant 0 : index
    %c0_2 = arith.constant 0 : index
    %1 = vector.load %arg2[%c0_1, %c0_2] : memref<128x128xbf16, #tpu.memory_space<vmem>>, vector<128x128xbf16>
    %cst = arith.constant dense<0.000000e+00> : vector<16x128xf32>
    %2 = tpu.matmul %0, %1, %cst {dimension_numbers = #tpu.dot_dimension_numbers<[1], [0], [0], [1], [0, 0, 1, 1], [], []>} : vector<16x128xbf16>, vector<128x128xbf16>, vector<16x128xf32> -> vector<16x128xf32>
    %c0_3 = arith.constant 0 : index
    %c0_4 = arith.constant 0 : index
    %3 = vector.load %arg3[%c0_3, %c0_4] : memref<1x128xf32, #tpu.memory_space<vmem>>, vector<1x128xf32>
    %4 = vector.broadcast %3 : vector<1x128xf32> to vector<16x128xf32>
    %5 = arith.addf %2, %4 : vector<16x128xf32>
    %6 = arith.truncf %5 : vector<16x128xf32> to vector<16x128xbf16>
    %c0_5 = arith.constant 0 : index
    %c0_6 = arith.constant 0 : index
    %7 = vector.load %arg4[%c0_5, %c0_6] : memref<16x128xbf16, #tpu.memory_space<vmem>>, vector<16x128xbf16>
    tpu.vector_store %arg4[%c0_5, %c0_6], %6 {strides = array<i32>} : memref<16x128xbf16, #tpu.memory_space<vmem>>, vector<16x128xbf16>,
    return
  }
  func.func @transform_0(%arg0: i32) -> (i32, i32) {
    %c0_i32 = arith.constant 0 : i32
    %c0_i32_0 = arith.constant 0 : i32
    return %arg0, %c0_i32 : i32, i32
  }
  func.func @transform_1(%arg0: i32) -> (i32, i32) {
    %c0_i32 = arith.constant 0 : i32
    %c0_i32_0 = arith.constant 0 : i32
    %c0_i32_1 = arith.constant 0 : i32
    return %c0_i32, %c0_i32_0 : i32, i32
  }
  func.func @transform_2(%arg0: i32) -> (i32, i32) {
    %c0_i32 = arith.constant 0 : i32
    %c0_i32_0 = arith.constant 0 : i32
    %c0_i32_1 = arith.constant 0 : i32
    return %c0_i32, %c0_i32_0 : i32, i32
  }
  func.func @transform_3(%arg0: i32) -> (i32, i32) {
    %c0_i32 = arith.constant 0 : i32
    %c0_i32_0 = arith.constant 0 : i32
    return %arg0, %c0_i32 : i32, i32
  }
}

module attributes {stable_mosaic.version = 11 : i64} {
  func.func @_linear_bias_kernel(%arg0: i32, %arg1: memref<256x128xbf16, #tpu.memory_space<vmem>>, %arg2: memref<128x256xbf16, #tpu.memory_space<vmem>>, %arg3: memref<1x256xf32, #tpu.memory_space<vmem>>, %arg4: memref<256x256xbf16, #tpu.memory_space<vmem>>) attributes {dimension_semantics = [#tpu.dimension_semantics<parallel>], iteration_bounds = array<i64: 1>, scalar_prefetch = 0 : i64, scratch_operands = 0 : i64, tpu.core_type = #tpu.core_type<tc>, window_params = [{transform_indices = @transform_0, window_bounds = array<i64: 256, 128>}, {pipeline_mode = #tpu.pipeline_mode<synchronous>, transform_indices = @transform_1, window_bounds = array<i64: 128, 256>}, {pipeline_mode = #tpu.pipeline_mode<synchronous>, transform_indices = @transform_2, window_bounds = array<i64: 1, 256>}, {transform_indices = @transform_3, window_bounds = array<i64: 256, 256>}]} {
    %c0 = arith.constant 0 : index
    %c0_0 = arith.constant 0 : index
    %0 = vector.load %arg1[%c0, %c0_0] : memref<256x128xbf16, #tpu.memory_space<vmem>>, vector<256x128xbf16>
    %c0_1 = arith.constant 0 : index
    %c0_2 = arith.constant 0 : index
    %1 = vector.load %arg2[%c0_1, %c0_2] : memref<128x256xbf16, #tpu.memory_space<vmem>>, vector<128x256xbf16>
    %cst = arith.constant dense<0.000000e+00> : vector<256x256xf32>
    %2 = tpu.matmul %0, %1, %cst {dimension_numbers = #tpu.dot_dimension_numbers<[1], [0], [0], [1], [0, 0, 1, 1], [], []>} : vector<256x128xbf16>, vector<128x256xbf16>, vector<256x256xf32> -> vector<256x256xf32>
    %c0_3 = arith.constant 0 : index
    %c0_4 = arith.constant 0 : index
    %3 = vector.load %arg3[%c0_3, %c0_4] : memref<1x256xf32, #tpu.memory_space<vmem>>, vector<1x256xf32>
    %4 = vector.broadcast %3 : vector<1x256xf32> to vector<256x256xf32>
    %5 = arith.addf %2, %4 : vector<256x256xf32>
    %6 = arith.truncf %5 : vector<256x256xf32> to vector<256x256xbf16>
    %c0_5 = arith.constant 0 : index
    %c0_6 = arith.constant 0 : index
    %7 = vector.load %arg4[%c0_5, %c0_6] : memref<256x256xbf16, #tpu.memory_space<vmem>>, vector<256x256xbf16>
    tpu.vector_store %arg4[%c0_5, %c0_6], %6 {strides = array<i32>} : memref<256x256xbf16, #tpu.memory_space<vmem>>, vector<256x256xbf16>,
    return
  }
  func.func @transform_0(%arg0: i32) -> (i32, i32) {
    %c0_i32 = arith.constant 0 : i32
    %c0_i32_0 = arith.constant 0 : i32
    return %arg0, %c0_i32 : i32, i32
  }
  func.func @transform_1(%arg0: i32) -> (i32, i32) {
    %c0_i32 = arith.constant 0 : i32
    %c0_i32_0 = arith.constant 0 : i32
    %c0_i32_1 = arith.constant 0 : i32
    return %c0_i32, %c0_i32_0 : i32, i32
  }
  func.func @transform_2(%arg0: i32) -> (i32, i32) {
    %c0_i32 = arith.constant 0 : i32
    %c0_i32_0 = arith.constant 0 : i32
    %c0_i32_1 = arith.constant 0 : i32
    return %c0_i32, %c0_i32_0 : i32, i32
  }
  func.func @transform_3(%arg0: i32) -> (i32, i32) {
    %c0_i32 = arith.constant 0 : i32
    %c0_i32_0 = arith.constant 0 : i32
    return %arg0, %c0_i32 : i32, i32
  }
}

module attributes {stable_mosaic.version = 11 : i64} {
  func.func @_attn_block_kernel(%arg0: i32, %arg1: i32, %arg2: memref<1x8x128xbf16, #tpu.memory_space<vmem>>, %arg3: memref<1x128x128xbf16, #tpu.memory_space<vmem>>, %arg4: memref<1x128x128xbf16, #tpu.memory_space<vmem>>, %arg5: memref<1x1x128xf32, #tpu.memory_space<vmem>>, %arg6: memref<128x128xbf16, #tpu.memory_space<vmem>>, %arg7: memref<1x128xf32, #tpu.memory_space<vmem>>, %arg8: memref<1x8x128xbf16, #tpu.memory_space<vmem>>, %arg9: memref<1x128xf32, #tpu.memory_space<vmem>>, %arg10: memref<1x128xf32, #tpu.memory_space<vmem>>, %arg11: memref<1x8x128xbf16, #tpu.memory_space<vmem>>, %arg12: memref<1x8x128xbf16, #tpu.memory_space<vmem>>) attributes {dimension_semantics = [#tpu.dimension_semantics<parallel>, #tpu.dimension_semantics<parallel>], iteration_bounds = array<i64: 2, 1>, scalar_prefetch = 0 : i64, scratch_operands = 0 : i64, tpu.core_type = #tpu.core_type<tc>, window_params = [{transform_indices = @transform_0, window_bounds = array<i64: 1, 8, 128>}, {transform_indices = @transform_1, window_bounds = array<i64: 1, 128, 128>}, {transform_indices = @transform_2, window_bounds = array<i64: 1, 128, 128>}, {transform_indices = @transform_3, window_bounds = array<i64: 1, 1, 128>}, {pipeline_mode = #tpu.pipeline_mode<synchronous>, transform_indices = @transform_4, window_bounds = array<i64: 128, 128>}, {pipeline_mode = #tpu.pipeline_mode<synchronous>, transform_indices = @transform_5, window_bounds = array<i64: 1, 128>}, {transform_indices = @transform_6, window_bounds = array<i64: 1, 8, 128>}, {pipeline_mode = #tpu.pipeline_mode<synchronous>, transform_indices = @transform_7, window_bounds = array<i64: 1, 128>}, {pipeline_mode = #tpu.pipeline_mode<synchronous>, transform_indices = @transform_8, window_bounds = array<i64: 1, 128>}, {transform_indices = @transform_9, window_bounds = array<i64: 1, 8, 128>}, {transform_indices = @transform_10, window_bounds = array<i64: 1, 8, 128>}]} {
    %c0 = arith.constant 0 : index
    %c0_0 = arith.constant 0 : index
    %c0_1 = arith.constant 0 : index
    %0 = vector.load %arg2[%c0, %c0_0, %c0_1] : memref<1x8x128xbf16, #tpu.memory_space<vmem>>, vector<1x8x128xbf16>
    %1 = vector.shape_cast %0 : vector<1x8x128xbf16> to vector<8x128xbf16>
    %c0_2 = arith.constant 0 : index
    %c0_3 = arith.constant 0 : index
    %c0_4 = arith.constant 0 : index
    %2 = vector.load %arg3[%c0_2, %c0_3, %c0_4] : memref<1x128x128xbf16, #tpu.memory_space<vmem>>, vector<1x128x128xbf16>
    %3 = vector.shape_cast %2 : vector<1x128x128xbf16> to vector<128x128xbf16>
    %c0_5 = arith.constant 0 : index
    %c0_6 = arith.constant 0 : index
    %c0_7 = arith.constant 0 : index
    %4 = vector.load %arg4[%c0_5, %c0_6, %c0_7] : memref<1x128x128xbf16, #tpu.memory_space<vmem>>, vector<1x128x128xbf16>
    %5 = vector.shape_cast %4 : vector<1x128x128xbf16> to vector<128x128xbf16>
    %c0_8 = arith.constant 0 : index
    %c0_9 = arith.constant 0 : index
    %c0_10 = arith.constant 0 : index
    %6 = vector.load %arg5[%c0_8, %c0_9, %c0_10] : memref<1x1x128xf32, #tpu.memory_space<vmem>>, vector<1x1x128xf32>
    %7 = vector.shape_cast %6 : vector<1x1x128xf32> to vector<1x128xf32>
    %cst = arith.constant 0.000000e+00 : f32
    %8 = vector.broadcast %cst : f32 to vector<8x128xf32>
    %9 = vector.extract_strided_slice %1 {offsets = [0, 0], sizes = [8, 32], strides = [1, 1]} : vector<8x128xbf16> to vector<8x32xbf16>
    %10 = vector.extract_strided_slice %3 {offsets = [0, 0], sizes = [128, 32], strides = [1, 1]} : vector<128x128xbf16> to vector<128x32xbf16>
    %11 = vector.extract_strided_slice %5 {offsets = [0, 0], sizes = [128, 32], strides = [1, 1]} : vector<128x128xbf16> to vector<128x32xbf16>
    %cst_11 = arith.constant dense<0.000000e+00> : vector<8x128xf32>
    %12 = tpu.matmul %9, %10, %cst_11 {dimension_numbers = #tpu.dot_dimension_numbers<[1], [1], [0], [0], [0, 0, 1, 0], [], []>} : vector<8x32xbf16>, vector<128x32xbf16>, vector<8x128xf32> -> vector<8x128xf32>
    %13 = vector.broadcast %7 : vector<1x128xf32> to vector<8x128xf32>
    %14 = arith.addf %12, %13 : vector<8x128xf32>
    %cst_12 = arith.constant dense<0xFF800000> : vector<8xf32>
    %15 = vector.multi_reduction <maximumf>, %14, %cst_12 [1] : vector<8x128xf32> to vector<8xf32>
    %16 = vector.shape_cast %15 : vector<8xf32> to vector<8x1xf32>
    %17 = vector.broadcast %16 : vector<8x1xf32> to vector<8x128xf32>
    %18 = arith.subf %14, %17 : vector<8x128xf32>
    %19 = math.exp %18 : vector<8x128xf32>
    %cst_13 = arith.constant dense<0.000000e+00> : vector<8xf32>
    %20 = vector.multi_reduction <add>, %19, %cst_13 [1] : vector<8x128xf32> to vector<8xf32>
    %21 = vector.shape_cast %20 : vector<8xf32> to vector<8x1xf32>
    %22 = tpu.reciprocal %21 {approx = true} : vector<8x1xf32> -> vector<8x1xf32>
    %23 = vector.broadcast %22 : vector<8x1xf32> to vector<8x128xf32>
    %24 = arith.mulf %19, %23 : vector<8x128xf32>
    %25 = arith.truncf %24 : vector<8x128xf32> to vector<8x128xbf16>
    %cst_14 = arith.constant dense<0.000000e+00> : vector<8x32xf32>
    %26 = tpu.matmul %25, %11, %cst_14 {dimension_numbers = #tpu.dot_dimension_numbers<[1], [0], [0], [1], [0, 0, 1, 1], [], []>} : vector<8x128xbf16>, vector<128x32xbf16>, vector<8x32xf32> -> vector<8x32xf32>
    %27 = arith.truncf %26 : vector<8x32xf32> to vector<8x32xbf16>
    %c0_15 = arith.constant 0 : index
    %c0_16 = arith.constant 0 : index
    %28 = vector.load %arg6[%c0_15, %c0_16] : memref<128x128xbf16, #tpu.memory_space<vmem>>, vector<32x128xbf16>
    %cst_17 = arith.constant dense<0.000000e+00> : vector<8x128xf32>
    %29 = tpu.matmul %27, %28, %cst_17 {dimension_numbers = #tpu.dot_dimension_numbers<[1], [0], [0], [1], [0, 0, 1, 1], [], []>} : vector<8x32xbf16>, vector<32x128xbf16>, vector<8x128xf32> -> vector<8x128xf32>
    %30 = arith.addf %8, %29 : vector<8x128xf32>
    %31 = vector.extract_strided_slice %1 {offsets = [0, 32], sizes = [8, 32], strides = [1, 1]} : vector<8x128xbf16> to vector<8x32xbf16>
    %32 = vector.extract_strided_slice %3 {offsets = [0, 32], sizes = [128, 32], strides = [1, 1]} : vector<128x128xbf16> to vector<128x32xbf16>
    %33 = vector.extract_strided_slice %5 {offsets = [0, 32], sizes = [128, 32], strides = [1, 1]} : vector<128x128xbf16> to vector<128x32xbf16>
    %cst_18 = arith.constant dense<0.000000e+00> : vector<8x128xf32>
    %34 = tpu.matmul %31, %32, %cst_18 {dimension_numbers = #tpu.dot_dimension_numbers<[1], [1], [0], [0], [0, 0, 1, 0], [], []>} : vector<8x32xbf16>, vector<128x32xbf16>, vector<8x128xf32> -> vector<8x128xf32>
    %35 = vector.broadcast %7 : vector<1x128xf32> to vector<8x128xf32>
    %36 = arith.addf %34, %35 : vector<8x128xf32>
    %cst_19 = arith.constant dense<0xFF800000> : vector<8xf32>
    %37 = vector.multi_reduction <maximumf>, %36, %cst_19 [1] : vector<8x128xf32> to vector<8xf32>
    %38 = vector.shape_cast %37 : vector<8xf32> to vector<8x1xf32>
    %39 = vector.broadcast %38 : vector<8x1xf32> to vector<8x128xf32>
    %40 = arith.subf %36, %39 : vector<8x128xf32>
    %41 = math.exp %40 : vector<8x128xf32>
    %cst_20 = arith.constant dense<0.000000e+00> : vector<8xf32>
    %42 = vector.multi_reduction <add>, %41, %cst_20 [1] : vector<8x128xf32> to vector<8xf32>
    %43 = vector.shape_cast %42 : vector<8xf32> to vector<8x1xf32>
    %44 = tpu.reciprocal %43 {approx = true} : vector<8x1xf32> -> vector<8x1xf32>
    %45 = vector.broadcast %44 : vector<8x1xf32> to vector<8x128xf32>
    %46 = arith.mulf %41, %45 : vector<8x128xf32>
    %47 = arith.truncf %46 : vector<8x128xf32> to vector<8x128xbf16>
    %cst_21 = arith.constant dense<0.000000e+00> : vector<8x32xf32>
    %48 = tpu.matmul %47, %33, %cst_21 {dimension_numbers = #tpu.dot_dimension_numbers<[1], [0], [0], [1], [0, 0, 1, 1], [], []>} : vector<8x128xbf16>, vector<128x32xbf16>, vector<8x32xf32> -> vector<8x32xf32>
    %49 = arith.truncf %48 : vector<8x32xf32> to vector<8x32xbf16>
    %c32 = arith.constant 32 : index
    %c0_22 = arith.constant 0 : index
    %50 = vector.load %arg6[%c32, %c0_22] : memref<128x128xbf16, #tpu.memory_space<vmem>>, vector<32x128xbf16>
    %cst_23 = arith.constant dense<0.000000e+00> : vector<8x128xf32>
    %51 = tpu.matmul %49, %50, %cst_23 {dimension_numbers = #tpu.dot_dimension_numbers<[1], [0], [0], [1], [0, 0, 1, 1], [], []>} : vector<8x32xbf16>, vector<32x128xbf16>, vector<8x128xf32> -> vector<8x128xf32>
    %52 = arith.addf %30, %51 : vector<8x128xf32>
    %53 = arith.addf %24, %46 : vector<8x128xf32>
    %54 = vector.extract_strided_slice %1 {offsets = [0, 64], sizes = [8, 32], strides = [1, 1]} : vector<8x128xbf16> to vector<8x32xbf16>
    %55 = vector.extract_strided_slice %3 {offsets = [0, 64], sizes = [128, 32], strides = [1, 1]} : vector<128x128xbf16> to vector<128x32xbf16>
    %56 = vector.extract_strided_slice %5 {offsets = [0, 64], sizes = [128, 32], strides = [1, 1]} : vector<128x128xbf16> to vector<128x32xbf16>
    %cst_24 = arith.constant dense<0.000000e+00> : vector<8x128xf32>
    %57 = tpu.matmul %54, %55, %cst_24 {dimension_numbers = #tpu.dot_dimension_numbers<[1], [1], [0], [0], [0, 0, 1, 0], [], []>} : vector<8x32xbf16>, vector<128x32xbf16>, vector<8x128xf32> -> vector<8x128xf32>
    %58 = vector.broadcast %7 : vector<1x128xf32> to vector<8x128xf32>
    %59 = arith.addf %57, %58 : vector<8x128xf32>
    %cst_25 = arith.constant dense<0xFF800000> : vector<8xf32>
    %60 = vector.multi_reduction <maximumf>, %59, %cst_25 [1] : vector<8x128xf32> to vector<8xf32>
    %61 = vector.shape_cast %60 : vector<8xf32> to vector<8x1xf32>
    %62 = vector.broadcast %61 : vector<8x1xf32> to vector<8x128xf32>
    %63 = arith.subf %59, %62 : vector<8x128xf32>
    %64 = math.exp %63 : vector<8x128xf32>
    %cst_26 = arith.constant dense<0.000000e+00> : vector<8xf32>
    %65 = vector.multi_reduction <add>, %64, %cst_26 [1] : vector<8x128xf32> to vector<8xf32>
    %66 = vector.shape_cast %65 : vector<8xf32> to vector<8x1xf32>
    %67 = tpu.reciprocal %66 {approx = true} : vector<8x1xf32> -> vector<8x1xf32>
    %68 = vector.broadcast %67 : vector<8x1xf32> to vector<8x128xf32>
    %69 = arith.mulf %64, %68 : vector<8x128xf32>
    %70 = arith.truncf %69 : vector<8x128xf32> to vector<8x128xbf16>
    %cst_27 = arith.constant dense<0.000000e+00> : vector<8x32xf32>
    %71 = tpu.matmul %70, %56, %cst_27 {dimension_numbers = #tpu.dot_dimension_numbers<[1], [0], [0], [1], [0, 0, 1, 1], [], []>} : vector<8x128xbf16>, vector<128x32xbf16>, vector<8x32xf32> -> vector<8x32xf32>
    %72 = arith.truncf %71 : vector<8x32xf32> to vector<8x32xbf16>
    %c64 = arith.constant 64 : index
    %c0_28 = arith.constant 0 : index
    %73 = vector.load %arg6[%c64, %c0_28] : memref<128x128xbf16, #tpu.memory_space<vmem>>, vector<32x128xbf16>
    %cst_29 = arith.constant dense<0.000000e+00> : vector<8x128xf32>
    %74 = tpu.matmul %72, %73, %cst_29 {dimension_numbers = #tpu.dot_dimension_numbers<[1], [0], [0], [1], [0, 0, 1, 1], [], []>} : vector<8x32xbf16>, vector<32x128xbf16>, vector<8x128xf32> -> vector<8x128xf32>
    %75 = arith.addf %52, %74 : vector<8x128xf32>
    %76 = arith.addf %53, %69 : vector<8x128xf32>
    %77 = vector.extract_strided_slice %1 {offsets = [0, 96], sizes = [8, 32], strides = [1, 1]} : vector<8x128xbf16> to vector<8x32xbf16>
    %78 = vector.extract_strided_slice %3 {offsets = [0, 96], sizes = [128, 32], strides = [1, 1]} : vector<128x128xbf16> to vector<128x32xbf16>
    %79 = vector.extract_strided_slice %5 {offsets = [0, 96], sizes = [128, 32], strides = [1, 1]} : vector<128x128xbf16> to vector<128x32xbf16>
    %cst_30 = arith.constant dense<0.000000e+00> : vector<8x128xf32>
    %80 = tpu.matmul %77, %78, %cst_30 {dimension_numbers = #tpu.dot_dimension_numbers<[1], [1], [0], [0], [0, 0, 1, 0], [], []>} : vector<8x32xbf16>, vector<128x32xbf16>, vector<8x128xf32> -> vector<8x128xf32>
    %81 = vector.broadcast %7 : vector<1x128xf32> to vector<8x128xf32>
    %82 = arith.addf %80, %81 : vector<8x128xf32>
    %cst_31 = arith.constant dense<0xFF800000> : vector<8xf32>
    %83 = vector.multi_reduction <maximumf>, %82, %cst_31 [1] : vector<8x128xf32> to vector<8xf32>
    %84 = vector.shape_cast %83 : vector<8xf32> to vector<8x1xf32>
    %85 = vector.broadcast %84 : vector<8x1xf32> to vector<8x128xf32>
    %86 = arith.subf %82, %85 : vector<8x128xf32>
    %87 = math.exp %86 : vector<8x128xf32>
    %cst_32 = arith.constant dense<0.000000e+00> : vector<8xf32>
    %88 = vector.multi_reduction <add>, %87, %cst_32 [1] : vector<8x128xf32> to vector<8xf32>
    %89 = vector.shape_cast %88 : vector<8xf32> to vector<8x1xf32>
    %90 = tpu.reciprocal %89 {approx = true} : vector<8x1xf32> -> vector<8x1xf32>
    %91 = vector.broadcast %90 : vector<8x1xf32> to vector<8x128xf32>
    %92 = arith.mulf %87, %91 : vector<8x128xf32>
    %93 = arith.truncf %92 : vector<8x128xf32> to vector<8x128xbf16>
    %cst_33 = arith.constant dense<0.000000e+00> : vector<8x32xf32>
    %94 = tpu.matmul %93, %79, %cst_33 {dimension_numbers = #tpu.dot_dimension_numbers<[1], [0], [0], [1], [0, 0, 1, 1], [], []>} : vector<8x128xbf16>, vector<128x32xbf16>, vector<8x32xf32> -> vector<8x32xf32>
    %95 = arith.truncf %94 : vector<8x32xf32> to vector<8x32xbf16>
    %c96 = arith.constant 96 : index
    %c0_34 = arith.constant 0 : index
    %96 = vector.load %arg6[%c96, %c0_34] : memref<128x128xbf16, #tpu.memory_space<vmem>>, vector<32x128xbf16>
    %cst_35 = arith.constant dense<0.000000e+00> : vector<8x128xf32>
    %97 = tpu.matmul %95, %96, %cst_35 {dimension_numbers = #tpu.dot_dimension_numbers<[1], [0], [0], [1], [0, 0, 1, 1], [], []>} : vector<8x32xbf16>, vector<32x128xbf16>, vector<8x128xf32> -> vector<8x128xf32>
    %98 = arith.addf %75, %97 : vector<8x128xf32>
    %99 = arith.addf %76, %92 : vector<8x128xf32>
    %c0_36 = arith.constant 0 : index
    %c0_37 = arith.constant 0 : index
    %100 = vector.load %arg7[%c0_36, %c0_37] : memref<1x128xf32, #tpu.memory_space<vmem>>, vector<1x128xf32>
    %101 = vector.broadcast %100 : vector<1x128xf32> to vector<8x128xf32>
    %102 = arith.addf %98, %101 : vector<8x128xf32>
    %c0_38 = arith.constant 0 : index
    %c0_39 = arith.constant 0 : index
    %c0_40 = arith.constant 0 : index
    %103 = vector.load %arg8[%c0_38, %c0_39, %c0_40] : memref<1x8x128xbf16, #tpu.memory_space<vmem>>, vector<1x8x128xbf16>
    %104 = vector.shape_cast %103 : vector<1x8x128xbf16> to vector<8x128xbf16>
    %105 = arith.extf %104 : vector<8x128xbf16> to vector<8x128xf32>
    %106 = arith.addf %102, %105 : vector<8x128xf32>
    %cst_41 = arith.constant dense<0.000000e+00> : vector<8xf32>
    %107 = vector.multi_reduction <add>, %106, %cst_41 [1] : vector<8x128xf32> to vector<8xf32>
    %108 = vector.shape_cast %107 : vector<8xf32> to vector<8x1xf32>
    %cst_42 = arith.constant 1.280000e+02 : f32
    %109 = vector.broadcast %cst_42 : f32 to vector<8x1xf32>
    %110 = arith.divf %108, %109 : vector<8x1xf32>
    %111 = vector.broadcast %110 : vector<8x1xf32> to vector<8x128xf32>
    %112 = arith.subf %106, %111 : vector<8x128xf32>
    %113 = arith.mulf %112, %112 : vector<8x128xf32>
    %cst_43 = arith.constant dense<0.000000e+00> : vector<8xf32>
    %114 = vector.multi_reduction <add>, %113, %cst_43 [1] : vector<8x128xf32> to vector<8xf32>
    %115 = vector.shape_cast %114 : vector<8xf32> to vector<8x1xf32>
    %cst_44 = arith.constant 1.280000e+02 : f32
    %116 = vector.broadcast %cst_44 : f32 to vector<8x1xf32>
    %117 = arith.divf %115, %116 : vector<8x1xf32>
    %118 = vector.broadcast %110 : vector<8x1xf32> to vector<8x128xf32>
    %119 = arith.subf %106, %118 : vector<8x128xf32>
    %cst_45 = arith.constant 9.99999974E-6 : f32
    %120 = vector.broadcast %cst_45 : f32 to vector<8x1xf32>
    %121 = arith.addf %117, %120 : vector<8x1xf32>
    %122 = math.rsqrt %121 : vector<8x1xf32>
    %123 = vector.broadcast %122 : vector<8x1xf32> to vector<8x128xf32>
    %124 = arith.mulf %119, %123 : vector<8x128xf32>
    %c0_46 = arith.constant 0 : index
    %c0_47 = arith.constant 0 : index
    %125 = vector.load %arg9[%c0_46, %c0_47] : memref<1x128xf32, #tpu.memory_space<vmem>>, vector<1x128xf32>
    %126 = vector.broadcast %125 : vector<1x128xf32> to vector<8x128xf32>
    %127 = arith.mulf %124, %126 : vector<8x128xf32>
    %c0_48 = arith.constant 0 : index
    %c0_49 = arith.constant 0 : index
    %128 = vector.load %arg10[%c0_48, %c0_49] : memref<1x128xf32, #tpu.memory_space<vmem>>, vector<1x128xf32>
    %129 = vector.broadcast %128 : vector<1x128xf32> to vector<8x128xf32>
    %130 = arith.addf %127, %129 : vector<8x128xf32>
    %131 = arith.truncf %130 : vector<8x128xf32> to vector<8x128xbf16>
    %c0_50 = arith.constant 0 : index
    %c0_51 = arith.constant 0 : index
    %c0_52 = arith.constant 0 : index
    %132 = vector.load %arg11[%c0_50, %c0_51, %c0_52] : memref<1x8x128xbf16, #tpu.memory_space<vmem>>, vector<1x8x128xbf16>
    %133 = vector.shape_cast %132 : vector<1x8x128xbf16> to vector<8x128xbf16>
    %134 = vector.shape_cast %131 : vector<8x128xbf16> to vector<1x8x128xbf16>
    tpu.vector_store %arg11[%c0_50, %c0_51, %c0_52], %134 {strides = array<i32>} : memref<1x8x128xbf16, #tpu.memory_space<vmem>>, vector<1x8x128xbf16>,
    %cst_53 = arith.constant 2.500000e-01 : f32
    %135 = vector.broadcast %cst_53 : f32 to vector<8x128xf32>
    %136 = arith.mulf %99, %135 : vector<8x128xf32>
    %137 = arith.truncf %136 : vector<8x128xf32> to vector<8x128xbf16>
    %c0_54 = arith.constant 0 : index
    %c0_55 = arith.constant 0 : index
    %c0_56 = arith.constant 0 : index
    %138 = vector.load %arg12[%c0_54, %c0_55, %c0_56] : memref<1x8x128xbf16, #tpu.memory_space<vmem>>, vector<1x8x128xbf16>
    %139 = vector.shape_cast %138 : vector<1x8x128xbf16> to vector<8x128xbf16>
    %140 = vector.shape_cast %137 : vector<8x128xbf16> to vector<1x8x128xbf16>
    tpu.vector_store %arg12[%c0_54, %c0_55, %c0_56], %140 {strides = array<i32>} : memref<1x8x128xbf16, #tpu.memory_space<vmem>>, vector<1x8x128xbf16>,
    return
  }
  func.func @transform_0(%arg0: i32, %arg1: i32) -> (i32, i32, i32) {
    %c0_i32 = arith.constant 0 : i32
    %c0_i32_0 = arith.constant 0 : i32
    return %arg0, %arg1, %c0_i32 : i32, i32, i32
  }
  func.func @transform_1(%arg0: i32, %arg1: i32) -> (i32, i32, i32) {
    %c0_i32 = arith.constant 0 : i32
    %c0_i32_0 = arith.constant 0 : i32
    %c0_i32_1 = arith.constant 0 : i32
    return %arg0, %c0_i32, %c0_i32_0 : i32, i32, i32
  }
  func.func @transform_2(%arg0: i32, %arg1: i32) -> (i32, i32, i32) {
    %c0_i32 = arith.constant 0 : i32
    %c1_i32 = arith.constant 1 : i32
    %c0_i32_0 = arith.constant 0 : i32
    return %arg0, %c0_i32, %c1_i32 : i32, i32, i32
  }
  func.func @transform_3(%arg0: i32, %arg1: i32) -> (i32, i32, i32) {
    %c0_i32 = arith.constant 0 : i32
    %c0_i32_0 = arith.constant 0 : i32
    %c0_i32_1 = arith.constant 0 : i32
    return %arg0, %c0_i32, %c0_i32_0 : i32, i32, i32
  }
  func.func @transform_4(%arg0: i32, %arg1: i32) -> (i32, i32) {
    %c0_i32 = arith.constant 0 : i32
    %c0_i32_0 = arith.constant 0 : i32
    %c0_i32_1 = arith.constant 0 : i32
    return %c0_i32, %c0_i32_0 : i32, i32
  }
  func.func @transform_5(%arg0: i32, %arg1: i32) -> (i32, i32) {
    %c0_i32 = arith.constant 0 : i32
    %c0_i32_0 = arith.constant 0 : i32
    %c0_i32_1 = arith.constant 0 : i32
    return %c0_i32, %c0_i32_0 : i32, i32
  }
  func.func @transform_6(%arg0: i32, %arg1: i32) -> (i32, i32, i32) {
    %c0_i32 = arith.constant 0 : i32
    %c0_i32_0 = arith.constant 0 : i32
    return %arg0, %arg1, %c0_i32 : i32, i32, i32
  }
  func.func @transform_7(%arg0: i32, %arg1: i32) -> (i32, i32) {
    %c0_i32 = arith.constant 0 : i32
    %c0_i32_0 = arith.constant 0 : i32
    %c0_i32_1 = arith.constant 0 : i32
    return %c0_i32, %c0_i32_0 : i32, i32
  }
  func.func @transform_8(%arg0: i32, %arg1: i32) -> (i32, i32) {
    %c0_i32 = arith.constant 0 : i32
    %c0_i32_0 = arith.constant 0 : i32
    %c0_i32_1 = arith.constant 0 : i32
    return %c0_i32, %c0_i32_0 : i32, i32
  }
  func.func @transform_9(%arg0: i32, %arg1: i32) -> (i32, i32, i32) {
    %c0_i32 = arith.constant 0 : i32
    %c0_i32_0 = arith.constant 0 : i32
    return %arg0, %arg1, %c0_i32 : i32, i32, i32
  }
  func.func @transform_10(%arg0: i32, %arg1: i32) -> (i32, i32, i32) {
    %c0_i32 = arith.constant 0 : i32
    %c0_i32_0 = arith.constant 0 : i32
    return %arg0, %arg1, %c0_i32 : i32, i32, i32
  }
}

</mosaic_0001>

<bundles_post_ra>
// kernel: paired_transformer_encoder_layer.10
= control target key start
LH: loop header
LB: loop body
LE: loop exit
PB: predicated region body
PF: predicated region fallthrough
CT: control target
= control target key end

     0   :  { %8 = vsyncpa [#allocation3], 0  ;;  %s209_s15 = smov [#allocation2]   ;;  %s210_s17 = smov 64   ;;  %s244_s0 = inlined_call_operand.vmem [shape: bf16[16,128], index: 0, kind: input, shape index: {}]   ;;  %s245_s1 = inlined_call_operand.hbm [shape: bf16[128,128], index: 1, kind: input, shape index: {}]   ;;  %s246_s2 = inlined_call_operand.vmem [shape: f32[1,128], index: 2, kind: input, shape index: {}]   ;;  %s247_s3 = inlined_call_operand.vmem [shape: bf16[16,128], index: 3, kind: output, shape index: {}]  }
   0x1   :  { %s15_s14 = sshll.u32 %s245_s1, 4  ;;  %s17_s16 = sshll.u32 %s209_s15, 4  ;;  %s16_s14 = int_to_ptr.hbm [resolvable:$true] %s15_s14  ;;  %s18_s16 = int_to_ptr.vmem [resolvable:$true] %s17_s16 }
   0x2   :  { %s211_s18 = smov 4  }
   0x3   :  { %23 = dma.hbm_to_vmem [thread:$0]  %s16_s14, 1024, %s18_s16, [#allocation3], %s210_s17, %s210_s17, %s211_s18  }
   0x4   :  { %207 = dma.done.wait [#allocation3], 1024  }
   0x5   :  { %208 = vsyncadd [#allocation3], 4294966272  ;;  %v173_v0 = vld [vmem:[#allocation2 + $0x38] sm:$0xff]  ;;  %v172_v1 = vld [vmem:[#allocation2 + $0x30] sm:$0xff] }
   0x6   :  { %106 = vmatpush.bf16.msra.mxu0 %v173_v0  ;;  %v171_v2 = vld [vmem:[#allocation2 + $0x28] sm:$0xff]  ;;  %v170_v3 = vld [vmem:[#allocation2 + $0x20] sm:$0xff]  ;;  %v169_v4 = vld [vmem:[#allocation2 + $0x18] sm:$0xff] }
   0x7   :  { %v168_v5 = vld [vmem:[#allocation2 + $0x10] sm:$0xff]  ;;  %v167_v6 = vld [vmem:[#allocation2 + $0x8] sm:$0xff]  ;;  %v166_v7 = vld [vmem:[#allocation2] sm:$0xff] }
   0x8   :  { %v165_v8 = vld [vmem:[%s244_s0] sm:$0xff] }
   0x9   :  { %v182_v10 = vld [vmem:[%s246_s2] ss:$0 sm:$0xff] }
   0xa   :  { %107 = vmatpush.bf16.msra.mxu0 %v172_v1 }
   0xe   :  { %108 = vmatpush.bf16.msra.mxu0 %v171_v2 }
  0x12   :  { %109 = vmatpush.bf16.msra.mxu0 %v170_v3 }
  0x16   :  { %110 = vmatpush.bf16.msra.mxu0 %v169_v4 }
  0x1a   :  { %111 = vmatpush.bf16.msra.mxu0 %v168_v5 }
  0x1e   :  { %112 = vmatpush.bf16.msra.mxu0 %v167_v6 }
  0x22   :  { %113 = vmatpush.bf16.msra.mxu0 %v166_v7 }
  0x25   :  { %114 = vmatmul.bf16.vlgmr.msra.gmra.mxu0 %v165_v8 }
  0xa2   :  { %v115_v9 = vpop.f32.mrf.mxu0 }
  0xa3   :  { %v116_v12 = vadd.f32 %v182_v10, %v115_v9 }
  0xaa   :  { %v117_v11 = vpop.f32.mrf.mxu0 }
  0xab   :  { %v118_v13 = vadd.f32 %v182_v10, %v117_v11 }
  0xad   :  { %v177_v14 = vpack.c.bf16 %v118_v13, %v116_v12 }
  0xaf   :  { %178 = vst [vmem:[%s247_s3] sm:$0xff] %v177_v14  }
  0xb0   :  { %128 = vsyncpa [#allocation3], 1 }

// kernel: paired_transformer_encoder_layer.7
= control target key start
LH: loop header
LB: loop body
LE: loop exit
PB: predicated region body
PF: predicated region fallthrough
CT: control target
= control target key end

     0   :  { %8 = vsyncpa [#allocation3], 0  ;;  %s415_s15 = smov [#allocation2]   ;;  %s416_s17 = smov 192   ;;  %s459_s0 = inlined_call_operand.vmem [shape: bf16[16,128], index: 0, kind: input, shape index: {}]   ;;  %s460_s1 = inlined_call_operand.hbm [shape: bf16[128,384], index: 1, kind: input, shape index: {}]   ;;  %s461_s2 = inlined_call_operand.vmem [shape: f32[1,384], index: 2, kind: input, shape index: {}]   ;;  %s462_s3 = inlined_call_operand.vmem [shape: bf16[16,384], index: 3, kind: output, shape index: {}]  }
   0x1   :  { %s15_s14 = sshll.u32 %s460_s1, 4  ;;  %s17_s16 = sshll.u32 %s415_s15, 4  ;;  %s16_s14 = int_to_ptr.hbm [resolvable:$true] %s15_s14  ;;  %s18_s16 = int_to_ptr.vmem [resolvable:$true] %s17_s16 }
   0x2   :  { %s417_s18 = smov 12  }
   0x3   :  { %23 = dma.hbm_to_vmem [thread:$0]  %s16_s14, 3072, %s18_s16, [#allocation3], %s416_s17, %s416_s17, %s417_s18  }
   0x4   :  { %413 = dma.done.wait [#allocation3], 3072  }
   0x5   :  { %414 = vsyncadd [#allocation3], 4294964224  ;;  %v351_v0 = vld [vmem:[#allocation2 + $0xa8] sm:$0xf]  ;;  %v384_v1 = vld [vmem:[#allocation2 + $0xb0] sm:$0xf0] }
   0x6   :  { %v383_v2 = vld [vmem:[#allocation2 + $0xac] sm:$0xf]  ;;  %v352_v3 = vor.u32 %v384_v1, %v351_v0  ;;  %v353_v4 = vld [vmem:[#allocation2 + $0xb4] sm:$0xf0]  ;;  %v359_v5 = vld [vmem:[#allocation2 + $0xb0] sm:$0xf] }
   0x7   :  { %v385_v6 = vld [vmem:[#allocation2 + $0xb8] sm:$0xf0]  ;;  %v356_v7 = vor.u32 %v383_v2, %v353_v4  ;;  %v339_v9 = vld [vmem:[#allocation2 + $0x90] sm:$0xf]  ;;  %v380_v11 = vld [vmem:[#allocation2 + $0x94] sm:$0xf] }
   0x8   :  { %v360_v8 = vor.u32 %v385_v6, %v359_v5  ;;  %v381_v10 = vld [vmem:[#allocation2 + $0x98] sm:$0xf0]  ;;  %206 = vmatpush.bf16.msra.mxu0 %v352_v3  ;;  %v341_v13 = vld [vmem:[#allocation2 + $0x9c] sm:$0xf0]  ;;  %v347_v14 = vld [vmem:[#allocation2 + $0x98] sm:$0xf] }
   0x9   :  { %v340_v12 = vor.u32 %v381_v10, %v339_v9  ;;  %v382_v15 = vld [vmem:[#allocation2 + $0xa0] sm:$0xf0]  ;;  %220 = vmatpush.bf16.msra.mxu1 %v356_v7  ;;  %v344_v16 = vor.u32 %v380_v11, %v341_v13  ;;  %v327_v18 = vld [vmem:[#allocation2 + $0x78] sm:$0xf]  ;;  %v377_v20 = vld [vmem:[#allocation2 + $0x7c] sm:$0xf] }
   0xa   :  { %234 = vmatpush.bf16.msra.mxu2 %v360_v8  ;;  %v348_v17 = vor.u32 %v382_v15, %v347_v14  ;;  %v378_v19 = vld [vmem:[#allocation2 + $0x80] sm:$0xf0]  ;;  %v329_v21 = vld [vmem:[#allocation2 + $0x84] sm:$0xf0]  ;;  %v335_v22 = vld [vmem:[#allocation2 + $0x80] sm:$0xf] }
   0xb   :  { %v379_v23 = vld [vmem:[#allocation2 + $0x88] sm:$0xf0]  ;;  %v328_v24 = vor.u32 %v378_v19, %v327_v18  ;;  %v332_v25 = vor.u32 %v377_v20, %v329_v21  ;;  %v315_v27 = vld [vmem:[#allocation2 + $0x60] sm:$0xf]  ;;  %v374_v29 = vld [vmem:[#allocation2 + $0x64] sm:$0xf] }
   0xc   :  { %207 = vmatpush.bf16.msra.mxu0 %v340_v12  ;;  %v336_v26 = vor.u32 %v379_v23, %v335_v22  ;;  %v375_v28 = vld [vmem:[#allocation2 + $0x68] sm:$0xf0]  ;;  %v317_v30 = vld [vmem:[#allocation2 + $0x6c] sm:$0xf0]  ;;  %v323_v31 = vld [vmem:[#allocation2 + $0x68] sm:$0xf] }
   0xd   :  { %221 = vmatpush.bf16.msra.mxu1 %v344_v16  ;;  %v376_v32 = vld [vmem:[#allocation2 + $0x70] sm:$0xf0]  ;;  %v316_v33 = vor.u32 %v375_v28, %v315_v27  ;;  %v320_v34 = vor.u32 %v374_v29, %v317_v30  ;;  %v303_v36 = vld [vmem:[#allocation2 + $0x48] sm:$0xf]  ;;  %v371_v38 = vld [vmem:[#allocation2 + $0x4c] sm:$0xf] }
   0xe   :  { %235 = vmatpush.bf16.msra.mxu2 %v348_v17  ;;  %v324_v35 = vor.u32 %v376_v32, %v323_v31  ;;  %v372_v37 = vld [vmem:[#allocation2 + $0x50] sm:$0xf0]  ;;  %v305_v39 = vld [vmem:[#allocation2 + $0x54] sm:$0xf0]  ;;  %v311_v40 = vld [vmem:[#allocation2 + $0x50] sm:$0xf] }
   0xf   :  { %v373_v41 = vld [vmem:[#allocation2 + $0x58] sm:$0xf0]  ;;  %v304_v42 = vor.u32 %v372_v37, %v303_v36  ;;  %v308_v43 = vor.u32 %v371_v38, %v305_v39  ;;  %v291_v45 = vld [vmem:[#allocation2 + $0x30] sm:$0xf]  ;;  %v368_v47 = vld [vmem:[#allocation2 + $0x34] sm:$0xf] }
  0x10   :  { %208 = vmatpush.bf16.msra.mxu0 %v328_v24  ;;  %v312_v44 = vor.u32 %v373_v41, %v311_v40  ;;  %v369_v46 = vld [vmem:[#allocation2 + $0x38] sm:$0xf0]  ;;  %v293_v48 = vld [vmem:[#allocation2 + $0x3c] sm:$0xf0]  ;;  %v299_v49 = vld [vmem:[#allocation2 + $0x38] sm:$0xf] }
  0x11   :  { %222 = vmatpush.bf16.msra.mxu1 %v332_v25  ;;  %v370_v50 = vld [vmem:[#allocation2 + $0x40] sm:$0xf0]  ;;  %v292_v51 = vor.u32 %v369_v46, %v291_v45  ;;  %v296_v52 = vor.u32 %v368_v47, %v293_v48  ;;  %v279_v54 = vld [vmem:[#allocation2 + $0x18] sm:$0xf]  ;;  %v365_v56 = vld [vmem:[#allocation2 + $0x1c] sm:$0xf] }
  0x12   :  { %236 = vmatpush.bf16.msra.mxu2 %v336_v26  ;;  %v300_v53 = vor.u32 %v370_v50, %v299_v49  ;;  %v366_v55 = vld [vmem:[#allocation2 + $0x20] sm:$0xf0]  ;;  %v281_v57 = vld [vmem:[#allocation2 + $0x24] sm:$0xf0]  ;;  %v287_v58 = vld [vmem:[#allocation2 + $0x20] sm:$0xf] }
  0x13   :  { %v367_v59 = vld [vmem:[#allocation2 + $0x28] sm:$0xf0]  ;;  %v280_v60 = vor.u32 %v366_v55, %v279_v54  ;;  %v284_v61 = vor.u32 %v365_v56, %v281_v57  ;;  %v267_v63 = vld [vmem:[#allocation2] sm:$0xf]  ;;  %v362_v1 = vld [vmem:[#allocation2 + $0x4] sm:$0xf] }
  0x14   :  { %209 = vmatpush.bf16.msra.mxu0 %v316_v33  ;;  %v288_v62 = vor.u32 %v367_v59, %v287_v58  ;;  %v363_v0 = vld [vmem:[#allocation2 + $0x8] sm:$0xf0]  ;;  %v269_v2 = vld [vmem:[#allocation2 + $0xc] sm:$0xf0]  ;;  %v275_v3 = vld [vmem:[#allocation2 + $0x8] sm:$0xf] }
  0x15   :  { %223 = vmatpush.bf16.msra.mxu1 %v320_v34  ;;  %v364_v4 = vld [vmem:[#allocation2 + $0x10] sm:$0xf0]  ;;  %v268_v5 = vor.u32 %v363_v0, %v267_v63  ;;  %v272_v6 = vor.u32 %v362_v1, %v269_v2  ;;  %v361_v8 = vld [vmem:[%s459_s0] sm:$0xff] }
  0x16   :  { %237 = vmatpush.bf16.msra.mxu2 %v324_v35  ;;  %v276_v7 = vor.u32 %v364_v4, %v275_v3  ;;  %v64_v9 = vld [vmem:[%s461_s2] sm:$0x7] }
  0x17   :  { %v66_v10 = vperm.slane %v64_v9, 0  ;;  %v67_v11 = vperm.slane %v64_v9, 1  ;;  %v68_v17 = vperm.slane %v64_v9, 2 }
  0x18   :  { %210 = vmatpush.bf16.msra.mxu0 %v304_v42 }
  0x19   :  { %224 = vmatpush.bf16.msra.mxu1 %v308_v43 }
  0x1a   :  { %238 = vmatpush.bf16.msra.mxu2 %v312_v44 }
  0x1c   :  { %211 = vmatpush.bf16.msra.mxu0 %v292_v51 }
  0x1d   :  { %225 = vmatpush.bf16.msra.mxu1 %v296_v52 }
  0x1e   :  { %239 = vmatpush.bf16.msra.mxu2 %v300_v53 }
  0x20   :  { %212 = vmatpush.bf16.msra.mxu0 %v280_v60 }
  0x21   :  { %226 = vmatpush.bf16.msra.mxu1 %v284_v61 }
  0x22   :  { %240 = vmatpush.bf16.msra.mxu2 %v288_v62 }
  0x24   :  { %213 = vmatpush.bf16.msra.mxu0 %v268_v5 }
  0x25   :  { %227 = vmatpush.bf16.msra.mxu1 %v272_v6 }
  0x26   :  { %241 = vmatpush.bf16.msra.mxu2 %v276_v7 }
  0x27   :  { %214 = vmatmul.bf16.vlgmr.msra.gmra.mxu0 %v361_v8 }
  0x28   :  { %228 = vmatmul.bf16.vlgmr.msra.gmra.mxu1 %v361_v8 }
  0x29   :  { %242 = vmatmul.bf16.vlgmr.msra.gmra.mxu2 %v361_v8 }
  0xa4   :  { %v215_v12 = vpop.f32.mrf.mxu0 }
  0xa5   :  { %v216_v13 = vadd.f32 %v215_v12, %v66_v10  ;;  %v229_v14 = vpop.f32.mrf.mxu1 }
  0xa6   :  { %v230_v15 = vadd.f32 %v229_v14, %v67_v11 }
  0xa8   :  { %v248_v16 = vpack.c.bf16 %v230_v15, %v216_v13 }
  0xaa   :  { %252 = vst [vmem:[%s462_s3] sm:$0xff] %v248_v16 }
  0xac   :  { %v243_v18 = vpop.f32.mrf.mxu2  ;;  %v217_v20 = vpop.f32.mrf.mxu0 }
  0xad   :  { %v244_v19 = vadd.f32 %v243_v18, %v68_v17  ;;  %v218_v21 = vadd.f32 %v217_v20, %v66_v10  ;;  %v231_v22 = vpop.f32.mrf.mxu1 }
  0xae   :  { %v232_v24 = vadd.f32 %v231_v22, %v67_v11 }
  0xaf   :  { %v249_v23 = vpack.c.bf16 %v244_v19, %v244_v19 }
  0xb0   :  { %v250_v25 = vpack.c.bf16 %v232_v24, %v218_v21 }
  0xb1   :  { %253 = vst [vmem:[%s462_s3 + $0x8] sm:$0xf] %v249_v23 }
  0xb2   :  { %254 = vst [vmem:[%s462_s3 + $0xc] sm:$0xff] %v250_v25 }
  0xb4   :  { %v245_v26 = vpop.f32.mrf.mxu2 }
  0xb5   :  { %v246_v27 = vadd.f32 %v245_v26, %v68_v17 }
  0xb7   :  { %v251_v28 = vpack.c.bf16 %v246_v27, %v246_v27 }
  0xb9   :  { %255 = vst [vmem:[%s462_s3 + $0x14] sm:$0xf] %v251_v28 }
  0xba   :  { %260 = vsyncpa [#allocation3], 1 }

// kernel: paired_transformer_encoder_layer.9
= control target key start
LH: loop header
LB: loop body
LE: loop exit
PB: predicated region body
PF: predicated region fallthrough
CT: control target
= control target key end

     0   :  { %12 = vsyncpa [#allocation3], 0  ;;  %s747_s0 = inlined_call_operand.vmem [shape: bf16[16,128], index: 0, kind: input, shape index: {}]   ;;  %s748_s1 = inlined_call_operand.hbm [shape: bf16[128,256], index: 1, kind: input, shape index: {}]   ;;  %s749_s2 = inlined_call_operand.vmem [shape: f32[1,256], index: 2, kind: input, shape index: {}]   ;;  %s750_s3 = inlined_call_operand.hbm [shape: bf16[256,128], index: 3, kind: input, shape index: {}]   ;;  %s751_s4 = inlined_call_operand.vmem [shape: f32[1,128], index: 4, kind: input, shape index: {}]   ;;  %s752_s5 = inlined_call_operand.vmem [shape: f32[1,128], index: 5, kind: input, shape index: {}]   ;;  %s753_s6 = inlined_call_operand.vmem [shape: f32[1,128], index: 6, kind: input, shape index: {}]   ;;  %s754_s7 = inlined_call_operand.vmem [shape: bf16[16,128], index: 7, kind: output, shape index: {}]  }
   0x1   :  { %s20_s26 = sshll.u32 %s748_s1, 4  ;;  %s21_s26 = int_to_ptr.hbm [resolvable:$true] %s20_s26 }
   0x2   :  { %13 = vsyncpa [#allocation5], 0  ;;  %s673_s27 = smov [#allocation2]   ;;  %s35_s8 = sshll.u32 %s750_s3, 4  ;;  %s36_s8 = int_to_ptr.hbm [resolvable:$true] %s35_s8 }
   0x3   :  { %s22_s28 = sshll.u32 %s673_s27, 4  ;;  %s674_s9 = smov 128   ;;  %s23_s28 = int_to_ptr.vmem [resolvable:$true] %s22_s28 }
   0x4   :  { %s675_s10 = smov 8   ;;  %s676_s11 = smov [#allocation4]  }
   0x5   :  { %28 = dma.hbm_to_vmem [thread:$0]  %s21_s26, 2048, %s23_s28, [#allocation3], %s674_s9, %s674_s9, %s675_s10  }
   0x6   :  { %s37_s12 = sshll.u32 %s676_s11, 4  ;;  %s677_s13 = smov 64   ;;  %s38_s12 = int_to_ptr.vmem [resolvable:$true] %s37_s12 }
   0x7   :  { %s678_s14 = smov 4  }
   0x8   :  { %43 = dma.hbm_to_vmem [thread:$0]  %s36_s8, 2048, %s38_s12, [#allocation5], %s677_s13, %s677_s13, %s678_s14  }
   0x9   :  { %669 = dma.done.wait [#allocation3], 2048  }
   0xa   :  { %670 = vsyncadd [#allocation3], 4294965248 }
   0xb   :  { %671 = dma.done.wait [#allocation5], 2048  }
   0xc   :  { %672 = vsyncadd [#allocation5], 4294965248  ;;  %v497_v0 = vld [vmem:[#allocation2 + $0x70] sm:$0xf]  ;;  %v583_v1 = vld [vmem:[#allocation2 + $0x74] sm:$0xf0] }
   0xd   :  { %v582_v2 = vld [vmem:[#allocation2 + $0x74] sm:$0xf]  ;;  %v498_v3 = vor.u32 %v583_v1, %v497_v0  ;;  %v499_v4 = vld [vmem:[#allocation2 + $0x78] sm:$0xf0]  ;;  %v489_v5 = vld [vmem:[#allocation2 + $0x60] sm:$0xf] }
   0xe   :  { %v581_v6 = vld [vmem:[#allocation2 + $0x64] sm:$0xf0]  ;;  %v502_v7 = vor.u32 %v582_v2, %v499_v4  ;;  %v580_v8 = vld [vmem:[#allocation2 + $0x64] sm:$0xf]  ;;  %v491_v9 = vld [vmem:[#allocation2 + $0x68] sm:$0xf0] }
   0xf   :  { %170 = vmatpush.bf16.msra.mxu0 %v498_v3  ;;  %v490_v10 = vor.u32 %v581_v6, %v489_v5  ;;  %v494_v11 = vor.u32 %v580_v8, %v491_v9  ;;  %v481_v12 = vld [vmem:[#allocation2 + $0x50] sm:$0xf]  ;;  %v579_v13 = vld [vmem:[#allocation2 + $0x54] sm:$0xf0]  ;;  %v578_v14 = vld [vmem:[#allocation2 + $0x54] sm:$0xf] }
  0x10   :  { %184 = vmatpush.bf16.msra.mxu1 %v502_v7  ;;  %v483_v15 = vld [vmem:[#allocation2 + $0x58] sm:$0xf0]  ;;  %v482_v16 = vor.u32 %v579_v13, %v481_v12  ;;  %v473_v18 = vld [vmem:[#allocation2 + $0x40] sm:$0xf]  ;;  %v577_v19 = vld [vmem:[#allocation2 + $0x44] sm:$0xf0] }
  0x11   :  { %v486_v17 = vor.u32 %v578_v14, %v483_v15  ;;  %v576_v20 = vld [vmem:[#allocation2 + $0x44] sm:$0xf]  ;;  %v475_v21 = vld [vmem:[#allocation2 + $0x48] sm:$0xf0]  ;;  %v474_v22 = vor.u32 %v577_v19, %v473_v18  ;;  %v591_v23 = vld [vmem:[#allocation4 + $0x38] sm:$0xff] }
  0x12   :  { %v599_v24 = vld [vmem:[#allocation4 + $0x78] sm:$0xff]  ;;  %v478_v25 = vor.u32 %v576_v20, %v475_v21  ;;  %v465_v26 = vld [vmem:[#allocation2 + $0x30] sm:$0xf]  ;;  %v574_v28 = vld [vmem:[#allocation2 + $0x34] sm:$0xf]  ;;  %336 = vmatpush.bf16.msra.mxu2 %v591_v23 }
  0x13   :  { %171 = vmatpush.bf16.msra.mxu0 %v490_v10  ;;  %v575_v27 = vld [vmem:[#allocation2 + $0x34] sm:$0xf0]  ;;  %v467_v29 = vld [vmem:[#allocation2 + $0x38] sm:$0xf0]  ;;  %350 = vmatpush.bf16.msra.mxu3 %v599_v24  ;;  %v590_v30 = vld [vmem:[#allocation4 + $0x30] sm:$0xff] }
  0x14   :  { %185 = vmatpush.bf16.msra.mxu1 %v494_v11  ;;  %v598_v31 = vld [vmem:[#allocation4 + $0x70] sm:$0xff]  ;;  %v466_v32 = vor.u32 %v575_v27, %v465_v26  ;;  %v470_v33 = vor.u32 %v574_v28, %v467_v29  ;;  %v457_v34 = vld [vmem:[#allocation2 + $0x20] sm:$0xf]  ;;  %v573_v35 = vld [vmem:[#allocation2 + $0x24] sm:$0xf0] }
  0x15   :  { %v572_v36 = vld [vmem:[#allocation2 + $0x24] sm:$0xf]  ;;  %v459_v37 = vld [vmem:[#allocation2 + $0x28] sm:$0xf0]  ;;  %v458_v40 = vor.u32 %v573_v35, %v457_v34  ;;  %v449_v42 = vld [vmem:[#allocation2 + $0x10] sm:$0xf] }
  0x16   :  { %337 = vmatpush.bf16.msra.mxu2 %v590_v30  ;;  %v589_v38 = vld [vmem:[#allocation4 + $0x28] sm:$0xff]  ;;  %v462_v41 = vor.u32 %v572_v36, %v459_v37  ;;  %v571_v43 = vld [vmem:[#allocation2 + $0x14] sm:$0xf0]  ;;  %v570_v44 = vld [vmem:[#allocation2 + $0x14] sm:$0xf] }
  0x17   :  { %172 = vmatpush.bf16.msra.mxu0 %v482_v16  ;;  %351 = vmatpush.bf16.msra.mxu3 %v598_v31  ;;  %v597_v39 = vld [vmem:[#allocation4 + $0x68] sm:$0xff]  ;;  %v451_v45 = vld [vmem:[#allocation2 + $0x18] sm:$0xf0]  ;;  %v588_v46 = vld [vmem:[#allocation4 + $0x20] sm:$0xff]  ;;  %v450_v48 = vor.u32 %v571_v43, %v449_v42 }
  0x18   :  { %186 = vmatpush.bf16.msra.mxu1 %v486_v17  ;;  %v596_v47 = vld [vmem:[#allocation4 + $0x60] sm:$0xff]  ;;  %v454_v49 = vor.u32 %v570_v44, %v451_v45  ;;  %v569_v51 = vld [vmem:[#allocation2 + $0x4] sm:$0xf0]  ;;  %v443_v53 = vld [vmem:[#allocation2 + $0x8] sm:$0xf0] }
  0x19   :  { %v441_v50 = vld [vmem:[#allocation2] sm:$0xf]  ;;  %v568_v52 = vld [vmem:[#allocation2 + $0x4] sm:$0xf]  ;;  %v587_v57 = vld [vmem:[#allocation4 + $0x18] sm:$0xff] }
  0x1a   :  { %338 = vmatpush.bf16.msra.mxu2 %v589_v38  ;;  %v442_v54 = vor.u32 %v569_v51, %v441_v50  ;;  %v446_v55 = vor.u32 %v568_v52, %v443_v53  ;;  %v567_v56 = vld [vmem:[%s747_s0] sm:$0xff]  ;;  %v595_v58 = vld [vmem:[#allocation4 + $0x58] sm:$0xff]  ;;  %v586_v59 = vld [vmem:[#allocation4 + $0x10] sm:$0xff] }
  0x1b   :  { %173 = vmatpush.bf16.msra.mxu0 %v474_v22  ;;  %352 = vmatpush.bf16.msra.mxu3 %v597_v39  ;;  %v594_v60 = vld [vmem:[#allocation4 + $0x50] sm:$0xff]  ;;  %v585_v61 = vld [vmem:[#allocation4 + $0x8] sm:$0xff]  ;;  %v584_v63 = vld [vmem:[#allocation4] sm:$0xff] }
  0x1c   :  { %187 = vmatpush.bf16.msra.mxu1 %v478_v25  ;;  %v593_v62 = vld [vmem:[#allocation4 + $0x48] sm:$0xff]  ;;  %v592_v0 = vld [vmem:[#allocation4 + $0x40] sm:$0xff] }
  0x1d   :  { %v78_v1 = vld [vmem:[%s749_s2] sm:$0x3] }
  0x1e   :  { %339 = vmatpush.bf16.msra.mxu2 %v588_v46  ;;  %v80_v4 = vperm.slane %v78_v1, 0  ;;  %v81_v5 = vperm.slane %v78_v1, 1  ;;  %v612_v18 = vld [vmem:[%s751_s4] ss:$0 sm:$0xff] }
  0x1f   :  { %174 = vmatpush.bf16.msra.mxu0 %v466_v32  ;;  %353 = vmatpush.bf16.msra.mxu3 %v596_v47  ;;  %v58_v19 = vld [vmem:[%s747_s0] sm:$0xff]   ;;  %v679_v32 = vmov 128.0  }
  0x20   :  { %188 = vmatpush.bf16.msra.mxu1 %v470_v33  ;;  %v60_v23 = vunpack.c.l.bf16 %v58_v19  ;;  %v61_v28 = vunpack.c.h.bf16 %v58_v19  ;;  %615 = vrcp.f32 %v679_v32  ;;  %v613_v1 = vld [vmem:[%s752_s5] ss:$0 sm:$0xff] }
  0x22   :  { %340 = vmatpush.bf16.msra.mxu2 %v587_v57 }
  0x23   :  { %175 = vmatpush.bf16.msra.mxu0 %v458_v40  ;;  %354 = vmatpush.bf16.msra.mxu3 %v595_v58 }
  0x24   :  { %189 = vmatpush.bf16.msra.mxu1 %v462_v41 }
  0x26   :  { %341 = vmatpush.bf16.msra.mxu2 %v586_v59  ;;  %v616_v33 = vpop.eup %615 }
  0x27   :  { %176 = vmatpush.bf16.msra.mxu0 %v450_v48  ;;  %355 = vmatpush.bf16.msra.mxu3 %v594_v60  ;;  %v371_v34 = vmul.f32 128.0, %v616_v33  ;;  %vm375_vm0 = vweird.f32 %v616_v33 }
  0x28   :  { %190 = vmatpush.bf16.msra.mxu1 %v454_v49 }
  0x29   :  { %v372_v35 = vsub.f32 1.0, %v371_v34 }
  0x2a   :  { %342 = vmatpush.bf16.msra.mxu2 %v585_v61 }
  0x2b   :  { %177 = vmatpush.bf16.msra.mxu0 %v442_v54  ;;  %356 = vmatpush.bf16.msra.mxu3 %v593_v62  ;;  %v373_v36 = vmul.f32 %v616_v33, %v372_v35 }
  0x2c   :  { %191 = vmatpush.bf16.msra.mxu1 %v446_v55 }
  0x2d   :  { %v374_v37 = vadd.f32 %v616_v33, %v373_v36 }
  0x2e   :  { %178 = vmatmul.bf16.vlgmr.msra.gmra.mxu0 %v567_v56  ;;  %343 = vmatpush.bf16.msra.mxu2 %v584_v63 }
  0x2f   :  { %192 = vmatmul.bf16.vlgmr.msra.gmra.mxu1 %v567_v56  ;;  %357 = vmatpush.bf16.msra.mxu3 %v592_v0  ;;  %v376_v38 = vsel %vm375_vm0, %v616_v33, %v374_v37 }
  0xab   :  { %v179_v2 = vpop.f32.mrf.mxu0 }
  0xac   :  { %v193_v3 = vpop.f32.mrf.mxu1  ;;  %v180_v6 = vadd.f32 %v179_v2, %v80_v4 }
  0xad   :  { %v194_v7 = vadd.f32 %v193_v3, %v81_v5 }
  0xae   :  { %v198_v12 = vmax.f32 %v180_v6, 0.0 }
  0xaf   :  { %v199_v14 = vmax.f32 %v194_v7, 0.0 }
  0xb3   :  { %v181_v8 = vpop.f32.mrf.mxu0 }
  0xb4   :  { %v182_v9 = vadd.f32 %v181_v8, %v80_v4  ;;  %v195_v10 = vpop.f32.mrf.mxu1 }
  0xb5   :  { %v196_v11 = vadd.f32 %v195_v10, %v81_v5  ;;  %v614_v5 = vld [vmem:[%s753_s6] ss:$0 sm:$0xff] }
  0xb6   :  { %v200_v13 = vmax.f32 %v182_v9, 0.0 }
  0xb7   :  { %v201_v15 = vmax.f32 %v196_v11, 0.0 }
  0xb8   :  { %v202_v16 = vpack.c.bf16 %v200_v13, %v198_v12 }
  0xb9   :  { %v203_v17 = vpack.c.bf16 %v201_v15, %v199_v14 }
  0xba   :  { %344 = vmatmul.bf16.vlgmr.msra.gmra.mxu2 %v202_v16 }
  0xbb   :  { %358 = vmatmul.bf16.vlgmr.msra.gmra.mxu3 %v203_v17 }
 0x13d   :  { %v345_v20 = vpop.f32.mrf.mxu2 }
 0x13e   :  { %v346_v21 = vadd.f32 %v612_v18, %v345_v20  ;;  %v359_v22 = vpop.f32.mrf.mxu3 }
 0x140   :  { %v360_v24 = vadd.f32 %v359_v22, %v346_v21 }
 0x142   :  { %v364_v25 = vadd.f32 %v360_v24, %v60_v23 }
 0x144   :  { %366 = vadd.xlane.f32.xlu0 %v364_v25 }
 0x145   :  { %v347_v26 = vpop.f32.mrf.mxu2 }
 0x146   :  { %v348_v27 = vadd.f32 %v612_v18, %v347_v26  ;;  %v361_v29 = vpop.f32.mrf.mxu3 }
 0x148   :  { %v362_v30 = vadd.f32 %v361_v29, %v348_v27 }
 0x14a   :  { %v365_v31 = vadd.f32 %v362_v30, %v61_v28 }
 0x14c   :  { %368 = vadd.xlane.f32.xlu0 %v365_v31 }
 0x1b7   :  { %v367_v39 = vpop.xlane.xlu0 %366 }
 0x1b8   :  { %v377_v40 = vmul.f32 %v376_v38, %v367_v39 }
 0x1ba   :  { %v379_v41 = vsub.f32 %v364_v25, %v377_v40 }
 0x1bc   :  { %v381_v42 = vmul.f32 %v379_v41, %v379_v41 }
 0x1be   :  { %383 = vadd.xlane.f32.xlu1 %v381_v42 }
 0x1bf   :  { %v369_v43 = vpop.xlane.xlu0 %368 }
 0x1c0   :  { %v378_v44 = vmul.f32 %v376_v38, %v369_v43 }
 0x1c2   :  { %v380_v45 = vsub.f32 %v365_v31, %v378_v44 }
 0x1c4   :  { %v382_v46 = vmul.f32 %v380_v45, %v380_v45 }
 0x1c6   :  { %385 = vadd.xlane.f32.xlu1 %v382_v46 }
 0x231   :  { %v384_v47 = vpop.xlane.xlu1 %383 }
 0x232   :  { %v387_v48 = vmul.f32 %v384_v47, %v376_v38 }
 0x234   :  { %v389_v49 = vadd.f32 1e-05, %v387_v48 }
 0x236   :  { %617 = vrsqrt.f32 %v389_v49  ;;  %vm397_vm2 = vweird.f32 %v389_v49 }
 0x239   :  { %v386_v50 = vpop.xlane.xlu1 %385 }
 0x23a   :  { %v388_v51 = vmul.f32 %v386_v50, %v376_v38 }
 0x23c   :  { %v618_v52 = vpop.eup %617  ;;  %v390_v53 = vadd.f32 1e-05, %v388_v51 }
 0x23d   :  { %v392_v54 = vmul.f32 %v618_v52, %v389_v49  ;;  %vm398_vm1 = vweird.f32 %v618_v52 }
 0x23e   :  { %619 = vrsqrt.f32 %v390_v53  ;;  %vm399_vm3 = vmor %vm397_vm2, %vm398_vm1  ;;  %vm407_vm5 = vweird.f32 %v390_v53 }
 0x23f   :  { %v393_v55 = vmul.f32 %v618_v52, %v392_v54 }
 0x241   :  { %v394_v56 = vmul.f32 0.5, %v393_v55 }
 0x243   :  { %v395_v57 = vsub.f32 1.5, %v394_v56 }
 0x244   :  { %v620_v58 = vpop.eup %619 }
 0x245   :  { %v396_v59 = vmul.f32 %v618_v52, %v395_v57  ;;  %v402_v60 = vmul.f32 %v620_v58, %v390_v53  ;;  %vm408_vm4 = vweird.f32 %v620_v58 }
 0x246   :  { %vm409_vm6 = vmor %vm407_vm5, %vm408_vm4 }
 0x247   :  { %v403_v61 = vmul.f32 %v620_v58, %v402_v60  ;;  %v400_v62 = vsel %vm399_vm3, %v618_v52, %v396_v59 }
 0x248   :  { %v411_v2 = vmul.f32 %v400_v62, %v379_v41 }
 0x249   :  { %v404_v63 = vmul.f32 0.5, %v403_v61 }
 0x24a   :  { %v417_v6 = vmul.f32 %v613_v1, %v411_v2 }
 0x24b   :  { %v405_v0 = vsub.f32 1.5, %v404_v63 }
 0x24c   :  { %v423_v9 = vadd.f32 %v614_v5, %v417_v6 }
 0x24d   :  { %v406_v3 = vmul.f32 %v620_v58, %v405_v0 }
 0x24f   :  { %v410_v4 = vsel %vm409_vm6, %v620_v58, %v406_v3 }
 0x250   :  { %v412_v7 = vmul.f32 %v410_v4, %v380_v45 }
 0x252   :  { %v418_v8 = vmul.f32 %v613_v1, %v412_v7 }
 0x254   :  { %v424_v10 = vadd.f32 %v614_v5, %v418_v8 }
 0x256   :  { %v603_v11 = vpack.c.bf16 %v424_v10, %v423_v9 }
 0x258   :  { %604 = vst [vmem:[%s754_s7] sm:$0xff] %v603_v11  }
 0x259   :  { %433 = vsyncpa [#allocation3], 1 }
 0x25a   :  { %434 = vsyncpa [#allocation5], 1 }

// kernel: paired_transformer_encoder_layer.8
= control target key start
LH: loop header
LB: loop body
LE: loop exit
PB: predicated region body
PF: predicated region fallthrough
CT: control target
= control target key end

     0   :  { %s1767_s0 = inlined_call_operand.vmem [shape: bf16[2,8,384], index: 0, kind: input, shape index: {}, may-alias: {0,1,2}]   ;;  %s1768_s1 = inlined_call_operand.vmem [shape: bf16[2,8,384], index: 1, kind: input, shape index: {}, may-alias: {0,1,2}]   ;;  %s1769_s2 = inlined_call_operand.vmem [shape: bf16[2,8,384], index: 2, kind: input, shape index: {}, may-alias: {0,1,2}]   ;;  %s1770_s3 = inlined_call_operand.vmem [shape: f32[2,1,8], index: 3, kind: input, shape index: {}]   ;;  %s1771_s4 = inlined_call_operand.vmem [shape: f32[8,8], index: 4, kind: input, shape index: {}]   ;;  %s1772_s5 = inlined_call_operand.hbm [shape: bf16[128,128], index: 5, kind: input, shape index: {}]   ;;  %s1773_s6 = inlined_call_operand.vmem [shape: f32[1,128], index: 6, kind: input, shape index: {}]   ;;  %s1774_s7 = inlined_call_operand.vmem [shape: bf16[2,8,128], index: 7, kind: input, shape index: {}]   ;;  %s1775_s8 = inlined_call_operand.vmem [shape: f32[1,128], index: 8, kind: input, shape index: {}]   ;;  %s1776_s9 = inlined_call_operand.vmem [shape: f32[1,128], index: 9, kind: input, shape index: {}]   ;;  %s1777_s10 = inlined_call_operand.vmem [shape: bf16[2,8,128], index: 10, kind: output, shape index: {0}]   ;;  %s1778_s11 = inlined_call_operand.hbm [shape: bf16[2,8,8], index: 11, kind: output, shape index: {1}]  }
   0x1   :  { %1782 = sst [smem:[#allocation10_spill]] %s1767_s0 }
   0x2   :  { %1783 = sst [smem:[#allocation11_spill]] %s1768_s1 }
   0x3   :  { %1784 = sst [smem:[#allocation12_spill]] %s1769_s2 }
   0x4   :  { %1785 = sst [smem:[#allocation13_spill]] %s1772_s5 }
   0x5   :  { %17 = vsyncpa [#allocation3], 0 }
   0x6   :  { %18 = vsyncpa [#allocation4], 0 }
   0x7   :  { %20 = vsyncpa [#allocation4 + $0x1], 0  ;;  %s1554_s17 = smov 0   ;;  %s1556_s18 = smov 0  }
   0x8   :  { %s1558_s19 = smov 0   ;;  %s1560_s20 = smov 0  }
   0x9   :  { %s1562_s21 = smov 0   ;;  %s1564_s22 = smov 0  }
   0xa LB: > { %1786 = sst [smem:[#allocation8_spill]] %s1481_s21  ;;  %s1204_s23 = sadd.s32 4294967295, %s1485_s22   ;;  %s1485_s22 = sphi %s1564_s22, %s26_s22   ;;  %s1481_s21 = sphi %s1562_s21, %s1796_s21   ;;  %s1477_s20 = sphi %s1560_s20, %s1795_s20   ;;  %s1473_s19 = sphi %s1558_s19, %s1799_s19   ;;  %s1469_s18 = sphi %s1556_s18, %s1798_s18   ;;  %s1465_s17 = sphi %s1554_s17, %s1797_s17  }
   0xb   : > { %s1205_s24 = sadd.s32 4294967294, %s1485_s22   ;;  %s38_s25 = sadd.s32 1, %s1481_s21 }
   0xc   : > { %s319_s26 = sadd.s32 1, %s1473_s19  ;;  %p40_p0 = scmp.ge.s32.totalorder %s38_s25, 2 }
   0xd   : > { %p329_p1 = scmp.ne.s32.totalorder %s1473_s19, %s1469_s18  ;;  %p330_p2 = scmp.eq.s32.totalorder %s1204_s23, 1 }
   0xe   : > { %p335_p3 = scmp.ne.s32.totalorder %s1469_s18, %s1465_s17  ;;  %s1801_s25 = smov (%p40_p0, %s38_s25), 0 }
   0xf   : > { %1787 = sst [smem:[#allocation9_spill]] %s1801_s25  ;;  %p1594_p4 = por %p330_p2, %p329_p1 }
  0x10   : > { %p336_p5 = scmp.eq.s32.totalorder %s1205_s24, 1  ;;  %s314_s28 = ssub.s32 %s1481_s21, %s1801_s25 }
  0x11   : > { %p1206_p6 = scmp.ge.s32.totalorder %s1485_s22, 1  ;;  %p317_p7 = scmp.eq.s32.totalorder %s314_s28, 0 }
  0x12   : > { %p1601_p8 = por %p336_p5, %p335_p3  ;;  %p343_p9 = scmp.lt.s32.totalorder %s1485_s22, 3 }
  0x13   : > { %s1607_s30 = scalar_select %p317_p7, %s1473_s19, %s319_s26  }
  0x14   : > { %p344_p10 = pnand %p1206_p6, %p343_p9  ;;  %p1291_p11 = scmp.eq.s32.totalorder %s1204_s23, 0 }
  0x15   : > { %s1790_s5 = sld [smem:[#allocation13_spill]]  ;;  %s1487_s15 = smov [#allocation2]  }
  0x16   : > { %p1283_p12 = pneg %p344_p10  ;;  %s363_s16 = sshll.u32 %s1487_s15, 4  ;;  %s364_s16 = int_to_ptr.vmem [resolvable:$true] %s363_s16 }
  0x17   : > { %s1488_s24 = smov 64   ;;  %s1489_s28 = smov 4  }
  0x18   : > { %p1284_p13 = pnand %p1291_p11, %p1283_p12  ;;  %434 = sbr.rel (%p344_p10) target bundleno = 1512 (0x5e8), region = 60 }
  0x1b   : > { %s361_s14 = sshll.u32 %s1790_s5, 4  ;;  %s362_s14 = int_to_ptr.hbm [resolvable:$true] %s361_s14 }
  0x1c   : > { %1286 = dma.hbm_to_vmem [thread:$0]  (!%p1284_p13), %s362_s14, 1024, %s364_s16, [#allocation3], %s1488_s24, %s1488_s24, %s1489_s28  }
  0x1d   : > { %1456 = dma.done.wait (%p1291_p11), [#allocation3], 1024  }
  0x1e   : > { %1458 = vsyncadd (%p1291_p11), [#allocation3], 4294966272  ;;  %p512_p0 = scmp.lt.s32.totalorder %s1477_s20, 1  ;;  %vm564_vm0 = vcmask 261120   ;;  %s1791_s1 = sld [smem:[#allocation11_spill]]  ;;  %v559_v11 = vld [vmem:[%s1771_s4] sm:$0xff] }
  0x1f   : > { %s1792_s0 = sld [smem:[#allocation10_spill]]  ;;  %s1490_s21 = smov 96   ;;  %vm584_vm1 = vcmask 64512   ;;  %vm600_vm2 = vcmask 1043456   ;;  %v1269_v41 = vld [vmem:[#allocation2 + $0x8] sm:$0xff]  ;;  %v1268_v42 = vld [vmem:[#allocation2] sm:$0xff] }
  0x20   : > { %s1614_s23 = scalar_select %p512_p0, %s1477_s20, 1  ;;  %v1271_v53 = vld [vmem:[#allocation2 + $0x18] sm:$0xff]  ;;  %v1270_v57 = vld [vmem:[#allocation2 + $0x10] sm:$0xff]  ;;  %vm980_vm3 = vcmask 60416  }
  0x21   : > { %s1793_s2 = sld [smem:[#allocation12_spill]]  ;;  %s1492_s16 = smov 64  }
  0x22   : > { %s1617_s26 = smul.u32 12, %s1614_s23  ;;  %s535_s25 = scalar_lea.vmem %s1770_s3, %s1614_s23 }
  0x23   : > { %v1349_v10 = vld [vmem:[%s535_s25] ss:$0 sm:$0xff]  ;;  %s1491_s25 = smov 32   ;;  %s1781_s28 = sshll.u32 %s1614_s23, 2 }
  0x24   : > { %s1094_s15 = scalar_lea.vmem %s1791_s1, %s1617_s26  ;;  %v1640_v12 = vadd.f32 %v1349_v10, %v559_v11 }
  0x25   : > { %s520_s24 = scalar_lea.vmem %s1792_s0, %s1617_s26  ;;  %v1218_v0 = vld [vmem:[%s1094_s15 + $0x4] sm:$0xf] }
  0x26   : > { %v569_v1 = vsel %vm564_vm0, %v1218_v0, 0  ;;  %v628_v2 = vunpack.c.l.b16 %v1218_v0  ;;  %v555_v3 = vld [vmem:[%s520_s24] sm:$0xf] }
  0x27   : > { %578 = vmatpush.bf16.xpose.msra.mxu0 %v569_v1  ;;  %v623_v5 = vunpack.c.l.b16 %v555_v3  ;;  %s1098_s14 = scalar_lea.vmem %s1793_s2, %s1617_s26  ;;  %s1423_s2 = scalar_lea.hbm %s1778_s11, 8 }
  0x28   : > { %v629_v4 = vpack.c.b16 %v628_v2, %v628_v2  ;;  %v1219_v26 = vld [vmem:[%s1098_s14 + $0x8] sm:$0xf]  ;;  %s1265_s14 = sshll.u32 %s1477_s20, 2 }
  0x29   : > { %v624_v6 = vpack.c.b16 %v623_v5, %v623_v5  ;;  %v602_v27 = vsel %vm600_vm2, %v1219_v26, 0  ;;  %v664_v28 = vunpack.c.l.b16 %v1219_v26  ;;  %s1004_s12 = scalar_lea.hbm %s1778_s11, %s1265_s14 }
  0x2a   : > { %630 = vrot.lane.b32.xlu0 %v629_v4, %s1490_s21  ;;  %611 = vmatpush.bf16.msra.mxu1 %v602_v27  ;;  %s1008_s13 = sshll.u32 %s1004_s12, 4  ;;  %s1009_s13 = int_to_ptr.hbm [resolvable:$true] %s1008_s13 }
  0x2b   : > { %v1653_v29 = vpack.c.b16 %v664_v28, %v664_v28 }
  0x2e   : > { %1220 = vmatmul.msk.bf16.vlgmr.msra.gmra.mxu0 %vm564_vm0, %v555_v3  ;;  %713 = vmatpush.bf16.msrb.mxu1 %v1271_v53 }
  0x32   : > { %625 = vrot.lane.b32.xlu0 %v624_v6, %s1490_s21  ;;  %714 = vmatpush.bf16.msrb.mxu1 %v1270_v57 }
  0x3a   : > { %666 = vrot.lane.b32.xlu0 %v1653_v29, %s1490_s21  ;;  %s509_s21 = sand.u32 1, %s1469_s18  }
  0x3b   : > { %s1698_s26 = sshll.u32 %s509_s21, 2  ;;  %s990_s15 = scalar_lea.sflag [#allocation4], %s509_s21 }
  0x3c   : > { %s511_s24 = scalar_lea.vmem [#allocation5], %s1698_s26 }
  0x42   : > { %840 = vrot.lane.b32.xlu0 %v624_v6, %s1491_s25 }
  0x4a   : > { %749 = vrot.lane.b32.xlu0 %v624_v6, %s1492_s16 }
  0x9c   : > { %v631_v7 = vpop.permute.xlu0 %630 }
  0x9d   : > { %v636_v8 = vsel %vm564_vm0, %v631_v7, 0 }
  0x9e   : > { %645 = vmatpush.bf16.xpose.msra.mxu2 %v636_v8 }
  0xa4   : > { %v626_v9 = vpop.permute.xlu0 %625 }
  0xa5   : > { %1222 = vmatmul.msk.bf16.vlgmr.msra.gmra.mxu2 %vm564_vm0, %v626_v9 }
  0xab   : > { %v580_v13 = vpop.f32.mrf.mxu0 }
  0xac   : > { %v581_v14 = vadd.f32 %v580_v13, %v1640_v12  ;;  %v667_v39 = vpop.permute.xlu0 %666 }
  0xad   : > { %v672_v40 = vsel %vm600_vm2, %v667_v39, 0  ;;  %v1274_v39 = vld [vmem:[#allocation2 + $0x30] sm:$0xff] }
  0xae   : > { %v585_v15 = vsel %vm584_vm1, %v581_v14, -inf  ;;  %681 = vmatpush.bf16.msra.mxu3 %v672_v40 }
  0xaf   : > { %586 = vmax.xlane.f32.xlu1 %v585_v15 }
  0xb2   : > { %741 = vmatpush.bf16.msrb.mxu3 %v1269_v41 }
  0xb3   : > { %v582_v16 = vpop.f32.mrf.mxu0 }
  0xb4   : > { %v841_v44 = vpop.permute.xlu0 %840 }
  0xb6   : > { %742 = vmatpush.bf16.msrb.mxu3 %v1268_v42 }
  0xbc   : > { %v750_v54 = vpop.permute.xlu0 %749 }
 0x122   : > { %v587_v17 = vpop.xlane.xlu1 %586 }
 0x123   : > { %v588_v18 = vsub.f32 %v581_v14, %v587_v17 }
 0x125   : > { %v589_v19 = vmul.f32 1.442695, %v588_v18 }
 0x127   : > { %1353 = vpow2.f32 %v589_v19 }
 0x128   : > { %v647_v20 = vpop.f32.mrf.mxu2 }
 0x129   : > { %v648_v21 = vadd.f32 %v647_v20, %v1640_v12 }
 0x12b   : > { %v651_v22 = vsel %vm584_vm1, %v648_v21, -inf }
 0x12c   : > { %652 = vmax.xlane.f32.xlu2 %v651_v22 }
 0x12d   : > { %v1354_v23 = vpop.eup %1353 }
 0x12e   : > { %v591_v24 = vsel %vm584_vm1, %v1354_v23, 0.0 }
 0x12f   : > { %592 = vadd.xlane.f32.xlu1 %v591_v24 }
 0x130   : > { %v649_v25 = vpop.f32.mrf.mxu2 }
 0x131   : > { %v1273_v25 = vld [vmem:[#allocation2 + $0x28] sm:$0xff] }
 0x148   : > { %842 = vrot.lane.b32.xlu1 %v629_v4, %s1491_s25 }
 0x19f   : > { %v653_v30 = vpop.xlane.xlu2 %652 }
 0x1a0   : > { %v654_v31 = vsub.f32 %v648_v21, %v653_v30 }
 0x1a2   : > { %v655_v32 = vmul.f32 1.442695, %v654_v31  ;;  %v593_v33 = vpop.xlane.xlu1 %592 }
 0x1a3   : > { %1355 = vrcp.f32 %v593_v33 }
 0x1a4   : > { %1357 = vpow2.f32 %v655_v32 }
 0x1a9   : > { %v1356_v34 = vpop.eup %1355 }
 0x1aa   : > { %v1358_v35 = vpop.eup %1357  ;;  %v1659_v36 = vmul.f32 %v1356_v34, %v1354_v23 }
 0x1ab   : > { %v657_v37 = vsel %vm584_vm1, %v1358_v35, 0.0 }
 0x1ac   : > { %658 = vadd.xlane.f32.xlu2 %v657_v37  ;;  %v596_v38 = vpack.c.bf16 %v1659_v36, %v1659_v36 }
 0x1ae   : > { %1221 = vmatmul.msk.bf16.vlgmr.msra.gmra.mxu1 %vm584_vm1, %v596_v38  ;;  %v1275_v38 = vld [vmem:[#allocation2 + $0x38] sm:$0xff] }
 0x1af   : > { %831 = vmatpush.bf16.msra.mxu1 %v1273_v25 }
 0x1ba   : > { %v843_v46 = vpop.permute.xlu1 %842 }
 0x1bb   : > { %v848_v51 = vsel %vm564_vm0, %v843_v46, 0 }
 0x1c4   : > { %751 = vrot.lane.b32.xlu2 %v629_v4, %s1492_s16 }
 0x21f   : > { %v659_v43 = vpop.xlane.xlu2 %658 }
 0x220   : > { %1359 = vrcp.f32 %v659_v43 }
 0x226   : > { %v1360_v45 = vpop.eup %1359 }
 0x227   : > { %v752_v47 = vpop.permute.xlu2 %751  ;;  %v1667_v48 = vmul.f32 %v1360_v45, %v1358_v35 }
 0x228   : > { %v757_v49 = vsel %vm564_vm0, %v752_v47, 0 }
 0x229   : > { %766 = vmatpush.bf16.xpose.msrb.mxu0 %v757_v49  ;;  %v662_v50 = vpack.c.bf16 %v1667_v48, %v1667_v48 }
 0x22b   : > { %v613_v52 = vpop.f32.mrf.mxu1  ;;  %1223 = vmatmul.msk.bf16.vlgmr.msra.gmra.mxu3 %vm584_vm1, %v662_v50 }
 0x22c   : > { %857 = vmatpush.bf16.xpose.msra.mxu3 %v848_v51  ;;  %v617_v56 = vpack.c.bf16 %v613_v52, %v613_v52  ;;  %v1350_v51 = vld [vmem:[%s1773_s6] ss:$0 sm:$0xff] }
 0x230   : > { %1242 = vmatmul.msk.bf16.vlgmr.msrb.gmra.mxu0 %vm564_vm0, %v750_v54 }
 0x233   : > { %v615_v55 = vpop.f32.mrf.mxu1 }
 0x23b   : > { %1241 = vmatmul.msk.bf16.vlgmr.msrb.gmra.mxu3 %vm564_vm0, %v617_v56 }
 0x24b   : > { %1253 = vmatmul.msk.bf16.vlgmr.msra.gmra.mxu3 %vm564_vm0, %v841_v44 }
 0x2ad   : > { %v768_v58 = vpop.f32.mrf.mxu0 }
 0x2ae   : > { %v769_v59 = vadd.f32 %v768_v58, %v1640_v12  ;;  %v683_v60 = vpop.f32.mrf.mxu3  ;;  %v1493_v58 = vmov 128.0  }
 0x2af   : > { %v687_v61 = vpack.c.bf16 %v683_v60, %v683_v60 }
 0x2b0   : > { %v772_v62 = vsel %vm584_vm1, %v769_v59, -inf }
 0x2b1   : > { %773 = vmax.xlane.f32.xlu0 %v772_v62  ;;  %1232 = vmatmul.msk.bf16.vlgmr.msrb.gmra.mxu1 %vm564_vm0, %v687_v61 }
 0x2b5   : > { %v770_v63 = vpop.f32.mrf.mxu0 }
 0x2b6   : > { %v685_v0 = vpop.f32.mrf.mxu3 }
 0x2be   : > { %v1680_v1 = vpop.f32.mrf.mxu3 }
 0x2c5   : > { %784 = vrot.lane.b32.xlu0 %v1653_v29, %s1492_s16 }
 0x2c6   : > { %v746_v2 = vpop.f32.mrf.mxu3 }
 0x2ce   : > { %v859_v3 = vpop.f32.mrf.mxu3 }
 0x2cf   : > { %v860_v4 = vadd.f32 %v859_v3, %v1640_v12 }
 0x2d1   : > { %v863_v5 = vsel %vm584_vm1, %v860_v4, -inf }
 0x2d2   : > { %864 = vmax.xlane.f32.xlu2 %v863_v5 }
 0x2d6   : > { %v861_v6 = vpop.f32.mrf.mxu3 }
 0x324   : > { %v774_v7 = vpop.xlane.xlu0 %773 }
 0x325   : > { %v775_v8 = vsub.f32 %v769_v59, %v774_v7 }
 0x327   : > { %v776_v9 = vmul.f32 1.442695, %v775_v8 }
 0x329   : > { %1361 = vpow2.f32 %v776_v9 }
 0x32e   : > { %v716_v10 = vpop.f32.mrf.mxu1 }
 0x32f   : > { %v1362_v11 = vpop.eup %1361 }
 0x330   : > { %v778_v13 = vsel %vm584_vm1, %v1362_v11, 0.0 }
 0x331   : > { %779 = vadd.xlane.f32.xlu1 %v778_v13 }
 0x336   : > { %v718_v14 = vpop.f32.mrf.mxu1 }
 0x337   : > { %v785_v19 = vpop.permute.xlu0 %784 }
 0x338   : > { %v790_v20 = vsel %vm600_vm2, %v785_v19, 0 }
 0x339   : > { %799 = vmatpush.bf16.msrb.mxu2 %v790_v20 }
 0x33d   : > { %922 = vmatpush.bf16.msra.mxu2 %v1275_v38 }
 0x341   : > { %923 = vmatpush.bf16.msra.mxu2 %v1274_v39 }
 0x345   : > { %v865_v15 = vpop.xlane.xlu2 %864 }
 0x346   : > { %v866_v16 = vsub.f32 %v860_v4, %v865_v15 }
 0x348   : > { %v867_v17 = vmul.f32 1.442695, %v866_v16 }
 0x34a   : > { %1363 = vpow2.f32 %v867_v17  ;;  %875 = vrot.lane.b32.xlu1 %v1653_v29, %s1491_s25  ;;  %v748_v29 = vadd.f32 %v1667_v48, %v1659_v36  ;;  %v1272_v36 = vld [vmem:[#allocation2 + $0x20] sm:$0xff]  ;;  %s546_s25 = scalar_lea.vmem %s1774_s7, %s1781_s28  ;;  %v745_v48 = vadd.f32 %v1680_v1, %v716_v10  ;;  %s1417_s28 = sshra.s32 %s1009_s13, 4  ;;  %s1418_s28 = int_to_ptr.hbm [resolvable:$true] %s1417_s28 }
 0x34b   : > { %832 = vmatpush.bf16.msra.mxu1 %v1272_v36  ;;  %v936_v49 = vld [vmem:[%s546_s25] sm:$0xf]  ;;  %s1006_s25 = sshll.u32 %s511_s24, 4  ;;  %s1419_s0 = scalar_lea.hbm %s1418_s28, 4  ;;  %s1007_s25 = int_to_ptr.vmem [resolvable:$true] %s1006_s25 }
 0x34c   : > { %v937_v54 = vunpack.c.l.bf16 %v936_v49  ;;  %p1420_p1 = scmp.ne.s32.totalorder %s1418_s28, %s1419_s0  ;;  %p1424_p5 = scmp.lt.s32.totalorder %s1418_s28, %s1778_s11 }
 0x34d   : > { %p1425_p6 = scmp.lt.s32.totalorder %s1423_s2, %s1419_s0 }
 0x34e   : > { %p1421_p2 = pnand %p1420_p1, %p1594_p4 }
 0x34f   : > { %p1426_p7 = por %p1425_p6, %p1424_p5 }
 0x350   : > { %v1364_v12 = vpop.eup %1363  ;;  %p1422_p3 = pneg %p1421_p2 }
 0x351   : > { %v869_v18 = vsel %vm584_vm1, %v1364_v12, 0.0 }
 0x352   : > { %870 = vadd.xlane.f32.xlu2 %v869_v18  ;;  %p1427_p9 = pnand %p1426_p7, %p1422_p3 }
 0x3a4   : > { %v780_v21 = vpop.xlane.xlu1 %779 }
 0x3a5   : > { %1365 = vrcp.f32 %v780_v21 }
 0x3ab   : > { %v1366_v22 = vpop.eup %1365 }
 0x3ac   : > { %v782_v23 = vmul.f32 %v1366_v22, %v1362_v11 }
 0x3ae   : > { %v783_v24 = vpack.c.bf16 %v782_v23, %v782_v23  ;;  %v839_v31 = vadd.f32 %v782_v23, %v748_v29 }
 0x3b0   : > { %1243 = vmatmul.msk.bf16.vlgmr.msrb.gmra.mxu2 %vm584_vm1, %v783_v24 }
 0x3bc   : > { %v876_v26 = vpop.permute.xlu1 %875 }
 0x3bd   : > { %v881_v27 = vsel %vm600_vm2, %v876_v26, 0 }
 0x3be   : > { %890 = vmatpush.bf16.msra.mxu0 %v881_v27 }
 0x3c5   : > { %v871_v28 = vpop.xlane.xlu2 %870 }
 0x3c6   : > { %1367 = vrcp.f32 %v871_v28 }
 0x3c7   : > { %1369 = vrcp.f32 %v1493_v58 }
 0x3cc   : > { %v1368_v30 = vpop.eup %1367 }
 0x3cd   : > { %v873_v32 = vmul.f32 %v1368_v30, %v1364_v12  ;;  %v1370_v59 = vpop.eup %1369 }
 0x3ce   : > { %v942_v60 = vmul.f32 128.0, %v1370_v59  ;;  %vm946_vm4 = vweird.f32 %v1370_v59 }
 0x3cf   : > { %v874_v33 = vpack.c.bf16 %v873_v32, %v873_v32  ;;  %v930_v34 = vadd.f32 %v873_v32, %v839_v31 }
 0x3d0   : > { %v943_v61 = vsub.f32 1.0, %v942_v60 }
 0x3d1   : > { %v978_v35 = vmul.f32 0.25, %v930_v34  ;;  %1254 = vmatmul.msk.bf16.vlgmr.msra.gmra.mxu0 %vm584_vm1, %v874_v33 }
 0x3d2   : > { %v944_v62 = vmul.f32 %v1370_v59, %v943_v61 }
 0x3d3   : > { %v979_v37 = vpack.c.bf16 %v978_v35, %v978_v35 }
 0x3d4   : > { %v945_v63 = vadd.f32 %v1370_v59, %v944_v62 }
 0x3d5   : > { %981 = vst.msk [vmem:[%s511_s24] sm:$0xf] %vm980_vm3, %v979_v37 }
 0x3d6   : > { %v947_v0 = vsel %vm946_vm4, %v1370_v59, %v945_v63 }
 0x433   : > { %v801_v40 = vpop.f32.mrf.mxu2 }
 0x434   : > { %v805_v41 = vpack.c.bf16 %v801_v40, %v801_v40 }
 0x436   : > { %1252 = vmatmul.msk.bf16.vlgmr.msra.gmra.mxu1 %vm564_vm0, %v805_v41 }
 0x43b   : > { %v803_v42 = vpop.f32.mrf.mxu2 }
 0x44e   : > { %v892_v43 = vpop.f32.mrf.mxu0 }
 0x44f   : > { %v896_v44 = vpack.c.bf16 %v892_v43, %v892_v43 }
 0x451   : > { %1263 = vmatmul.msk.bf16.vlgmr.msra.gmra.mxu2 %vm564_vm0, %v896_v44 }
 0x456   : > { %v894_v45 = vpop.f32.mrf.mxu0 }
 0x4b3   : > { %v834_v46 = vpop.f32.mrf.mxu1 }
 0x4b4   : > { %v838_v50 = vadd.f32 %v834_v46, %v745_v48 }
 0x4bb   : > { %v836_v47 = vpop.f32.mrf.mxu1 }
 0x4d4   : > { %v925_v52 = vpop.f32.mrf.mxu2 }
 0x4d5   : > { %v929_v53 = vadd.f32 %v925_v52, %v838_v50 }
 0x4d7   : > { %v935_v55 = vadd.f32 %v1350_v51, %v929_v53 }
 0x4d9   : > { %v938_v56 = vadd.f32 %v937_v54, %v935_v55 }
 0x4db   : > { %939 = vadd.xlane.f32.xlu2 %v938_v56 }
 0x4dc   : > { %v927_v57 = vpop.f32.mrf.mxu2 }
 0x54e   : > { %v940_v1 = vpop.xlane.xlu2 %939 }
 0x54f   : > { %v948_v2 = vmul.f32 %v947_v0, %v940_v1 }
 0x551   : > { %v949_v3 = vsub.f32 %v938_v56, %v948_v2 }
 0x553   : > { %v950_v4 = vmul.f32 %v949_v3, %v949_v3 }
 0x555   : > { %951 = vadd.xlane.f32.xlu2 %v950_v4 }
 0x556   : > { %1430 = shalt.err (!%p1427_p9)
}
 0x557   : > { %1281 = dma.vmem_to_hbm [thread:$0]  (%p1594_p4), %s1007_s25, 64, %s1009_s13, %s990_s15   ;;  %v1351_v15 = vld [vmem:[%s1775_s8] ss:$0 sm:$0xff] }
 0x558   : > { %v1352_v17 = vld [vmem:[%s1776_s9] ss:$0 sm:$0xff]  ;;  %s1794_s21 = sshll.u32 %s1614_s23, 2 }
 0x559   : > { %s553_s28 = scalar_lea.vmem %s1777_s10, %s1794_s21 }
 0x5c8   : > { %v952_v5 = vpop.xlane.xlu2 %951 }
 0x5c9   : > { %v953_v6 = vmul.f32 %v952_v5, %v947_v0 }
 0x5cb   : > { %v954_v7 = vadd.f32 1e-05, %v953_v6 }
 0x5cd   : > { %1371 = vrsqrt.f32 %v954_v7  ;;  %vm961_vm6 = vweird.f32 %v954_v7 }
 0x5d3   : > { %v1372_v8 = vpop.eup %1371 }
 0x5d4   : > { %v956_v9 = vmul.f32 %v1372_v8, %v954_v7  ;;  %vm962_vm5 = vweird.f32 %v1372_v8 }
 0x5d5   : > { %vm963_vm7 = vmor %vm961_vm6, %vm962_vm5 }
 0x5d6   : > { %v957_v10 = vmul.f32 %v1372_v8, %v956_v9 }
 0x5d8   : > { %v958_v11 = vmul.f32 0.5, %v957_v10 }
 0x5da   : > { %v959_v13 = vsub.f32 1.5, %v958_v11 }
 0x5dc   : > { %v960_v14 = vmul.f32 %v1372_v8, %v959_v13 }
 0x5de   : > { %v964_v16 = vsel %vm963_vm7, %v1372_v8, %v960_v14 }
 0x5df   : > { %v965_v12 = vmul.f32 %v964_v16, %v949_v3 }
 0x5e1   : > { %v970_v18 = vmul.f32 %v1351_v15, %v965_v12 }
 0x5e3   : > { %v975_v19 = vadd.f32 %v1352_v17, %v970_v18 }
 0x5e5   : > { %v976_v20 = vpack.c.bf16 %v975_v19, %v975_v19 }
 0x5e7   : > { %977 = vst [vmem:[%s553_s28] sm:$0xf] %v976_v20 }
 0x5e8 PF: > { %p1293_p4 = scmp.ge.s32.totalorder %s1485_s22, 2  ;;  %s1030_s5 = sand.u32 1, %s1465_s17  }
 0x5e9   : > { %s1031_s12 = scalar_lea.sflag [#allocation4], %s1030_s5 }
 0x5ea   : > { %p1288_p10 = pnand %p1293_p4, %p1601_p8 }
 0x5ec   : > { %p1289_p11 = pneg %p1288_p10 }
 0x5ee   : > { %1460 = dma.done.wait (%p1289_p11), %s1031_s12, 64  }
 0x5ef   : > { %1462 = vsyncadd (%p1289_p11), %s1031_s12, 4294967232  ;;  %s26_s22 = sadd.s32 1, %s1485_s22   ;;  %s1795_s20 = sld [smem:[#allocation8_spill]] }
 0x5f0   : > { %p23_p12 = scmp.ge.s32.totalorder %s26_s22, 4   ;;  %s1796_s21 = sld [smem:[#allocation9_spill]] }
 0x5f1   : > { %s1797_s17 = smov %s1469_s18  ;;  %s1798_s18 = smov %s1473_s19 }
 0x5f2   : > { %s1799_s19 = smov %s1607_s30  ;;  %25 = sbr.rel (!%p23_p12) target bundleno = 10 (0xa), region = 127 }
 0x5f7   :  { %1037 = vsyncpa [#allocation3], 1 }
 0x5f8   :  { %1039 = vsyncpa [#allocation3 + $0x1], 1 }
 0x5f9   :  { %1040 = vsyncpa [#allocation4], 1 }
 0x5fa   :  { %1042 = vsyncpa [#allocation4 + $0x1], 1 }

// kernel: paired_transformer_encoder_layer.11
= control target key start
LH: loop header
LB: loop body
LE: loop exit
PB: predicated region body
PF: predicated region fallthrough
CT: control target
= control target key end

     0   :  { %s997_s1 = inlined_call_operand.vmem [shape: bf16[128,256], index: 1, kind: input, shape index: {}]   ;;  %s998_s0 = inlined_call_operand.vmem [shape: bf16[256,128], index: 0, kind: input, shape index: {}]   ;;  %s999_s2 = inlined_call_operand.vmem [shape: f32[1,256], index: 2, kind: input, shape index: {}]   ;;  %s1000_s3 = inlined_call_operand.vmem [shape: bf16[256,256], index: 3, kind: output, shape index: {}]  }
   0x1   :  { %v612_v0 = vld [vmem:[%s997_s1 + $0x70] sm:$0xf]  ;;  %v649_v1 = vld [vmem:[%s997_s1 + $0x74] sm:$0xf0]  ;;  %v648_v2 = vld [vmem:[%s997_s1 + $0x74] sm:$0xf] }
   0x2   :  { %v613_v3 = vor.u32 %v649_v1, %v612_v0  ;;  %v614_v4 = vld [vmem:[%s997_s1 + $0x78] sm:$0xf0]  ;;  %v604_v5 = vld [vmem:[%s997_s1 + $0x60] sm:$0xf]  ;;  %v647_v6 = vld [vmem:[%s997_s1 + $0x64] sm:$0xf0] }
   0x3   :  { %v617_v7 = vor.u32 %v648_v2, %v614_v4  ;;  %v646_v8 = vld [vmem:[%s997_s1 + $0x64] sm:$0xf]  ;;  %v606_v9 = vld [vmem:[%s997_s1 + $0x68] sm:$0xf0]  ;;  %v605_v10 = vor.u32 %v647_v6, %v604_v5  ;;  %v596_v12 = vld [vmem:[%s997_s1 + $0x50] sm:$0xf] }
   0x4   :  { %244 = vmatpush.bf16.msra.mxu0 %v613_v3  ;;  %650 = vmatpush.bf16.msra.mxu2 %v613_v3  ;;  %v609_v11 = vor.u32 %v646_v8, %v606_v9  ;;  %v645_v13 = vld [vmem:[%s997_s1 + $0x54] sm:$0xf0]  ;;  %v644_v14 = vld [vmem:[%s997_s1 + $0x54] sm:$0xf]  ;;  %v598_v15 = vld [vmem:[%s997_s1 + $0x58] sm:$0xf0] }
   0x5   :  { %333 = vmatpush.bf16.msra.mxu1 %v617_v7  ;;  %658 = vmatpush.bf16.msra.mxu3 %v617_v7  ;;  %v597_v16 = vor.u32 %v645_v13, %v596_v12  ;;  %v601_v17 = vor.u32 %v644_v14, %v598_v15  ;;  %v588_v18 = vld [vmem:[%s997_s1 + $0x40] sm:$0xf]  ;;  %v643_v19 = vld [vmem:[%s997_s1 + $0x44] sm:$0xf0]  ;;  %v642_v20 = vld [vmem:[%s997_s1 + $0x44] sm:$0xf] }
   0x6   :  { %v590_v21 = vld [vmem:[%s997_s1 + $0x48] sm:$0xf0]  ;;  %v589_v22 = vor.u32 %v643_v19, %v588_v18  ;;  %v580_v24 = vld [vmem:[%s997_s1 + $0x30] sm:$0xf]  ;;  %v641_v25 = vld [vmem:[%s997_s1 + $0x34] sm:$0xf0] }
   0x7   :  { %v593_v23 = vor.u32 %v642_v20, %v590_v21  ;;  %v640_v26 = vld [vmem:[%s997_s1 + $0x34] sm:$0xf]  ;;  %v582_v27 = vld [vmem:[%s997_s1 + $0x38] sm:$0xf0]  ;;  %v581_v28 = vor.u32 %v641_v25, %v580_v24  ;;  %v572_v30 = vld [vmem:[%s997_s1 + $0x20] sm:$0xf] }
   0x8   :  { %245 = vmatpush.bf16.msra.mxu0 %v605_v10  ;;  %651 = vmatpush.bf16.msra.mxu2 %v605_v10  ;;  %v585_v29 = vor.u32 %v640_v26, %v582_v27  ;;  %v639_v31 = vld [vmem:[%s997_s1 + $0x24] sm:$0xf0]  ;;  %v638_v32 = vld [vmem:[%s997_s1 + $0x24] sm:$0xf]  ;;  %v574_v33 = vld [vmem:[%s997_s1 + $0x28] sm:$0xf0] }
   0x9   :  { %334 = vmatpush.bf16.msra.mxu1 %v609_v11  ;;  %659 = vmatpush.bf16.msra.mxu3 %v609_v11  ;;  %v573_v34 = vor.u32 %v639_v31, %v572_v30  ;;  %v577_v35 = vor.u32 %v638_v32, %v574_v33  ;;  %v564_v36 = vld [vmem:[%s997_s1 + $0x10] sm:$0xf]  ;;  %v637_v37 = vld [vmem:[%s997_s1 + $0x14] sm:$0xf0]  ;;  %v636_v38 = vld [vmem:[%s997_s1 + $0x14] sm:$0xf] }
   0xa   :  { %v566_v39 = vld [vmem:[%s997_s1 + $0x18] sm:$0xf0]  ;;  %v565_v40 = vor.u32 %v637_v37, %v564_v36  ;;  %v556_v42 = vld [vmem:[%s997_s1] sm:$0xf]  ;;  %v635_v43 = vld [vmem:[%s997_s1 + $0x4] sm:$0xf0] }
   0xb   :  { %v569_v41 = vor.u32 %v636_v38, %v566_v39  ;;  %v634_v44 = vld [vmem:[%s997_s1 + $0x4] sm:$0xf]  ;;  %v558_v45 = vld [vmem:[%s997_s1 + $0x8] sm:$0xf0]  ;;  %v557_v46 = vor.u32 %v635_v43, %v556_v42  ;;  %v620_v52 = vld [vmem:[%s998_s0 + $0x10] sm:$0xff] }
   0xc   :  { %246 = vmatpush.bf16.msra.mxu0 %v597_v16  ;;  %652 = vmatpush.bf16.msra.mxu2 %v597_v16  ;;  %v561_v47 = vor.u32 %v634_v44, %v558_v45  ;;  %v618_v48 = vld [vmem:[%s998_s0] sm:$0xff]  ;;  %v619_v50 = vld [vmem:[%s998_s0 + $0x8] sm:$0xff]  ;;  %v628_v53 = vld [vmem:[%s998_s0 + $0x50] sm:$0xff] }
   0xd   :  { %335 = vmatpush.bf16.msra.mxu1 %v601_v17  ;;  %660 = vmatpush.bf16.msra.mxu3 %v601_v17  ;;  %v626_v49 = vld [vmem:[%s998_s0 + $0x40] sm:$0xff]  ;;  %v627_v51 = vld [vmem:[%s998_s0 + $0x48] sm:$0xff]  ;;  %v621_v54 = vld [vmem:[%s998_s0 + $0x18] sm:$0xff] }
   0xe   :  { %v629_v55 = vld [vmem:[%s998_s0 + $0x58] sm:$0xff]  ;;  %v622_v56 = vld [vmem:[%s998_s0 + $0x20] sm:$0xff]  ;;  %v623_v58 = vld [vmem:[%s998_s0 + $0x28] sm:$0xff] }
   0xf   :  { %v630_v57 = vld [vmem:[%s998_s0 + $0x60] sm:$0xff]  ;;  %v631_v59 = vld [vmem:[%s998_s0 + $0x68] sm:$0xff]  ;;  %v624_v60 = vld [vmem:[%s998_s0 + $0x30] sm:$0xff] }
  0x10   :  { %247 = vmatpush.bf16.msra.mxu0 %v589_v22  ;;  %653 = vmatpush.bf16.msra.mxu2 %v589_v22  ;;  %v632_v61 = vld [vmem:[%s998_s0 + $0x70] sm:$0xff]  ;;  %v625_v62 = vld [vmem:[%s998_s0 + $0x38] sm:$0xff]  ;;  %v62_v0 = vld [vmem:[%s999_s2] sm:$0x3] }
  0x11   :  { %336 = vmatpush.bf16.msra.mxu1 %v593_v23  ;;  %661 = vmatpush.bf16.msra.mxu3 %v593_v23  ;;  %v633_v63 = vld [vmem:[%s998_s0 + $0x78] sm:$0xff]  ;;  %v833_v1 = vperm.slane %v62_v0, 0  ;;  %v835_v2 = vperm.slane %v62_v0, 1 }
  0x14   :  { %248 = vmatpush.bf16.msra.mxu0 %v581_v28  ;;  %654 = vmatpush.bf16.msra.mxu2 %v581_v28 }
  0x15   :  { %337 = vmatpush.bf16.msra.mxu1 %v585_v29  ;;  %662 = vmatpush.bf16.msra.mxu3 %v585_v29 }
  0x18   :  { %249 = vmatpush.bf16.msra.mxu0 %v573_v34  ;;  %655 = vmatpush.bf16.msra.mxu2 %v573_v34 }
  0x19   :  { %338 = vmatpush.bf16.msra.mxu1 %v577_v35  ;;  %663 = vmatpush.bf16.msra.mxu3 %v577_v35 }
  0x1c   :  { %250 = vmatpush.bf16.msra.mxu0 %v565_v40  ;;  %656 = vmatpush.bf16.msra.mxu2 %v565_v40 }
  0x1d   :  { %339 = vmatpush.bf16.msra.mxu1 %v569_v41  ;;  %664 = vmatpush.bf16.msra.mxu3 %v569_v41 }
  0x20   :  { %251 = vmatpush.bf16.msra.mxu0 %v557_v46  ;;  %657 = vmatpush.bf16.msra.mxu2 %v557_v46 }
  0x21   :  { %340 = vmatpush.bf16.msra.mxu1 %v561_v47  ;;  %665 = vmatpush.bf16.msra.mxu3 %v561_v47 }
  0x23   :  { %252 = vmatmul.bf16.vlgmr.msra.gmra.mxu0 %v618_v48  ;;  %292 = vmatmul.bf16.vlgmr.msra.gmra.mxu2 %v626_v49 }
  0x24   :  { %341 = vmatmul.bf16.vlgmr.msra.gmra.mxu1 %v618_v48  ;;  %381 = vmatmul.bf16.vlgmr.msra.gmra.mxu3 %v626_v49 }
  0x33   :  { %257 = vmatmul.bf16.gmra.mxu0 %v619_v50  ;;  %297 = vmatmul.bf16.gmra.mxu2 %v627_v51 }
  0x34   :  { %346 = vmatmul.bf16.gmra.mxu1 %v619_v50  ;;  %386 = vmatmul.bf16.gmra.mxu3 %v627_v51 }
  0x43   :  { %262 = vmatmul.bf16.gmra.mxu0 %v620_v52  ;;  %302 = vmatmul.bf16.gmra.mxu2 %v628_v53 }
  0x44   :  { %351 = vmatmul.bf16.gmra.mxu1 %v620_v52  ;;  %391 = vmatmul.bf16.gmra.mxu3 %v628_v53 }
  0x53   :  { %267 = vmatmul.bf16.gmra.mxu0 %v621_v54  ;;  %307 = vmatmul.bf16.gmra.mxu2 %v629_v55 }
  0x54   :  { %356 = vmatmul.bf16.gmra.mxu1 %v621_v54  ;;  %396 = vmatmul.bf16.gmra.mxu3 %v629_v55 }
  0x63   :  { %272 = vmatmul.bf16.gmra.mxu0 %v622_v56  ;;  %312 = vmatmul.bf16.gmra.mxu2 %v630_v57 }
  0x64   :  { %361 = vmatmul.bf16.gmra.mxu1 %v622_v56  ;;  %401 = vmatmul.bf16.gmra.mxu3 %v630_v57 }
  0x73   :  { %277 = vmatmul.bf16.gmra.mxu0 %v623_v58  ;;  %317 = vmatmul.bf16.gmra.mxu2 %v631_v59 }
  0x74   :  { %366 = vmatmul.bf16.gmra.mxu1 %v623_v58  ;;  %406 = vmatmul.bf16.gmra.mxu3 %v631_v59 }
  0x83   :  { %282 = vmatmul.bf16.gmra.mxu0 %v624_v60  ;;  %322 = vmatmul.bf16.gmra.mxu2 %v632_v61 }
  0x84   :  { %371 = vmatmul.bf16.gmra.mxu1 %v624_v60  ;;  %411 = vmatmul.bf16.gmra.mxu3 %v632_v61 }
  0x93   :  { %287 = vmatmul.bf16.gmra.mxu0 %v625_v62  ;;  %327 = vmatmul.bf16.gmra.mxu2 %v633_v63 }
  0x94   :  { %376 = vmatmul.bf16.gmra.mxu1 %v625_v62  ;;  %416 = vmatmul.bf16.gmra.mxu3 %v633_v63 }
  0xa0   :  { %v253_v3 = vpop.f32.mrf.mxu0 }
  0xa1   :  { %v254_v4 = vadd.f32 %v253_v3, %v833_v1  ;;  %v342_v5 = vpop.f32.mrf.mxu1 }
  0xa2   :  { %v343_v6 = vadd.f32 %v342_v5, %v835_v2 }
  0xa4   :  { %v422_v7 = vpack.c.bf16 %v343_v6, %v254_v4 }
  0xa6   :  { %454 = vst [vmem:[%s1000_s3] sm:$0xff] %v422_v7  ;;  %v293_v8 = vpop.f32.mrf.mxu2 }
  0xa7   :  { %v294_v9 = vadd.f32 %v293_v8, %v833_v1  ;;  %v382_v10 = vpop.f32.mrf.mxu3 }
  0xa8   :  { %v383_v11 = vadd.f32 %v382_v10, %v835_v2  ;;  %v255_v12 = vpop.f32.mrf.mxu0 }
  0xa9   :  { %v256_v13 = vadd.f32 %v255_v12, %v833_v1  ;;  %v344_v14 = vpop.f32.mrf.mxu1 }
  0xaa   :  { %v438_v15 = vpack.c.bf16 %v383_v11, %v294_v9  ;;  %v345_v16 = vadd.f32 %v344_v14, %v835_v2 }
  0xac   :  { %470 = vst [vmem:[%s1000_s3 + $0x80] sm:$0xff] %v438_v15  ;;  %v423_v17 = vpack.c.bf16 %v345_v16, %v256_v13 }
  0xae   :  { %455 = vst [vmem:[%s1000_s3 + $0x8] sm:$0xff] %v423_v17  ;;  %v295_v18 = vpop.f32.mrf.mxu2 }
  0xaf   :  { %v296_v19 = vadd.f32 %v295_v18, %v833_v1  ;;  %v384_v20 = vpop.f32.mrf.mxu3 }
  0xb0   :  { %v385_v21 = vadd.f32 %v384_v20, %v835_v2  ;;  %v258_v22 = vpop.f32.mrf.mxu0 }
  0xb1   :  { %v259_v23 = vadd.f32 %v258_v22, %v833_v1  ;;  %v347_v24 = vpop.f32.mrf.mxu1 }
  0xb2   :  { %v439_v25 = vpack.c.bf16 %v385_v21, %v296_v19  ;;  %v348_v26 = vadd.f32 %v347_v24, %v835_v2 }
  0xb4   :  { %471 = vst [vmem:[%s1000_s3 + $0x88] sm:$0xff] %v439_v25  ;;  %v424_v27 = vpack.c.bf16 %v348_v26, %v259_v23 }
  0xb6   :  { %456 = vst [vmem:[%s1000_s3 + $0x10] sm:$0xff] %v424_v27  ;;  %v298_v28 = vpop.f32.mrf.mxu2 }
  0xb7   :  { %v299_v29 = vadd.f32 %v298_v28, %v833_v1  ;;  %v387_v30 = vpop.f32.mrf.mxu3 }
  0xb8   :  { %v388_v31 = vadd.f32 %v387_v30, %v835_v2  ;;  %v260_v32 = vpop.f32.mrf.mxu0 }
  0xb9   :  { %v261_v33 = vadd.f32 %v260_v32, %v833_v1  ;;  %v349_v34 = vpop.f32.mrf.mxu1 }
  0xba   :  { %v440_v35 = vpack.c.bf16 %v388_v31, %v299_v29  ;;  %v350_v36 = vadd.f32 %v349_v34, %v835_v2 }
  0xbc   :  { %472 = vst [vmem:[%s1000_s3 + $0x90] sm:$0xff] %v440_v35  ;;  %v425_v37 = vpack.c.bf16 %v350_v36, %v261_v33 }
  0xbe   :  { %457 = vst [vmem:[%s1000_s3 + $0x18] sm:$0xff] %v425_v37  ;;  %v300_v38 = vpop.f32.mrf.mxu2 }
  0xbf   :  { %v301_v39 = vadd.f32 %v300_v38, %v833_v1  ;;  %v389_v40 = vpop.f32.mrf.mxu3 }
  0xc0   :  { %v390_v41 = vadd.f32 %v389_v40, %v835_v2  ;;  %v263_v42 = vpop.f32.mrf.mxu0 }
  0xc1   :  { %v264_v43 = vadd.f32 %v263_v42, %v833_v1  ;;  %v352_v44 = vpop.f32.mrf.mxu1 }
  0xc2   :  { %v441_v45 = vpack.c.bf16 %v390_v41, %v301_v39  ;;  %v353_v46 = vadd.f32 %v352_v44, %v835_v2 }
  0xc4   :  { %473 = vst [vmem:[%s1000_s3 + $0x98] sm:$0xff] %v441_v45  ;;  %v426_v47 = vpack.c.bf16 %v353_v46, %v264_v43 }
  0xc6   :  { %458 = vst [vmem:[%s1000_s3 + $0x20] sm:$0xff] %v426_v47  ;;  %v303_v48 = vpop.f32.mrf.mxu2 }
  0xc7   :  { %v304_v49 = vadd.f32 %v303_v48, %v833_v1  ;;  %v392_v50 = vpop.f32.mrf.mxu3 }
  0xc8   :  { %v393_v51 = vadd.f32 %v392_v50, %v835_v2  ;;  %v265_v52 = vpop.f32.mrf.mxu0 }
  0xc9   :  { %v266_v53 = vadd.f32 %v265_v52, %v833_v1  ;;  %v354_v54 = vpop.f32.mrf.mxu1 }
  0xca   :  { %v442_v55 = vpack.c.bf16 %v393_v51, %v304_v49  ;;  %v355_v56 = vadd.f32 %v354_v54, %v835_v2 }
  0xcc   :  { %474 = vst [vmem:[%s1000_s3 + $0xa0] sm:$0xff] %v442_v55  ;;  %v427_v57 = vpack.c.bf16 %v355_v56, %v266_v53 }
  0xce   :  { %459 = vst [vmem:[%s1000_s3 + $0x28] sm:$0xff] %v427_v57  ;;  %v305_v58 = vpop.f32.mrf.mxu2 }
  0xcf   :  { %v306_v59 = vadd.f32 %v305_v58, %v833_v1  ;;  %v394_v60 = vpop.f32.mrf.mxu3 }
  0xd0   :  { %v395_v61 = vadd.f32 %v394_v60, %v835_v2  ;;  %v268_v62 = vpop.f32.mrf.mxu0 }
  0xd1   :  { %v269_v63 = vadd.f32 %v268_v62, %v833_v1  ;;  %v357_v0 = vpop.f32.mrf.mxu1 }
  0xd2   :  { %v443_v3 = vpack.c.bf16 %v395_v61, %v306_v59  ;;  %v358_v4 = vadd.f32 %v357_v0, %v835_v2 }
  0xd4   :  { %475 = vst [vmem:[%s1000_s3 + $0xa8] sm:$0xff] %v443_v3  ;;  %v428_v5 = vpack.c.bf16 %v358_v4, %v269_v63 }
  0xd6   :  { %460 = vst [vmem:[%s1000_s3 + $0x30] sm:$0xff] %v428_v5  ;;  %v308_v6 = vpop.f32.mrf.mxu2 }
  0xd7   :  { %v309_v7 = vadd.f32 %v308_v6, %v833_v1  ;;  %v397_v8 = vpop.f32.mrf.mxu3 }
  0xd8   :  { %v398_v9 = vadd.f32 %v397_v8, %v835_v2  ;;  %v270_v10 = vpop.f32.mrf.mxu0 }
  0xd9   :  { %v271_v11 = vadd.f32 %v270_v10, %v833_v1  ;;  %v359_v12 = vpop.f32.mrf.mxu1 }
  0xda   :  { %v444_v13 = vpack.c.bf16 %v398_v9, %v309_v7  ;;  %v360_v14 = vadd.f32 %v359_v12, %v835_v2 }
  0xdc   :  { %476 = vst [vmem:[%s1000_s3 + $0xb0] sm:$0xff] %v444_v13  ;;  %v429_v15 = vpack.c.bf16 %v360_v14, %v271_v11 }
  0xde   :  { %461 = vst [vmem:[%s1000_s3 + $0x38] sm:$0xff] %v429_v15  ;;  %v310_v16 = vpop.f32.mrf.mxu2 }
  0xdf   :  { %v311_v17 = vadd.f32 %v310_v16, %v833_v1  ;;  %v399_v18 = vpop.f32.mrf.mxu3 }
  0xe0   :  { %v400_v19 = vadd.f32 %v399_v18, %v835_v2  ;;  %v273_v20 = vpop.f32.mrf.mxu0 }
  0xe1   :  { %v274_v21 = vadd.f32 %v273_v20, %v833_v1  ;;  %v362_v22 = vpop.f32.mrf.mxu1 }
  0xe2   :  { %v445_v23 = vpack.c.bf16 %v400_v19, %v311_v17  ;;  %v363_v24 = vadd.f32 %v362_v22, %v835_v2 }
  0xe4   :  { %477 = vst [vmem:[%s1000_s3 + $0xb8] sm:$0xff] %v445_v23  ;;  %v430_v25 = vpack.c.bf16 %v363_v24, %v274_v21 }
  0xe6   :  { %462 = vst [vmem:[%s1000_s3 + $0x40] sm:$0xff] %v430_v25  ;;  %v313_v26 = vpop.f32.mrf.mxu2 }
  0xe7   :  { %v314_v27 = vadd.f32 %v313_v26, %v833_v1  ;;  %v402_v28 = vpop.f32.mrf.mxu3 }
  0xe8   :  { %v403_v29 = vadd.f32 %v402_v28, %v835_v2  ;;  %v275_v30 = vpop.f32.mrf.mxu0 }
  0xe9   :  { %v276_v31 = vadd.f32 %v275_v30, %v833_v1  ;;  %v364_v32 = vpop.f32.mrf.mxu1 }
  0xea   :  { %v446_v33 = vpack.c.bf16 %v403_v29, %v314_v27  ;;  %v365_v34 = vadd.f32 %v364_v32, %v835_v2 }
  0xec   :  { %478 = vst [vmem:[%s1000_s3 + $0xc0] sm:$0xff] %v446_v33  ;;  %v431_v35 = vpack.c.bf16 %v365_v34, %v276_v31 }
  0xee   :  { %463 = vst [vmem:[%s1000_s3 + $0x48] sm:$0xff] %v431_v35  ;;  %v315_v36 = vpop.f32.mrf.mxu2 }
  0xef   :  { %v316_v37 = vadd.f32 %v315_v36, %v833_v1  ;;  %v404_v38 = vpop.f32.mrf.mxu3 }
  0xf0   :  { %v405_v39 = vadd.f32 %v404_v38, %v835_v2  ;;  %v278_v40 = vpop.f32.mrf.mxu0 }
  0xf1   :  { %v279_v41 = vadd.f32 %v278_v40, %v833_v1  ;;  %v367_v42 = vpop.f32.mrf.mxu1 }
  0xf2   :  { %v447_v43 = vpack.c.bf16 %v405_v39, %v316_v37  ;;  %v368_v44 = vadd.f32 %v367_v42, %v835_v2 }
  0xf4   :  { %479 = vst [vmem:[%s1000_s3 + $0xc8] sm:$0xff] %v447_v43  ;;  %v432_v45 = vpack.c.bf16 %v368_v44, %v279_v41 }
  0xf6   :  { %464 = vst [vmem:[%s1000_s3 + $0x50] sm:$0xff] %v432_v45  ;;  %v318_v46 = vpop.f32.mrf.mxu2 }
  0xf7   :  { %v319_v47 = vadd.f32 %v318_v46, %v833_v1  ;;  %v407_v48 = vpop.f32.mrf.mxu3 }
  0xf8   :  { %v408_v49 = vadd.f32 %v407_v48, %v835_v2  ;;  %v280_v50 = vpop.f32.mrf.mxu0 }
  0xf9   :  { %v281_v51 = vadd.f32 %v280_v50, %v833_v1  ;;  %v369_v52 = vpop.f32.mrf.mxu1 }
  0xfa   :  { %v448_v53 = vpack.c.bf16 %v408_v49, %v319_v47  ;;  %v370_v54 = vadd.f32 %v369_v52, %v835_v2 }
  0xfc   :  { %480 = vst [vmem:[%s1000_s3 + $0xd0] sm:$0xff] %v448_v53  ;;  %v433_v55 = vpack.c.bf16 %v370_v54, %v281_v51 }
  0xfe   :  { %465 = vst [vmem:[%s1000_s3 + $0x58] sm:$0xff] %v433_v55  ;;  %v320_v56 = vpop.f32.mrf.mxu2 }
  0xff   :  { %v321_v57 = vadd.f32 %v320_v56, %v833_v1  ;;  %v409_v58 = vpop.f32.mrf.mxu3 }
 0x100   :  { %v410_v59 = vadd.f32 %v409_v58, %v835_v2  ;;  %v283_v60 = vpop.f32.mrf.mxu0 }
 0x101   :  { %v284_v61 = vadd.f32 %v283_v60, %v833_v1  ;;  %v372_v62 = vpop.f32.mrf.mxu1 }
 0x102   :  { %v449_v63 = vpack.c.bf16 %v410_v59, %v321_v57  ;;  %v373_v0 = vadd.f32 %v372_v62, %v835_v2 }
 0x104   :  { %481 = vst [vmem:[%s1000_s3 + $0xd8] sm:$0xff] %v449_v63  ;;  %v434_v3 = vpack.c.bf16 %v373_v0, %v284_v61 }
 0x106   :  { %466 = vst [vmem:[%s1000_s3 + $0x60] sm:$0xff] %v434_v3  ;;  %v323_v4 = vpop.f32.mrf.mxu2 }
 0x107   :  { %v324_v5 = vadd.f32 %v323_v4, %v833_v1  ;;  %v412_v6 = vpop.f32.mrf.mxu3 }
 0x108   :  { %v413_v7 = vadd.f32 %v412_v6, %v835_v2  ;;  %v285_v8 = vpop.f32.mrf.mxu0 }
 0x109   :  { %v286_v9 = vadd.f32 %v285_v8, %v833_v1  ;;  %v374_v10 = vpop.f32.mrf.mxu1 }
 0x10a   :  { %v450_v11 = vpack.c.bf16 %v413_v7, %v324_v5  ;;  %v375_v12 = vadd.f32 %v374_v10, %v835_v2 }
 0x10c   :  { %482 = vst [vmem:[%s1000_s3 + $0xe0] sm:$0xff] %v450_v11  ;;  %v435_v13 = vpack.c.bf16 %v375_v12, %v286_v9 }
 0x10e   :  { %467 = vst [vmem:[%s1000_s3 + $0x68] sm:$0xff] %v435_v13  ;;  %v325_v14 = vpop.f32.mrf.mxu2 }
 0x10f   :  { %v326_v15 = vadd.f32 %v325_v14, %v833_v1  ;;  %v414_v16 = vpop.f32.mrf.mxu3 }
 0x110   :  { %v415_v17 = vadd.f32 %v414_v16, %v835_v2  ;;  %v288_v18 = vpop.f32.mrf.mxu0 }
 0x111   :  { %v289_v19 = vadd.f32 %v288_v18, %v833_v1  ;;  %v377_v20 = vpop.f32.mrf.mxu1 }
 0x112   :  { %v451_v21 = vpack.c.bf16 %v415_v17, %v326_v15  ;;  %v378_v22 = vadd.f32 %v377_v20, %v835_v2 }
 0x114   :  { %483 = vst [vmem:[%s1000_s3 + $0xe8] sm:$0xff] %v451_v21  ;;  %v436_v23 = vpack.c.bf16 %v378_v22, %v289_v19 }
 0x116   :  { %468 = vst [vmem:[%s1000_s3 + $0x70] sm:$0xff] %v436_v23  ;;  %v328_v24 = vpop.f32.mrf.mxu2 }
 0x117   :  { %v329_v25 = vadd.f32 %v328_v24, %v833_v1  ;;  %v417_v26 = vpop.f32.mrf.mxu3 }
 0x118   :  { %v418_v27 = vadd.f32 %v417_v26, %v835_v2  ;;  %v290_v28 = vpop.f32.mrf.mxu0 }
 0x119   :  { %v291_v29 = vadd.f32 %v290_v28, %v833_v1  ;;  %v379_v30 = vpop.f32.mrf.mxu1 }
 0x11a   :  { %v452_v31 = vpack.c.bf16 %v418_v27, %v329_v25  ;;  %v380_v32 = vadd.f32 %v379_v30, %v835_v2 }
 0x11c   :  { %484 = vst [vmem:[%s1000_s3 + $0xf0] sm:$0xff] %v452_v31  ;;  %v437_v33 = vpack.c.bf16 %v380_v32, %v291_v29 }
 0x11e   :  { %469 = vst [vmem:[%s1000_s3 + $0x78] sm:$0xff] %v437_v33  ;;  %v330_v34 = vpop.f32.mrf.mxu2 }
 0x11f   :  { %v331_v35 = vadd.f32 %v330_v34, %v833_v1  ;;  %v419_v36 = vpop.f32.mrf.mxu3 }
 0x120   :  { %v420_v37 = vadd.f32 %v419_v36, %v835_v2 }
 0x122   :  { %v453_v38 = vpack.c.bf16 %v420_v37, %v331_v35 }
 0x124   :  { %485 = vst [vmem:[%s1000_s3 + $0xf8] sm:$0xff] %v453_v38 }

// kernel: paired_transformer_encoder_layer.12
= control target key start
LH: loop header
LB: loop body
LE: loop exit
PB: predicated region body
PF: predicated region fallthrough
CT: control target
= control target key end

     0   :  { %s2478_s0 = inlined_call_operand.vmem [shape: bf16[2,8,128], index: 0, kind: input, shape index: {}]   ;;  %s2479_s1 = inlined_call_operand.vmem [shape: bf16[2,128,256], index: 1, kind: input, shape index: {}, may-alias: {1,2}]   ;;  %s2480_s2 = inlined_call_operand.vmem [shape: bf16[2,128,256], index: 2, kind: input, shape index: {}, may-alias: {1,2}]   ;;  %s2481_s3 = inlined_call_operand.vmem [shape: f32[2,1,128], index: 3, kind: input, shape index: {}]   ;;  %s2482_s4 = inlined_call_operand.hbm [shape: bf16[128,128], index: 4, kind: input, shape index: {}]   ;;  %s2483_s5 = inlined_call_operand.vmem [shape: f32[1,128], index: 5, kind: input, shape index: {}]   ;;  %s2484_s6 = inlined_call_operand.vmem [shape: bf16[2,8,128], index: 6, kind: input, shape index: {}]   ;;  %s2485_s7 = inlined_call_operand.vmem [shape: f32[1,128], index: 7, kind: input, shape index: {}]   ;;  %s2486_s8 = inlined_call_operand.vmem [shape: f32[1,128], index: 8, kind: input, shape index: {}]   ;;  %s2487_s9 = inlined_call_operand.vmem [shape: bf16[2,8,128], index: 9, kind: output, shape index: {0}]   ;;  %s2488_s10 = inlined_call_operand.hbm [shape: bf16[2,8,128], index: 10, kind: output, shape index: {1}]  }
   0x1   :  { %2490 = sst [smem:[#allocation12_spill]] %s2478_s0 }
   0x2   :  { %2491 = sst [smem:[#allocation13_spill]] %s2479_s1 }
   0x3   :  { %2492 = sst [smem:[#allocation14_spill]] %s2480_s2 }
   0x4   :  { %2493 = sst [smem:[#allocation15_spill]] %s2482_s4 }
   0x5   :  { %16 = vsyncpa [#allocation5], 0 }
   0x6   :  { %17 = vsyncpa [#allocation6], 0 }
   0x7   :  { %19 = vsyncpa [#allocation6 + $0x1], 0  ;;  %s2046_s13 = smov 0   ;;  %s2048_s14 = smov 0  }
   0x8   :  { %s2050_s15 = smov 0   ;;  %s2052_s16 = smov 0  }
   0x9   :  { %s2054_s17 = smov 0   ;;  %s2056_s18 = smov 0  }
   0xa LB: > { %s1605_s19 = sadd.s32 4294967295, %s1982_s18   ;;  %s1606_s20 = sadd.s32 4294967294, %s1982_s18   ;;  %s1982_s18 = sphi %s2056_s18, %s25_s18   ;;  %s1978_s17 = sphi %s2054_s17, %s2511_s17   ;;  %s1974_s16 = sphi %s2052_s16, %s2510_s16   ;;  %s1970_s15 = sphi %s2050_s15, %s2509_s15   ;;  %s1966_s14 = sphi %s2048_s14, %s2508_s14   ;;  %s1962_s13 = sphi %s2046_s13, %s2507_s13  }
   0xb   : > { %s37_s21 = sadd.s32 1, %s1978_s17  ;;  %s72_s22 = sadd.s32 1, %s1970_s15 }
   0xc   : > { %p39_p0 = scmp.ge.s32.totalorder %s37_s21, 2  ;;  %p79_p1 = scmp.ne.s32.totalorder %s1970_s15, %s1966_s14 }
   0xd   : > { %p80_p2 = scmp.eq.s32.totalorder %s1982_s18, 0  ;;  %p303_p3 = scmp.eq.s32.totalorder %s1605_s19, 1 }
   0xe   : > { %s2513_s21 = smov (%p39_p0, %s37_s21), 0  ;;  %p308_p6 = scmp.ne.s32.totalorder %s1966_s14, %s1962_s13 }
   0xf   : > { %2494 = sst [smem:[#allocation10_spill]] %s2513_s21  ;;  %p2085_p4 = por %p80_p2, %p79_p1 }
  0x10   : > { %p2089_p5 = por %p303_p3, %p79_p1  ;;  %s69_s25 = ssub.s32 %s1978_s17, %s2513_s21 }
  0x11   : > { %p70_p7 = scmp.eq.s32.totalorder %s69_s25, 0  ;;  %p309_p8 = scmp.eq.s32.totalorder %s1606_s20, 1 }
  0x12   : > { %p1607_p9 = scmp.ge.s32.totalorder %s1982_s18, 1  ;;  %p316_p10 = scmp.lt.s32.totalorder %s1982_s18, 3 }
  0x13   : > { %s2100_s26 = scalar_select %p70_p7, %s1970_s15, %s72_s22  }
  0x14   : > { %p2102_p11 = por %p309_p8, %p308_p6  ;;  %p2106_p12 = pnand %p1607_p9, %p316_p10 }
  0x15   : > { %2497 = sst [smem:[#allocation11_spill]] %s2100_s26  ;;  %p2110_p13 = scmp.eq.s32.totalorder %s1605_s19, 0 }
  0x16   : > { %p1780_p0 = pneg %p2106_p12  ;;  %s2501_s4 = sld [smem:[#allocation15_spill]] }
  0x17   : > { %s1984_s20 = smov [#allocation4]   ;;  %s1985_s25 = smov 64  }
  0x18   : > { %s329_s22 = sshll.u32 %s1984_s20, 4  ;;  %p1781_p1 = pnand %p2110_p13, %p1780_p0  ;;  %s330_s22 = int_to_ptr.vmem [resolvable:$true] %s329_s22 }
  0x19   : > { %s1986_s21 = smov 4   ;;  %p1609_p2 = scmp.ge.s32.totalorder %s1982_s18, 2 }
  0x1b   : > { %348 = sbr.rel (%p1609_p2) target bundleno = 84 (0x54), region = 32 }
  0x1c   : > { %s327_s12 = sshll.u32 %s2501_s4, 4  ;;  %s328_s12 = int_to_ptr.hbm [resolvable:$true] %s327_s12 }
  0x1d   : > { %1783 = dma.hbm_to_vmem [thread:$0]  (!%p1781_p1), %s328_s12, 1024, %s330_s22, [#allocation5], %s1985_s25, %s1985_s25, %s1986_s21  }
  0x20   : > { %361 = sbr.rel (!%p2085_p4) target bundleno = 58 (0x3a), region = 40  ;;  %s363_s19 = sand.u32 (%p2085_p4), 1, %s1970_s15  }
  0x21   : > { %s1748_s30 = sshll.u32 (%p2085_p4), %s1978_s17, 7  ;;  %s1610_s11 = sshll.u32 (%p2085_p4), %s363_s19, 6 }
  0x22   : > { %s2502_s1 = sld [smem:[#allocation13_spill]] (%p2085_p4)  ;;  %s365_s21 = scalar_lea.vmem (%p2085_p4), [#allocation2], %s1610_s11 }
  0x28   : > { %s2131_s26 = scalar_lea.vmem %s2502_s1, %s1748_s30 }
  0x29   : > { %v385_v0 = vld [vmem:[%s2131_s26] sm:$0xf]  ;;  %v387_v1 = vld [vmem:[%s2131_s26 + $0x8] sm:$0xf]  ;;  %v389_v2 = vld [vmem:[%s2131_s26 + $0x10] sm:$0xf] }
  0x2a   : > { %386 = vst [vmem:[%s365_s21] sm:$0xf] %v385_v0  ;;  %v391_v3 = vld [vmem:[%s2131_s26 + $0x18] sm:$0xf]  ;;  %v393_v4 = vld [vmem:[%s2131_s26 + $0x20] sm:$0xf] }
  0x2b   : > { %388 = vst [vmem:[%s365_s21 + $0x4] sm:$0xf] %v387_v1  ;;  %v395_v5 = vld [vmem:[%s2131_s26 + $0x28] sm:$0xf]  ;;  %v397_v6 = vld [vmem:[%s2131_s26 + $0x30] sm:$0xf] }
  0x2c   : > { %390 = vst [vmem:[%s365_s21 + $0x8] sm:$0xf] %v389_v2  ;;  %v399_v7 = vld [vmem:[%s2131_s26 + $0x38] sm:$0xf]  ;;  %v401_v8 = vld [vmem:[%s2131_s26 + $0x40] sm:$0xf] }
  0x2d   : > { %392 = vst [vmem:[%s365_s21 + $0xc] sm:$0xf] %v391_v3  ;;  %v403_v9 = vld [vmem:[%s2131_s26 + $0x48] sm:$0xf]  ;;  %v405_v10 = vld [vmem:[%s2131_s26 + $0x50] sm:$0xf] }
  0x2e   : > { %394 = vst [vmem:[%s365_s21 + $0x10] sm:$0xf] %v393_v4  ;;  %v407_v11 = vld [vmem:[%s2131_s26 + $0x58] sm:$0xf]  ;;  %v409_v12 = vld [vmem:[%s2131_s26 + $0x60] sm:$0xf] }
  0x2f   : > { %396 = vst [vmem:[%s365_s21 + $0x14] sm:$0xf] %v395_v5  ;;  %v411_v13 = vld [vmem:[%s2131_s26 + $0x68] sm:$0xf]  ;;  %v413_v14 = vld [vmem:[%s2131_s26 + $0x70] sm:$0xf] }
  0x30   : > { %398 = vst [vmem:[%s365_s21 + $0x18] sm:$0xf] %v397_v6  ;;  %v415_v15 = vld [vmem:[%s2131_s26 + $0x78] sm:$0xf] }
  0x31   : > { %400 = vst [vmem:[%s365_s21 + $0x1c] sm:$0xf] %v399_v7 }
  0x32   : > { %402 = vst [vmem:[%s365_s21 + $0x20] sm:$0xf] %v401_v8 }
  0x33   : > { %404 = vst [vmem:[%s365_s21 + $0x24] sm:$0xf] %v403_v9 }
  0x34   : > { %406 = vst [vmem:[%s365_s21 + $0x28] sm:$0xf] %v405_v10 }
  0x35   : > { %408 = vst [vmem:[%s365_s21 + $0x2c] sm:$0xf] %v407_v11 }
  0x36   : > { %410 = vst [vmem:[%s365_s21 + $0x30] sm:$0xf] %v409_v12 }
  0x37   : > { %412 = vst [vmem:[%s365_s21 + $0x34] sm:$0xf] %v411_v13 }
  0x38   : > { %414 = vst [vmem:[%s365_s21 + $0x38] sm:$0xf] %v413_v14 }
  0x39   : > { %416 = vst [vmem:[%s365_s21 + $0x3c] sm:$0xf] %v415_v15 }
  0x3a PF: > { %472 = sbr.rel (!%p2085_p4) target bundleno = 84 (0x54), region = 81  ;;  %s474_s4 = sand.u32 (%p2085_p4), 1, %s1970_s15  }
  0x3b   : > { %s1749_s12 = sshll.u32 (%p2085_p4), %s1978_s17, 7  ;;  %s1613_s22 = sshll.u32 (%p2085_p4), %s474_s4, 6 }
  0x3c   : > { %s2503_s2 = sld [smem:[#allocation14_spill]] (%p2085_p4)  ;;  %s476_s23 = scalar_lea.vmem (%p2085_p4), [#allocation3], %s1613_s22 }
  0x42   : > { %s2156_s30 = scalar_lea.vmem %s2503_s2, %s1749_s12 }
  0x43   : > { %v1616_v16 = vld [vmem:[%s2156_s30 + $0x4] sm:$0xf]  ;;  %v1617_v17 = vld [vmem:[%s2156_s30 + $0xc] sm:$0xf]  ;;  %v1618_v18 = vld [vmem:[%s2156_s30 + $0x14] sm:$0xf] }
  0x44   : > { %498 = vst [vmem:[%s476_s23] sm:$0xf] %v1616_v16  ;;  %v1619_v19 = vld [vmem:[%s2156_s30 + $0x1c] sm:$0xf]  ;;  %v1620_v20 = vld [vmem:[%s2156_s30 + $0x24] sm:$0xf] }
  0x45   : > { %500 = vst [vmem:[%s476_s23 + $0x4] sm:$0xf] %v1617_v17  ;;  %v1621_v21 = vld [vmem:[%s2156_s30 + $0x2c] sm:$0xf]  ;;  %v1622_v22 = vld [vmem:[%s2156_s30 + $0x34] sm:$0xf] }
  0x46   : > { %502 = vst [vmem:[%s476_s23 + $0x8] sm:$0xf] %v1618_v18  ;;  %v1623_v23 = vld [vmem:[%s2156_s30 + $0x3c] sm:$0xf]  ;;  %v1624_v24 = vld [vmem:[%s2156_s30 + $0x44] sm:$0xf] }
  0x47   : > { %504 = vst [vmem:[%s476_s23 + $0xc] sm:$0xf] %v1619_v19  ;;  %v1625_v25 = vld [vmem:[%s2156_s30 + $0x4c] sm:$0xf]  ;;  %v1626_v26 = vld [vmem:[%s2156_s30 + $0x54] sm:$0xf] }
  0x48   : > { %506 = vst [vmem:[%s476_s23 + $0x10] sm:$0xf] %v1620_v20  ;;  %v1627_v27 = vld [vmem:[%s2156_s30 + $0x5c] sm:$0xf]  ;;  %v1628_v28 = vld [vmem:[%s2156_s30 + $0x64] sm:$0xf] }
  0x49   : > { %508 = vst [vmem:[%s476_s23 + $0x14] sm:$0xf] %v1621_v21  ;;  %v1629_v29 = vld [vmem:[%s2156_s30 + $0x6c] sm:$0xf]  ;;  %v1630_v30 = vld [vmem:[%s2156_s30 + $0x74] sm:$0xf] }
  0x4a   : > { %510 = vst [vmem:[%s476_s23 + $0x18] sm:$0xf] %v1622_v22  ;;  %v1631_v31 = vld [vmem:[%s2156_s30 + $0x7c] sm:$0xf] }
  0x4b   : > { %512 = vst [vmem:[%s476_s23 + $0x1c] sm:$0xf] %v1623_v23 }
  0x4c   : > { %514 = vst [vmem:[%s476_s23 + $0x20] sm:$0xf] %v1624_v24 }
  0x4d   : > { %516 = vst [vmem:[%s476_s23 + $0x24] sm:$0xf] %v1625_v25 }
  0x4e   : > { %518 = vst [vmem:[%s476_s23 + $0x28] sm:$0xf] %v1626_v26 }
  0x4f   : > { %520 = vst [vmem:[%s476_s23 + $0x2c] sm:$0xf] %v1627_v27 }
  0x50   : > { %522 = vst [vmem:[%s476_s23 + $0x30] sm:$0xf] %v1628_v28 }
  0x51   : > { %524 = vst [vmem:[%s476_s23 + $0x34] sm:$0xf] %v1629_v29 }
  0x52   : > { %526 = vst [vmem:[%s476_s23 + $0x38] sm:$0xf] %v1630_v30 }
  0x53   : > { %528 = vst [vmem:[%s476_s23 + $0x3c] sm:$0xf] %v1631_v31 }
  0x54 PF: > { %603 = sbr.rel (%p2106_p12) target bundleno = 1875 (0x753), region = 130  ;;  %s2177_s26 = sand.u32 (!%p2106_p12), 1, %s1966_s14  }
  0x55   : > { %s1633_s11 = sshll.u32 (!%p2106_p12), %s2177_s26, 6 }
  0x56   : > { %s608_s20 = scalar_lea.vmem (!%p2106_p12), [#allocation2], %s1633_s11  ;;  %s2180_s21 = scalar_lea.vmem (!%p2106_p12), [#allocation3], %s1633_s11 }
  0x59   : > { %1953 = dma.done.wait (%p2110_p13), [#allocation5], 1024  }
  0x5a   : > { %1955 = vsyncadd (%p2110_p13), [#allocation5], 4294966272  ;;  %p683_p3 = scmp.lt.s32.totalorder %s1974_s16, 1  ;;  %v2190_v32 = vld [vmem:[%s608_s20 + $0x38] sm:$0xff]  ;;  %v2192_v33 = vld [vmem:[%s608_s20 + $0x28] sm:$0xff]  ;;  %s1987_s28 = smov 96  }
  0x5b   : > { %v2194_v34 = vld [vmem:[%s608_s20 + $0x18] sm:$0xff]  ;;  %921 = vrot.lane.b32.xlu0 %v2190_v32, %s1987_s28  ;;  %917 = vrot.lane.b32.xlu1 %v2192_v33, %s1987_s28  ;;  %s2504_s0 = sld [smem:[#allocation12_spill]]  ;;  %v2209_v35 = vld [vmem:[%s608_s20 + $0x30] sm:$0xff]  ;;  %vm785_vm0 = vcmask 261120   ;;  %s1745_s11 = sshll.u32 %s1974_s16, 2 }
  0x5c   : > { %s2188_s4 = scalar_select %p683_p3, %s1974_s16, 1  ;;  %913 = vrot.lane.b32.xlu2 %v2194_v34, %s1987_s28  ;;  %v2211_v36 = vld [vmem:[%s608_s20 + $0x20] sm:$0xff]  ;;  %v2213_v37 = vld [vmem:[%s608_s20 + $0x10] sm:$0xff]  ;;  %v2221_v40 = vld [vmem:[%s608_s20 + $0x8] sm:$0xff]  ;;  %v811_v43 = vsel %vm785_vm0, %v2190_v32, 0  ;;  %v808_v44 = vsel %vm785_vm0, %v2209_v35, 0 }
  0x5d   : > { %v2223_v41 = vld [vmem:[%s608_s20] sm:$0xff]  ;;  %813 = vmatpush.bf16.xpose.msra.mxu0 %v811_v43  ;;  %v805_v45 = vsel %vm785_vm0, %v2192_v33, 0  ;;  %v802_v48 = vsel %vm785_vm0, %v2211_v36, 0  ;;  %v799_v52 = vsel %vm785_vm0, %v2194_v34, 0  ;;  %v796_v54 = vsel %vm785_vm0, %v2213_v37, 0  ;;  %v2264_v5 = vld [vmem:[%s2180_s21 + $0x38] sm:$0xff] }
  0x5e   : > { %s2201_s29 = sshll.u32 %s2188_s4, 2  ;;  %s692_s23 = scalar_lea.vmem %s2481_s3, %s2188_s4  ;;  %v793_v58 = vsel %vm785_vm0, %v2221_v40, 0  ;;  %v790_v60 = vsel %vm785_vm0, %v2223_v41, 0  ;;  %v2267_v7 = vld [vmem:[%s2180_s21 + $0x30] sm:$0xff]  ;;  %884 = vmatpush.bf16.msra.mxu1 %v2264_v5  ;;  %v2275_v8 = vld [vmem:[%s2180_s21 + $0x28] sm:$0xff]  ;;  %v2279_v9 = vld [vmem:[%s2180_s21 + $0x20] sm:$0xff] }
  0x5f   : > { %v2287_v10 = vld [vmem:[%s2180_s21 + $0x18] sm:$0xff]  ;;  %v2295_v11 = vld [vmem:[%s692_s23] ss:$0 sm:$0xff]  ;;  %v2301_v12 = vld [vmem:[%s2180_s21 + $0x10] sm:$0xff]  ;;  %s1988_s4 = smov 64   ;;  %s699_s19 = scalar_lea.vmem %s2484_s6, %s2201_s29 }
  0x60   : > { %v2306_v15 = vld [vmem:[%s2180_s21 + $0x8] sm:$0xff]  ;;  %v2313_v17 = vld [vmem:[%s2180_s21] sm:$0xff]  ;;  %s1989_s21 = smov 32   ;;  %s1920_s16 = scalar_lea.hbm %s2488_s10, 8 }
  0x61   : > { %s689_s25 = scalar_lea.vmem %s2504_s0, %s2201_s29 }
  0x62   : > { %v708_v38 = vld [vmem:[%s689_s25] sm:$0xf]  ;;  %885 = vmatpush.bf16.msra.mxu1 %v2267_v7  ;;  %s1410_s25 = scalar_lea.sflag [#allocation6], %s2177_s26 }
  0x63   : > { %919 = vrot.lane.b32.xlu0 %v2209_v35, %s1987_s28  ;;  %915 = vrot.lane.b32.xlu1 %v2211_v36, %s1987_s28  ;;  %v903_v39 = vunpack.c.l.b16 %v708_v38 }
  0x64   : > { %911 = vrot.lane.b32.xlu2 %v2213_v37, %s1987_s28 }
  0x65   : > { %v2225_v42 = vpack.c.b16 %v903_v39, %v903_v39  ;;  %814 = vmatpush.bf16.xpose.msra.mxu0 %v808_v44 }
  0x66   : > { %886 = vmatpush.bf16.msra.mxu1 %v2275_v8 }
  0x6a   : > { %887 = vmatpush.bf16.msra.mxu1 %v2279_v9 }
  0x6b   : > { %909 = vrot.lane.b32.xlu0 %v2221_v40, %s1987_s28  ;;  %907 = vrot.lane.b32.xlu1 %v2223_v41, %s1987_s28 }
  0x6c   : > { %905 = vrot.lane.b32.xlu2 %v2225_v42, %s1987_s28 }
  0x6d   : > { %815 = vmatpush.bf16.xpose.msra.mxu0 %v805_v45 }
  0x6e   : > { %888 = vmatpush.bf16.msra.mxu1 %v2287_v10 }
  0x72   : > { %889 = vmatpush.bf16.msra.mxu1 %v2301_v12 }
  0x73   : > { %987 = vrot.lane.b32.xlu1 %v2264_v5, %s1987_s28 }
  0x74   : > { %985 = vrot.lane.b32.xlu2 %v2267_v7, %s1987_s28 }
  0x75   : > { %816 = vmatpush.bf16.xpose.msra.mxu0 %v802_v48 }
  0x76   : > { %890 = vmatpush.bf16.msra.mxu1 %v2306_v15 }
  0x7a   : > { %891 = vmatpush.bf16.msra.mxu1 %v2313_v17 }
  0x7b   : > { %983 = vrot.lane.b32.xlu1 %v2275_v8, %s1987_s28 }
  0x7c   : > { %981 = vrot.lane.b32.xlu2 %v2279_v9, %s1987_s28 }
  0x7d   : > { %817 = vmatpush.bf16.xpose.msra.mxu0 %v799_v52 }
  0x83   : > { %979 = vrot.lane.b32.xlu1 %v2287_v10, %s1987_s28 }
  0x85   : > { %818 = vmatpush.bf16.xpose.msra.mxu0 %v796_v54 }
  0x8b   : > { %977 = vrot.lane.b32.xlu1 %v2301_v12, %s1987_s28 }
  0x8d   : > { %819 = vmatpush.bf16.xpose.msra.mxu0 %v793_v58  ;;  %v1768_v58 = vld [vmem:[#allocation4 + $0x10] sm:$0xff] }
  0x93   : > { %975 = vrot.lane.b32.xlu1 %v2306_v15, %s1987_s28 }
  0x95   : > { %820 = vmatpush.bf16.xpose.msra.mxu0 %v790_v60 }
  0x9b   : > { %973 = vrot.lane.b32.xlu1 %v2313_v17, %s1987_s28  ;;  %s1636_s28 = sshll.u32 %s2177_s26, 2 }
  0x9c   : > { %1672 = vmatmul.msk.bf16.vlgmr.msra.gmra.mxu0 %vm785_vm0, %v708_v38  ;;  %s2416_s12 = scalar_lea.vmem [#allocation7], %s1636_s28 }
  0x9d   : > { %s1426_s28 = sshll.u32 %s2416_s12, 4  ;;  %s1427_s28 = int_to_ptr.vmem [resolvable:$true] %s1426_s28 }
  0xb6   : > { %v914_v57 = vpop.permute.xlu2 %913 }
  0xb7   : > { %v936_v59 = vsel %vm785_vm0, %v914_v57, 0 }
  0xbe   : > { %v912_v61 = vpop.permute.xlu2 %911 }
  0xbf   : > { %v933_v62 = vsel %vm785_vm0, %v912_v61, 0 }
  0xc6   : > { %v906_v3 = vpop.permute.xlu2 %905 }
  0xcd   : > { %v922_v46 = vpop.permute.xlu0 %921  ;;  %v918_v51 = vpop.permute.xlu1 %917 }
  0xce   : > { %v948_v47 = vsel %vm785_vm0, %v922_v46, 0  ;;  %v942_v53 = vsel %vm785_vm0, %v918_v51, 0  ;;  %v986_v20 = vpop.permute.xlu2 %985 }
  0xcf   : > { %950 = vmatpush.bf16.xpose.msra.mxu2 %v948_v47 }
  0xd5   : > { %v920_v49 = vpop.permute.xlu0 %919  ;;  %v916_v55 = vpop.permute.xlu1 %915 }
  0xd6   : > { %v945_v50 = vsel %vm785_vm0, %v920_v49, 0  ;;  %v939_v56 = vsel %vm785_vm0, %v916_v55, 0  ;;  %v982_v22 = vpop.permute.xlu2 %981 }
  0xd7   : > { %951 = vmatpush.bf16.xpose.msra.mxu2 %v945_v50 }
  0xdd   : > { %v910_v63 = vpop.permute.xlu0 %909  ;;  %v908_v1 = vpop.permute.xlu1 %907 }
  0xde   : > { %v930_v0 = vsel %vm785_vm0, %v910_v63, 0  ;;  %v927_v2 = vsel %vm785_vm0, %v908_v1, 0 }
  0xdf   : > { %952 = vmatpush.bf16.xpose.msra.mxu2 %v942_v53 }
  0xe5   : > { %v988_v19 = vpop.permute.xlu1 %987 }
  0xe6   : > { %997 = vmatpush.bf16.msra.mxu3 %v988_v19 }
  0xe7   : > { %953 = vmatpush.bf16.xpose.msra.mxu2 %v939_v56  ;;  %v1769_v56 = vld [vmem:[#allocation4 + $0x18] sm:$0xff] }
  0xe8   : > { %1036 = vmatpush.bf16.msrb.mxu1 %v1769_v56 }
  0xea   : > { %998 = vmatpush.bf16.msra.mxu3 %v986_v20 }
  0xec   : > { %1037 = vmatpush.bf16.msrb.mxu1 %v1768_v58  ;;  %v1771_v58 = vld [vmem:[#allocation4 + $0x28] sm:$0xff] }
  0xed   : > { %v984_v21 = vpop.permute.xlu1 %983  ;;  %1203 = vmatpush.bf16.msrb.mxu0 %v1771_v58 }
  0xee   : > { %999 = vmatpush.bf16.msra.mxu3 %v984_v21 }
  0xef   : > { %954 = vmatpush.bf16.xpose.msra.mxu2 %v936_v59 }
  0xf2   : > { %1000 = vmatpush.bf16.msra.mxu3 %v982_v22 }
  0xf5   : > { %v980_v31 = vpop.permute.xlu1 %979 }
  0xf6   : > { %1001 = vmatpush.bf16.msra.mxu3 %v980_v31 }
  0xf7   : > { %955 = vmatpush.bf16.xpose.msra.mxu2 %v933_v62 }
  0xff   : > { %956 = vmatpush.bf16.xpose.msra.mxu2 %v930_v0 }
 0x107   : > { %957 = vmatpush.bf16.xpose.msra.mxu2 %v927_v2 }
 0x10e   : > { %1705 = vmatmul.msk.bf16.vlgmr.msra.gmra.mxu2 %vm785_vm0, %v906_v3 }
 0x119   : > { %v822_v4 = vpop.f32.mrf.mxu0 }
 0x11a   : > { %v823_v16 = vadd.f32 %v2295_v11, %v822_v4  ;;  %v1767_v4 = vld [vmem:[#allocation4 + $0x8] sm:$0xff] }
 0x121   : > { %v824_v6 = vpop.f32.mrf.mxu0 }
 0x191   : > { %v959_v13 = vpop.f32.mrf.mxu2 }
 0x192   : > { %v960_v14 = vadd.f32 %v2295_v11, %v959_v13 }
 0x194   : > { %963 = vmax.xlane.f32.xlu0 %v960_v14 }
 0x199   : > { %v961_v18 = vpop.f32.mrf.mxu2 }
 0x19c   : > { %826 = vmax.xlane.f32.xlu0 %v823_v16 }
 0x1b0   : > { %1088 = vrot.lane.b32.xlu0 %v2190_v32, %s1988_s4 }
 0x1b8   : > { %1084 = vrot.lane.b32.xlu0 %v2192_v33, %s1988_s4 }
 0x1c0   : > { %1082 = vrot.lane.b32.xlu0 %v2211_v36, %s1988_s4 }
 0x1c8   : > { %1078 = vrot.lane.b32.xlu0 %v2213_v37, %s1988_s4 }
 0x1d0   : > { %1072 = vrot.lane.b32.xlu0 %v2225_v42, %s1988_s4 }
 0x1d8   : > { %1226 = vrot.lane.b32.xlu0 %v2209_v35, %s1989_s21 }
 0x1e0   : > { %1222 = vrot.lane.b32.xlu0 %v2211_v36, %s1989_s21  ;;  %v978_v36 = vpop.permute.xlu1 %977 }
 0x1e1   : > { %1002 = vmatpush.bf16.msra.mxu3 %v978_v36 }
 0x1e8   : > { %1216 = vrot.lane.b32.xlu0 %v2221_v40, %s1989_s21  ;;  %v976_v38 = vpop.permute.xlu1 %975 }
 0x1e9   : > { %1003 = vmatpush.bf16.msra.mxu3 %v976_v38 }
 0x1f0   : > { %v974_v39 = vpop.permute.xlu1 %973 }
 0x1f1   : > { %1004 = vmatpush.bf16.msra.mxu3 %v974_v39 }
 0x1f5   : > { %1064 = vmatpush.bf16.msrb.mxu3 %v1767_v4 }
 0x207   : > { %v964_v23 = vpop.xlane.xlu0 %963 }
 0x208   : > { %v965_v24 = vsub.f32 %v960_v14, %v964_v23 }
 0x20a   : > { %v966_v25 = vmul.f32 1.442695, %v965_v24 }
 0x20c   : > { %1850 = vpow2.f32 %v966_v25 }
 0x20f   : > { %v827_v26 = vpop.xlane.xlu0 %826 }
 0x210   : > { %v828_v27 = vsub.f32 %v823_v16, %v827_v26  ;;  %v1766_v26 = vld [vmem:[#allocation4] sm:$0xff] }
 0x211   : > { %1065 = vmatpush.bf16.msrb.mxu3 %v1766_v26 }
 0x212   : > { %v1851_v28 = vpop.eup %1850  ;;  %v829_v29 = vmul.f32 1.442695, %v828_v27 }
 0x213   : > { %968 = vadd.xlane.f32.xlu2 %v1851_v28 }
 0x214   : > { %1852 = vpow2.f32 %v829_v29 }
 0x21a   : > { %v1853_v30 = vpop.eup %1852 }
 0x21b   : > { %831 = vadd.xlane.f32.xlu1 %v1853_v30 }
 0x22b   : > { %1086 = vrot.lane.b32.xlu2 %v2209_v35, %s1988_s4 }
 0x233   : > { %1080 = vrot.lane.b32.xlu2 %v2194_v34, %s1988_s4 }
 0x234   : > { %1074 = vrot.lane.b32.xlu1 %v2223_v41, %s1988_s4 }
 0x23b   : > { %1076 = vrot.lane.b32.xlu2 %v2221_v40, %s1988_s4 }
 0x23c   : > { %1218 = vrot.lane.b32.xlu1 %v2213_v37, %s1989_s21 }
 0x243   : > { %1228 = vrot.lane.b32.xlu2 %v2190_v32, %s1989_s21  ;;  %v1089_v32 = vpop.permute.xlu0 %1088 }
 0x244   : > { %1212 = vrot.lane.b32.xlu1 %v2225_v42, %s1989_s21  ;;  %v1115_v59 = vsel %vm785_vm0, %v1089_v32, 0 }
 0x24b   : > { %1224 = vrot.lane.b32.xlu2 %v2192_v33, %s1989_s21  ;;  %v1085_v33 = vpop.permute.xlu0 %1084 }
 0x24c   : > { %1152 = vrot.lane.b32.xlu1 %v2267_v7, %s1988_s4  ;;  %v1109_v2 = vsel %vm785_vm0, %v1085_v33, 0 }
 0x253   : > { %1220 = vrot.lane.b32.xlu2 %v2194_v34, %s1989_s21  ;;  %v1083_v35 = vpop.permute.xlu0 %1082 }
 0x254   : > { %1148 = vrot.lane.b32.xlu1 %v2279_v9, %s1988_s4  ;;  %v1106_v13 = vsel %vm785_vm0, %v1083_v35, 0 }
 0x25b   : > { %1214 = vrot.lane.b32.xlu2 %v2223_v41, %s1989_s21  ;;  %v1079_v47 = vpop.permute.xlu0 %1078 }
 0x25c   : > { %v1100_v21 = vsel %vm785_vm0, %v1079_v47, 0 }
 0x263   : > { %1154 = vrot.lane.b32.xlu2 %v2264_v5, %s1988_s4  ;;  %v1073_v51 = vpop.permute.xlu0 %1072 }
 0x26b   : > { %1150 = vrot.lane.b32.xlu2 %v2275_v8, %s1988_s4  ;;  %v1227_v54 = vpop.permute.xlu0 %1226 }
 0x26c   : > { %v1252_v55 = vsel %vm785_vm0, %v1227_v54, 0 }
 0x273   : > { %1146 = vrot.lane.b32.xlu2 %v2287_v10, %s1988_s4  ;;  %v1223_v61 = vpop.permute.xlu0 %1222 }
 0x274   : > { %v1246_v63 = vsel %vm785_vm0, %v1223_v61, 0 }
 0x27b   : > { %1144 = vrot.lane.b32.xlu2 %v2301_v12, %s1988_s4  ;;  %v1217_v16 = vpop.permute.xlu0 %1216 }
 0x27c   : > { %v1237_v19 = vsel %vm785_vm0, %v1217_v16, 0 }
 0x283   : > { %1142 = vrot.lane.b32.xlu2 %v2306_v15, %s1988_s4 }
 0x286   : > { %v969_v34 = vpop.xlane.xlu2 %968 }
 0x287   : > { %1854 = vrcp.f32 %v969_v34 }
 0x28d   : > { %v1855_v37 = vpop.eup %1854 }
 0x28e   : > { %v832_v40 = vpop.xlane.xlu1 %831  ;;  %v971_v41 = vmul.f32 %v1855_v37, %v1851_v28  ;;  %v1087_v42 = vpop.permute.xlu2 %1086 }
 0x28f   : > { %1856 = vrcp.f32 %v832_v40  ;;  %v1112_v62 = vsel %vm785_vm0, %v1087_v42, 0 }
 0x290   : > { %v972_v43 = vpack.c.bf16 %v971_v41, %v971_v41 }
 0x292   : > { %1005 = vmatmul.bf16.vlgmr.msra.gmra.mxu3 %v972_v43 }
 0x295   : > { %v1857_v44 = vpop.eup %1856 }
 0x296   : > { %v834_v45 = vmul.f32 %v1857_v44, %v1853_v30  ;;  %v1081_v46 = vpop.permute.xlu2 %1080 }
 0x297   : > { %v1103_v18 = vsel %vm785_vm0, %v1081_v46, 0 }
 0x298   : > { %v835_v48 = vpack.c.bf16 %v834_v45, %v834_v45  ;;  %v2370_v49 = vadd.f32 %v971_v41, %v834_v45 }
 0x29a   : > { %892 = vmatmul.bf16.vlgmr.msra.gmra.mxu1 %v835_v48 }
 0x29b   : > { %1117 = vmatpush.bf16.xpose.msra.mxu1 %v1115_v59  ;;  %v1770_v59 = vld [vmem:[#allocation4 + $0x20] sm:$0xff] }
 0x29c   : > { %1204 = vmatpush.bf16.msrb.mxu0 %v1770_v59 }
 0x29e   : > { %v1077_v50 = vpop.permute.xlu2 %1076 }
 0x29f   : > { %v1097_v23 = vsel %vm785_vm0, %v1077_v50, 0 }
 0x2a3   : > { %1118 = vmatpush.bf16.xpose.msra.mxu1 %v1112_v62 }
 0x2a6   : > { %v1229_v52 = vpop.permute.xlu2 %1228  ;;  %v1075_v0 = vpop.permute.xlu1 %1074 }
 0x2a7   : > { %v1255_v53 = vsel %vm785_vm0, %v1229_v52, 0  ;;  %v1094_v25 = vsel %vm785_vm0, %v1075_v0, 0 }
 0x2a8   : > { %1257 = vmatpush.bf16.xpose.msrb.mxu2 %v1255_v53 }
 0x2ab   : > { %1119 = vmatpush.bf16.xpose.msra.mxu1 %v1109_v2 }
 0x2ae   : > { %v1225_v57 = vpop.permute.xlu2 %1224  ;;  %v1219_v6 = vpop.permute.xlu1 %1218 }
 0x2af   : > { %v1249_v60 = vsel %vm785_vm0, %v1225_v57, 0  ;;  %v1240_v14 = vsel %vm785_vm0, %v1219_v6, 0 }
 0x2b0   : > { %1258 = vmatpush.bf16.xpose.msrb.mxu2 %v1252_v55 }
 0x2b3   : > { %1120 = vmatpush.bf16.xpose.msra.mxu1 %v1106_v13 }
 0x2b6   : > { %v1221_v1 = vpop.permute.xlu2 %1220  ;;  %v1213_v24 = vpop.permute.xlu1 %1212 }
 0x2b7   : > { %v1243_v3 = vsel %vm785_vm0, %v1221_v1, 0 }
 0x2b8   : > { %1259 = vmatpush.bf16.xpose.msrb.mxu2 %v1249_v60 }
 0x2bb   : > { %1121 = vmatpush.bf16.xpose.msra.mxu1 %v1103_v18 }
 0x2be   : > { %v1215_v20 = vpop.permute.xlu2 %1214  ;;  %v1153_v52 = vpop.permute.xlu1 %1152 }
 0x2bf   : > { %v1234_v22 = vsel %vm785_vm0, %v1215_v20, 0 }
 0x2c0   : > { %1260 = vmatpush.bf16.xpose.msrb.mxu2 %v1246_v63 }
 0x2c3   : > { %1122 = vmatpush.bf16.xpose.msra.mxu1 %v1100_v21  ;;  %v1773_v21 = vld [vmem:[#allocation4 + $0x38] sm:$0xff] }
 0x2c6   : > { %v1155_v40 = vpop.permute.xlu2 %1154  ;;  %v1149_v53 = vpop.permute.xlu1 %1148 }
 0x2c7   : > { %1164 = vmatpush.bf16.msra.mxu3 %v1155_v40 }
 0x2c8   : > { %1261 = vmatpush.bf16.xpose.msrb.mxu2 %v1243_v3 }
 0x2cb   : > { %1123 = vmatpush.bf16.xpose.msra.mxu1 %v1097_v23  ;;  %1165 = vmatpush.bf16.msra.mxu3 %v1153_v52 }
 0x2ce   : > { %v1151_v45 = vpop.permute.xlu2 %1150 }
 0x2cf   : > { %1166 = vmatpush.bf16.msra.mxu3 %v1151_v45 }
 0x2d0   : > { %1262 = vmatpush.bf16.xpose.msrb.mxu2 %v1240_v14 }
 0x2d3   : > { %1124 = vmatpush.bf16.xpose.msra.mxu1 %v1094_v25  ;;  %1167 = vmatpush.bf16.msra.mxu3 %v1149_v53 }
 0x2d8   : > { %1263 = vmatpush.bf16.xpose.msrb.mxu2 %v1237_v19 }
 0x2e0   : > { %1264 = vmatpush.bf16.xpose.msrb.mxu2 %v1234_v22  ;;  %v1772_v22 = vld [vmem:[#allocation4 + $0x30] sm:$0xff] }
 0x2e7   : > { %1734 = vmatmul.msk.bf16.vlgmr.msrb.gmra.mxu2 %vm785_vm0, %v1213_v24 }
 0x315   : > { %v1006_v27 = vpop.f32.mrf.mxu3 }
 0x316   : > { %v1010_v28 = vpack.c.bf16 %v1006_v27, %v1006_v27 }
 0x317   : > { %v893_v29 = vpop.f32.mrf.mxu1 }
 0x318   : > { %v897_v30 = vpack.c.bf16 %v893_v29, %v893_v29  ;;  %1714 = vmatmul.msk.bf16.vlgmr.msrb.gmra.mxu1 %vm785_vm0, %v1010_v28  ;;  %v1357_v29 = vld [vmem:[%s699_s19] sm:$0xf] }
 0x31a   : > { %1723 = vmatmul.msk.bf16.vlgmr.msrb.gmra.mxu3 %vm785_vm0, %v897_v30  ;;  %v1847_v30 = vld [vmem:[%s2483_s5] ss:$0 sm:$0xff] }
 0x31d   : > { %v1008_v31 = vpop.f32.mrf.mxu3 }
 0x31f   : > { %v895_v36 = vpop.f32.mrf.mxu1 }
 0x328   : > { %1724 = vmatmul.msk.bf16.vlgmr.msra.gmra.mxu1 %vm785_vm0, %v1073_v51 }
 0x36a   : > { %v1266_v38 = vpop.f32.mrf.mxu2 }
 0x36b   : > { %v1267_v39 = vadd.f32 %v2295_v11, %v1266_v38  ;;  %v1358_v38 = vunpack.c.l.bf16 %v1357_v29 }
 0x36d   : > { %1270 = vmax.xlane.f32.xlu2 %v1267_v39 }
 0x372   : > { %v1268_v32 = vpop.f32.mrf.mxu2 }
 0x385   : > { %1286 = vrot.lane.b32.xlu2 %v2287_v10, %s1989_s21  ;;  %v1147_v10 = vpop.permute.xlu2 %1146 }
 0x386   : > { %1168 = vmatpush.bf16.msra.mxu3 %v1147_v10 }
 0x38d   : > { %v1145_v46 = vpop.permute.xlu2 %1144 }
 0x38e   : > { %1169 = vmatpush.bf16.msra.mxu3 %v1145_v46 }
 0x395   : > { %v1039_v33 = vpop.f32.mrf.mxu1  ;;  %v1143_v47 = vpop.permute.xlu2 %1142 }
 0x396   : > { %1170 = vmatpush.bf16.msra.mxu3 %v1143_v47 }
 0x39d   : > { %v1041_v34 = vpop.f32.mrf.mxu1  ;;  %v1067_v35 = vpop.f32.mrf.mxu3 }
 0x39e   : > { %v2395_v37 = vadd.f32 %v1067_v35, %v1039_v33  ;;  %v1990_v34 = vmov 128.0  }
 0x3a5   : > { %v1069_v41 = vpop.f32.mrf.mxu3  ;;  %v1126_v42 = vpop.f32.mrf.mxu1 }
 0x3a6   : > { %v1127_v43 = vadd.f32 %v2295_v11, %v1126_v42 }
 0x3a8   : > { %1130 = vmax.xlane.f32.xlu0 %v1127_v43 }
 0x3ad   : > { %v1128_v44 = vpop.f32.mrf.mxu1 }
 0x3bc   : > { %1140 = vrot.lane.b32.xlu0 %v2313_v17, %s1988_s4 }
 0x3c4   : > { %1294 = vrot.lane.b32.xlu0 %v2264_v5, %s1989_s21 }
 0x3cc   : > { %1290 = vrot.lane.b32.xlu0 %v2275_v8, %s1989_s21 }
 0x3d4   : > { %1288 = vrot.lane.b32.xlu0 %v2279_v9, %s1989_s21 }
 0x3e0   : > { %v1271_v48 = vpop.xlane.xlu2 %1270 }
 0x3e1   : > { %v1272_v11 = vsub.f32 %v1267_v39, %v1271_v48 }
 0x3e3   : > { %v1273_v50 = vmul.f32 1.442695, %v1272_v11 }
 0x3e5   : > { %1858 = vpow2.f32 %v1273_v50 }
 0x3e8   : > { %v1287_v6 = vpop.permute.xlu2 %1286 }
 0x3eb   : > { %v1859_v51 = vpop.eup %1858 }
 0x3fe   : > { %1275 = vadd.xlane.f32.xlu0 %v1859_v51 }
 0x41b   : > { %v1131_v5 = vpop.xlane.xlu0 %1130 }
 0x41c   : > { %v1132_v8 = vsub.f32 %v1127_v43, %v1131_v5 }
 0x41e   : > { %v1133_v54 = vmul.f32 1.442695, %v1132_v8 }
 0x420   : > { %1860 = vpow2.f32 %v1133_v54 }
 0x426   : > { %v1861_v9 = vpop.eup %1860 }
 0x427   : > { %1135 = vadd.xlane.f32.xlu1 %v1861_v9 }
 0x42e   : > { %v1141_v55 = vpop.permute.xlu0 %1140 }
 0x42f   : > { %1171 = vmatpush.bf16.msra.mxu3 %v1141_v55 }
 0x433   : > { %1343 = vmatpush.bf16.msrb.mxu3 %v1773_v21 }
 0x436   : > { %v1295_v56 = vpop.permute.xlu0 %1294 }
 0x437   : > { %1304 = vmatpush.bf16.msra.mxu0 %v1295_v56  ;;  %1344 = vmatpush.bf16.msrb.mxu3 %v1772_v22 }
 0x43e   : > { %v1291_v57 = vpop.permute.xlu0 %1290 }
 0x440   : > { %1292 = vrot.lane.b32.xlu1 %v2267_v7, %s1989_s21 }
 0x446   : > { %v1289_v60 = vpop.permute.xlu0 %1288 }
 0x448   : > { %1284 = vrot.lane.b32.xlu1 %v2301_v12, %s1989_s21 }
 0x450   : > { %1282 = vrot.lane.b32.xlu1 %v2306_v15, %s1989_s21 }
 0x458   : > { %1280 = vrot.lane.b32.xlu1 %v2313_v17, %s1989_s21  ;;  %s1424_s21 = scalar_lea.hbm %s2488_s10, %s1745_s11 }
 0x459   : > { %s1428_s22 = sshll.u32 %s1424_s21, 4  ;;  %s1429_s22 = int_to_ptr.hbm [resolvable:$true] %s1428_s22 }
 0x45a   : > { %s1914_s19 = sshra.s32 %s1429_s22, 4  ;;  %s1915_s19 = int_to_ptr.hbm [resolvable:$true] %s1914_s19 }
 0x45b   : > { %s1916_s30 = scalar_lea.hbm %s1915_s19, 4  ;;  %p1921_p8 = scmp.lt.s32.totalorder %s1915_s19, %s2488_s10 }
 0x45c   : > { %p1917_p4 = scmp.ne.s32.totalorder %s1915_s19, %s1916_s30  ;;  %p1922_p9 = scmp.lt.s32.totalorder %s1920_s16, %s1916_s30 }
 0x45e   : > { %p1918_p6 = pnand %p1917_p4, %p2089_p5  ;;  %p1923_p10 = por %p1922_p9, %p1921_p8 }
 0x460   : > { %p1919_p7 = pneg %p1918_p6 }
 0x462   : > { %p1924_p12 = pnand %p1923_p10, %p1919_p7 }
 0x471   : > { %v1276_v61 = vpop.xlane.xlu0 %1275 }
 0x472   : > { %1862 = vrcp.f32 %v1276_v61 }
 0x478   : > { %v1863_v12 = vpop.eup %1862 }
 0x479   : > { %v1278_v15 = vmul.f32 %v1863_v12, %v1859_v51 }
 0x47b   : > { %v1279_v20 = vpack.c.bf16 %v1278_v15, %v1278_v15 }
 0x49a   : > { %v1136_v7 = vpop.xlane.xlu1 %1135 }
 0x49b   : > { %1864 = vrcp.f32 %v1136_v7 }
 0x49c   : > { %1866 = vrcp.f32 %v1990_v34 }
 0x4a1   : > { %v1865_v62 = vpop.eup %1864 }
 0x4a2   : > { %v1138_v63 = vmul.f32 %v1865_v62, %v1861_v9  ;;  %v1867_v35 = vpop.eup %1866 }
 0x4a3   : > { %vm1367_vm1 = vweird.f32 %v1867_v35 }
 0x4a4   : > { %v1211_v0 = vadd.f32 %v1138_v63, %v2370_v49  ;;  %v1139_v17 = vpack.c.bf16 %v1138_v63, %v1138_v63 }
 0x4a6   : > { %1172 = vmatmul.bf16.vlgmr.msra.gmra.mxu3 %v1139_v17  ;;  %v1351_v1 = vadd.f32 %v1278_v15, %v1211_v0 }
 0x4a8   : > { %v1399_v2 = vmul.f32 0.25, %v1351_v1 }
 0x4aa   : > { %v1400_v3 = vpack.c.bf16 %v1399_v2, %v1399_v2 }
 0x4ac   : > { %1401 = vst [vmem:[%s2416_s12] sm:$0xf] %v1400_v3 }
 0x4b2   : > { %v1293_v4 = vpop.permute.xlu1 %1292 }
 0x4b3   : > { %1305 = vmatpush.bf16.msra.mxu0 %v1293_v4 }
 0x4b7   : > { %1306 = vmatpush.bf16.msra.mxu0 %v1291_v57 }
 0x4ba   : > { %v1285_v13 = vpop.permute.xlu1 %1284 }
 0x4bb   : > { %1307 = vmatpush.bf16.msra.mxu0 %v1289_v60 }
 0x4bf   : > { %1308 = vmatpush.bf16.msra.mxu0 %v1287_v6 }
 0x4c2   : > { %v1283_v14 = vpop.permute.xlu1 %1282 }
 0x4c3   : > { %1309 = vmatpush.bf16.msra.mxu0 %v1285_v13 }
 0x4c7   : > { %1310 = vmatpush.bf16.msra.mxu0 %v1283_v14 }
 0x4ca   : > { %v1281_v49 = vpop.permute.xlu1 %1280 }
 0x4cb   : > { %1311 = vmatpush.bf16.msra.mxu0 %v1281_v49 }
 0x529   : > { %v1173_v16 = vpop.f32.mrf.mxu3 }
 0x52a   : > { %v1177_v18 = vpack.c.bf16 %v1173_v16, %v1173_v16 }
 0x52c   : > { %1733 = vmatmul.msk.bf16.vlgmr.msrb.gmra.mxu0 %vm785_vm0, %v1177_v18 }
 0x531   : > { %v1175_v19 = vpop.f32.mrf.mxu3 }
 0x53c   : > { %1312 = vmatmul.bf16.vlgmr.msra.gmra.mxu0 %v1279_v20 }
 0x5a9   : > { %v1206_v23 = vpop.f32.mrf.mxu0 }
 0x5aa   : > { %v1210_v24 = vadd.f32 %v1206_v23, %v2395_v37  ;;  %v1363_v37 = vmul.f32 128.0, %v1867_v35 }
 0x5ac   : > { %v1364_v40 = vsub.f32 1.0, %v1363_v37 }
 0x5ae   : > { %v1365_v41 = vmul.f32 %v1867_v35, %v1364_v40 }
 0x5b0   : > { %v1366_v42 = vadd.f32 %v1867_v35, %v1365_v41 }
 0x5b1   : > { %v1208_v25 = vpop.f32.mrf.mxu0 }
 0x5b2   : > { %v1368_v43 = vsel %vm1367_vm1, %v1867_v35, %v1366_v42 }
 0x5b9   : > { %v1313_v26 = vpop.f32.mrf.mxu0 }
 0x5ba   : > { %v1317_v27 = vpack.c.bf16 %v1313_v26, %v1313_v26 }
 0x5bc   : > { %1743 = vmatmul.msk.bf16.vlgmr.msrb.gmra.mxu3 %vm785_vm0, %v1317_v27 }
 0x5c1   : > { %v1315_v28 = vpop.f32.mrf.mxu0 }
 0x63f   : > { %v1346_v31 = vpop.f32.mrf.mxu3 }
 0x640   : > { %v1350_v36 = vadd.f32 %v1346_v31, %v1210_v24 }
 0x642   : > { %v1356_v39 = vadd.f32 %v1847_v30, %v1350_v36 }
 0x644   : > { %v1359_v32 = vadd.f32 %v1358_v38, %v1356_v39 }
 0x646   : > { %1360 = vadd.xlane.f32.xlu2 %v1359_v32 }
 0x647   : > { %v1348_v33 = vpop.f32.mrf.mxu3 }
 0x6b9   : > { %v1361_v44 = vpop.xlane.xlu2 %1360 }
 0x6ba   : > { %v1369_v45 = vmul.f32 %v1368_v43, %v1361_v44 }
 0x6bc   : > { %v1370_v10 = vsub.f32 %v1359_v32, %v1369_v45 }
 0x6be   : > { %v1371_v46 = vmul.f32 %v1370_v10, %v1370_v10 }
 0x6c0   : > { %1372 = vadd.xlane.f32.xlu1 %v1371_v46 }
 0x6c1   : > { %1927 = shalt.err (!%p1924_p12)
}
 0x6c2   : > { %1778 = dma.vmem_to_hbm [thread:$0]  (%p2089_p5), %s1427_s28, 64, %s1429_s22, %s1410_s25   ;;  %v1848_v54 = vld [vmem:[%s2485_s7] ss:$0 sm:$0xff] }
 0x6c3   : > { %v1849_v55 = vld [vmem:[%s2486_s8] ss:$0 sm:$0xff]  ;;  %s706_s11 = scalar_lea.vmem %s2487_s9, %s2201_s29 }
 0x733   : > { %v1373_v47 = vpop.xlane.xlu1 %1372 }
 0x734   : > { %v1374_v48 = vmul.f32 %v1373_v47, %v1368_v43 }
 0x736   : > { %v1375_v11 = vadd.f32 1e-05, %v1374_v48 }
 0x738   : > { %1868 = vrsqrt.f32 %v1375_v11  ;;  %vm1382_vm3 = vweird.f32 %v1375_v11 }
 0x73e   : > { %v1869_v50 = vpop.eup %1868 }
 0x73f   : > { %v1377_v51 = vmul.f32 %v1869_v50, %v1375_v11  ;;  %vm1383_vm2 = vweird.f32 %v1869_v50 }
 0x740   : > { %vm1384_vm4 = vmor %vm1382_vm3, %vm1383_vm2 }
 0x741   : > { %v1378_v52 = vmul.f32 %v1869_v50, %v1377_v51 }
 0x743   : > { %v1379_v53 = vmul.f32 0.5, %v1378_v52 }
 0x745   : > { %v1380_v5 = vsub.f32 1.5, %v1379_v53 }
 0x747   : > { %v1381_v8 = vmul.f32 %v1869_v50, %v1380_v5 }
 0x749   : > { %v1385_v9 = vsel %vm1384_vm4, %v1869_v50, %v1381_v8 }
 0x74a   : > { %v1386_v56 = vmul.f32 %v1385_v9, %v1370_v10 }
 0x74c   : > { %v1391_v57 = vmul.f32 %v1848_v54, %v1386_v56 }
 0x74e   : > { %v1396_v58 = vadd.f32 %v1849_v55, %v1391_v57 }
 0x750   : > { %v1397_v59 = vpack.c.bf16 %v1396_v58, %v1396_v58 }
 0x752   : > { %1398 = vst [vmem:[%s706_s11] sm:$0xf] %v1397_v59 }
 0x753 PF: > { %s1450_s20 = sand.u32 1, %s1962_s13   ;;  %p1785_p5 = pnand %p1609_p2, %p2102_p11 }
 0x754   : > { %s1451_s4 = scalar_lea.sflag [#allocation6], %s1450_s20 }
 0x755   : > { %p1786_p13 = pneg %p1785_p5 }
 0x757   : > { %1957 = dma.done.wait (%p1786_p13), %s1451_s4, 64  }
 0x758   : > { %1959 = vsyncadd (%p1786_p13), %s1451_s4, 4294967232  ;;  %s25_s18 = sadd.s32 1, %s1982_s18   ;;  %s2505_s29 = sld [smem:[#allocation11_spill]] }
 0x759   : > { %p22_p0 = scmp.ge.s32.totalorder %s25_s18, 4   ;;  %s2506_s21 = sld [smem:[#allocation10_spill]] }
 0x75a   : > { %s2507_s13 = smov %s1966_s14  ;;  %s2508_s14 = smov %s1970_s15 }
 0x75b   : > { %s2510_s16 = smov %s1978_s17  ;;  %24 = sbr.rel (!%p22_p0) target bundleno = 10 (0xa), region = 212 }
 0x75e   : > { %s2509_s15 = smov %s2505_s29 }
 0x75f   : > { %s2511_s17 = smov %s2506_s21 }
 0x760   :  { %1457 = vsyncpa [#allocation5], 1 }
 0x761   :  { %1459 = vsyncpa [#allocation5 + $0x1], 1 }
 0x762   :  { %1460 = vsyncpa [#allocation6], 1 }
 0x763   :  { %1462 = vsyncpa [#allocation6 + $0x1], 1 }

</bundles_post_ra>
